<compile_context>
chip_gen: v7x
topology: tpu7x:2x2x1
jax: 0.10.0
libtpu: 0.0.40
codegen_flags: <defaults>
</compile_context>

<pallas_src>
from functools import partial

import jax
import jax.numpy as jnp
from jax.experimental import pallas as pl
from jax.experimental.pallas import tpu as pltpu


# ----------------------------------------------------------------------------
# Hardware-aware knobs
# ----------------------------------------------------------------------------

_SINGLE_TC_KINDS = ("v2", "v3", "v5 lite", "v5e", "v6 lite", "v6e")


def _grid_split(batch):
    """2-way batch split only on multi-TensorCore chips (v7x, v4/v5p megacore)."""
    try:
        kind = jax.devices()[0].device_kind.lower()
    except Exception:
        kind = ""
    multi_tc = not any(s in kind for s in _SINGLE_TC_KINDS)
    return 2 if (multi_tc and batch % 2 == 0) else 1


def _vmem_limit_bytes():
    """Derive the scoped-VMEM guardrail from the chip instead of hard-coding it."""
    try:
        cap = int(pltpu.get_tpu_info().vmem_capacity_bytes)
    except Exception:
        cap = 64 * 1024 * 1024
    return int(min(cap // 2, 64 * 1024 * 1024))


def _mosaic_params():
    return pltpu.CompilerParams(dimension_semantics=("parallel",),
                                vmem_limit_bytes=_vmem_limit_bytes())


# ----------------------------------------------------------------------------
# In-kernel EdgeConv building block
# ----------------------------------------------------------------------------

def _edge_max(x, idx, wd, wb, b, n_neighbors):
    """EdgeConv message + LeakyReLU + running max over the K neighbor slots.

    x   : (Bh, N, C)       center features (any float dtype)
    idx : (Bh, K, N) int32 per-sample neighbor indices (k-major)
    wd  : (C, Cout) bf16   weight acting on (x_j - x_i)
    wb  : (C, Cout) bf16   Wc - Wd (precomputed in the wrapper)
    b   : (1, Cout) f32    bias
    ->  (Bh, N, Cout) f32  max_j LeakyReLU((x_j - x_i) @ Wd + x_i @ Wc + b)

    Uses gather∘(X@Wd) == (gather X)@Wd: project centers ONCE, then select rows
    with a per-sample bf16 one-hot (0/1 is exact in bf16) in a single stacked
    batched MXU matmul.
    """
    Bh, N, C = x.shape
    Cout = wd.shape[1]
    K = n_neighbors
    M = Bh * N

    ctr = x.astype(jnp.bfloat16).reshape(M, C)
    yd = jnp.dot(ctr, wd, preferred_element_type=jnp.float32)            # (M, Cout)
    base = jnp.dot(ctr, wb, preferred_element_type=jnp.float32) + b      # x_i@(Wc-Wd)+b
    yd_b = yd.astype(jnp.bfloat16).reshape(Bh, N, Cout)
    base3 = base.reshape(Bh, N, Cout)

    # Per-sample (N, N) one-hots, stacked over K -> one batched MXU gather.
    # TODO(synk): at realistic N replace with a direct row gather (jnp.take / DMA).
    iota_n = jax.lax.broadcasted_iota(jnp.int32, (Bh, K, N, N), 3)
    onehot = (idx[:, :, :, None] == iota_n).astype(jnp.bfloat16)         # (Bh, K, N, N)
    onehot = onehot.reshape(Bh, K * N, N)
    gath = jnp.einsum('bpm,bmc->bpc', onehot, yd_b,
                      preferred_element_type=jnp.float32)                 # (Bh, K*N, Cout)
    gath = gath.reshape(Bh, K, N, Cout)

    acc = None
    for k in range(K):                       # K is small + static: unrolled
        y = gath[:, k] + base3
        y = jnp.where(y > 0, y, 0.2 * y)     # LeakyReLU(0.2), f32 on the VPU
        acc = y if acc is None else jnp.maximum(acc, y)
    return acc


# ----------------------------------------------------------------------------
# Pallas kernels
# ----------------------------------------------------------------------------

def _edgeconv_gram_kernel(x_ref, idx_ref, wd_ref, wb_ref, b_ref,
                          f_ref, g_ref, *, n_neighbors):
    """EdgeConv layer + neg-squared-distance Gram for the NEXT layer's kNN."""
    feat = _edge_max(x_ref[...], idx_ref[...], wd_ref[...], wb_ref[...],
                     b_ref[...], n_neighbors)                             # (Bh,N,Cout) f32
    feat_b = feat.astype(jnp.bfloat16)
    f_ref[...] = feat_b

    inner = jnp.einsum('bic,bjc->bij', feat_b, feat_b,
                       preferred_element_type=jnp.float32)                # (Bh, N, N)
    f2 = feat * feat
    sq_row = jnp.sum(f2, axis=-1, keepdims=True)                          # (Bh, N, 1)
    sq_col = jnp.sum(f2, axis=-1)[:, None, :]                             # (Bh, 1, N)
    g_ref[...] = 2.0 * inner - sq_row - sq_col                            # -||fi - fj||^2


def _edgeconv_pool_kernel(*refs, n_neighbors, n_prev):
    """Last EdgeConv layer fused with concat + 1x1 conv + LeakyReLU + global max pool.

    refs = (x, idx, wd, wb, b, f_1..f_P, w5_1..w5_{P+1}, b5, out)
      f_l  : (Bh, N, C_l) bf16  earlier-layer EdgeConv features
      w5_l : (C_l, E) bf16      row-slice of w5 matching the concat order
      out  : (Bh, E) f32        per-sample embedding
    """
    x_ref, idx_ref, wd_ref, wb_ref, b_ref = refs[:5]
    rest = refs[5:]
    f_refs = rest[:n_prev]
    w_refs = rest[n_prev:2 * n_prev + 1]
    b5_ref = rest[2 * n_prev + 1]
    o_ref = rest[2 * n_prev + 2]

    feat = _edge_max(x_ref[...], idx_ref[...], wd_ref[...], wb_ref[...],
                     b_ref[...], n_neighbors)                             # (Bh,N,C_L) f32
    Bh, N, C_last = feat.shape
    M = Bh * N
    f_last = feat.astype(jnp.bfloat16).reshape(M, C_last)   # never leaves VMEM

    # concat(f_l) @ w5 == sum_l f_l @ w5[rows_l]  -- no concatenated activation needed
    y = jnp.dot(f_last, w_refs[n_prev][...], preferred_element_type=jnp.float32)
    for l in range(n_prev):
        fl = f_refs[l][...]
        fl2 = fl.reshape(M, fl.shape[-1])
        y = y + jnp.dot(fl2, w_refs[l][...], preferred_element_type=jnp.float32)
    y = y + b5_ref[...]
    y = jnp.where(y > 0, y, 0.2 * y)                                      # LeakyReLU(0.2)

    E = y.shape[1]
    o_ref[...] = jnp.max(y.reshape(Bh, N, E), axis=1)                     # global max pool


# ----------------------------------------------------------------------------
# Wrappers around pallas_call
# ----------------------------------------------------------------------------

def edgeconv_gram(h, idx_kmaj, wd, wc, b):
    """h: (B, N, C), idx_kmaj: (B, K, N) -> (features (B,N,Cout) bf16, negdist (B,N,N) f32)."""
    B, N, C = h.shape
    K = idx_kmaj.shape[1]
    Cout = wd.shape[1]
    G = _grid_split(B)
    Bh = B // G

    wd_b = wd.astype(jnp.bfloat16)
    wb_b = (wc - wd).astype(jnp.bfloat16)        # W_base precomputed in the wrapper

    feat, negdist = pl.pallas_call(
        partial(_edgeconv_gram_kernel, n_neighbors=K),
        out_shape=(jax.ShapeDtypeStruct((B, N, Cout), jnp.bfloat16),
                   jax.ShapeDtypeStruct((B, N, N), jnp.float32)),
        grid=(G,),
        in_specs=[
            pl.BlockSpec((Bh, N, C), lambda g: (g, 0, 0)),
            pl.BlockSpec((Bh, K, N), lambda g: (g, 0, 0)),
            pl.BlockSpec((C, Cout), lambda g: (0, 0)),
            pl.BlockSpec((C, Cout), lambda g: (0, 0)),
            pl.BlockSpec((1, Cout), lambda g: (0, 0)),
        ],
        out_specs=[pl.BlockSpec((Bh, N, Cout), lambda g: (g, 0, 0)),
                   pl.BlockSpec((Bh, N, N), lambda g: (g, 0, 0))],
        compiler_params=_mosaic_params(),
    )(h, idx_kmaj, wd_b, wb_b, b)
    return feat, negdist


def edgeconv_pool(h, idx_kmaj, wd, wc, b, feats, w5, b5):
    """Last EdgeConv layer fused with the embedding head (concat, 1x1 conv, pool)."""
    B, N, C = h.shape
    K = idx_kmaj.shape[1]
    Cout = wd.shape[1]
    E = w5.shape[1]
    G = _grid_split(B)
    Bh = B // G
    n_prev = len(feats)

    wd_b = wd.astype(jnp.bfloat16)
    wb_b = (wc - wd).astype(jnp.bfloat16)
    w5_b = w5.astype(jnp.bfloat16)

    # Split w5 along its input-channel rows to match the concat order [f_1..f_P, f_last].
    chans = [f.shape[-1] for f in feats] + [Cout]
    splits, off = [], 0
    for c in chans:
        splits.append(w5_b[off:off + c])
        off += c

    in_specs = [
        pl.BlockSpec((Bh, N, C), lambda g: (g, 0, 0)),
        pl.BlockSpec((Bh, K, N), lambda g: (g, 0, 0)),
        pl.BlockSpec((C, Cout), lambda g: (0, 0)),
        pl.BlockSpec((C, Cout), lambda g: (0, 0)),
        pl.BlockSpec((1, Cout), lambda g: (0, 0)),
    ]
    in_specs += [pl.BlockSpec((Bh, N, f.shape[-1]), lambda g: (g, 0, 0)) for f in feats]
    in_specs += [pl.BlockSpec(w.shape, lambda g: (0, 0)) for w in splits]
    in_specs += [pl.BlockSpec((1, E), lambda g: (0, 0))]

    out = pl.pallas_call(
        partial(_edgeconv_pool_kernel, n_neighbors=K, n_prev=n_prev),
        out_shape=jax.ShapeDtypeStruct((G, Bh, E), jnp.float32),
        grid=(G,),
        in_specs=in_specs,
        out_specs=pl.BlockSpec((None, Bh, E), lambda g: (g, 0, 0)),
        compiler_params=_mosaic_params(),
    )(h, idx_kmaj, wd_b, wb_b, b, *feats, *splits, b5)
    return out.reshape(B, E)


# ----------------------------------------------------------------------------
# DGCNN backbone glue (only top_k + first graph stay in plain JAX)
# ----------------------------------------------------------------------------

def _neg_sqdist_jax(x):
    """x: (B, N, C) -> (B, N, N) negative squared pairwise distances (first layer only)."""
    xf = x.astype(jnp.float32)
    inner = jnp.einsum('bic,bjc->bij', xf, xf)
    sq = jnp.sum(xf * xf, axis=-1)
    return 2.0 * inner - sq[:, :, None] - sq[:, None, :]


def _knn_kmajor(negdist, k):
    """(B, N, N) neg distances -> (B, K, N) int32 k-major kNN indices (self included)."""
    idx = jax.lax.top_k(negdist, k)[1]                      # (B, N, K)
    return jnp.transpose(idx, (0, 2, 1)).astype(jnp.int32)  # (B, K, N)


def dgcnn_forward(x_ncw, params, k_nn):
    """x_ncw: (B, C_in, N) PyTorch layout -> (B, E) embedding."""
    h = jnp.transpose(x_ncw, (0, 2, 1)).astype(jnp.float32)   # (B, N, C_in)
    negdist = _neg_sqdist_jax(h)                              # first graph in JAX (tiny)

    convs = params['edgeconvs']
    feats = []
    for wd, wc, b in convs[:-1]:
        idx = _knn_kmajor(negdist, k_nn)                      # dynamic graph per layer
        h, negdist = edgeconv_gram(h, idx, wd, wc, b)         # Gram fused in-kernel
        feats.append(h)

    wd, wc, b = convs[-1]
    idx = _knn_kmajor(negdist, k_nn)
    return edgeconv_pool(h, idx, wd, wc, b, feats, params['w5'], params['b5'])


# ----------------------------------------------------------------------------
# fs_network forward (backbone='dgcnn_normal', fs='wrapped')
# ----------------------------------------------------------------------------

def proto_logits(support, queries, k_way, n_shot):
    """Tiny ProtoNet head (Q=4, k=2) -- plain JAX, not worth a kernel launch."""
    D = support.shape[-1]
    proto = jnp.mean(support.reshape(k_way, n_shot, D), axis=1)   # (k, D)
    diff = queries[:, None, :] - proto[None, :, :]                # (Q, k, D)
    return -jnp.sum(diff * diff, axis=-1)                         # (Q, k)


def fs_network_forward(x, label, params, k_way, n_shot, query, k_nn=8):
    emb = dgcnn_forward(x, params, k_nn)                          # (B, E)
    support = emb[: k_way * n_shot]
    queries = emb[k_way * n_shot:]

    logits = proto_logits(support, queries, k_way, n_shot)        # (Q, k)

    q_labels = jnp.asarray(label[1], dtype=jnp.int32)
    logp = jax.nn.log_softmax(logits, axis=-1)
    loss = -jnp.mean(jnp.take_along_axis(logp, q_labels[:, None], axis=1))
    pred = logits
    return pred, loss


# ----------------------------------------------------------------------------
# Deterministic parameter init
# ----------------------------------------------------------------------------

def init_params(key, c_in, conv_channels, emb_dim):
    def linear(k, cin, cout):
        k1, k2 = jax.random.split(k)
        s = 1.0 / jnp.sqrt(cin)
        w = jax.random.uniform(k1, (cin, cout), jnp.float32, -s, s)
        b = jax.random.uniform(k2, (1, cout), jnp.float32, -s, s)
        return w, b

    params = {'edgeconvs': []}
    c_prev = c_in
    for cout in conv_channels:
        key, kd, kc, kb = jax.random.split(key, 4)
        s = 1.0 / jnp.sqrt(2 * c_prev)
        wd = jax.random.uniform(kd, (c_prev, cout), jnp.float32, -s, s)
        wc = jax.random.uniform(kc, (c_prev, cout), jnp.float32, -s, s)
        b = jax.random.uniform(kb, (1, cout), jnp.float32, -s, s)
        params['edgeconvs'].append((wd, wc, b))
        c_prev = cout
    key, k5 = jax.random.split(key)
    params['w5'], params['b5'] = linear(k5, sum(conv_channels), emb_dim)
    return params


# ----------------------------------------------------------------------------
# main
# ----------------------------------------------------------------------------

if __name__ == "__main__":
    # few-shot episode config (k_way, n_shot, query)
    k_way, n_shot, query = 2, 1, 2
    B = k_way * n_shot + k_way * query        # 6 samples per episode
    C_in, N, K_NN = 3, 64, 8                  # point cloud: 64 points, xyz
    conv_channels = (32, 32, 64, 128)         # EdgeConv output channels
    emb_dim = 256

    key = jax.random.PRNGKey(0)
    kx, kp = jax.random.split(key)
    x = jax.random.normal(kx, (B, C_in, N), dtype=jnp.float32)    # PyTorch NCW layout

    support_labels = jnp.repeat(jnp.arange(k_way), n_shot)        # (k*n,)
    query_labels = jnp.repeat(jnp.arange(k_way), query)           # (k*q,)
    label = (support_labels, query_labels)

    params = init_params(kp, C_in, conv_channels, emb_dim)

    pred, loss = fs_network_forward(x, label, params, k_way, n_shot, query, k_nn=K_NN)
    jax.block_until_ready((pred, loss))

    assert pred.shape == (k_way * query, k_way)
    assert loss.shape == ()
    print("KERNEL_OK")
</pallas_src>

<mosaic_0001>
module attributes {stable_mosaic.version = 11 : i64} {
  func.func @_edgeconv_gram_kernel(%arg0: i32, %arg1: memref<3x64x3xf32, #tpu.memory_space<vmem>>, %arg2: memref<3x8x64xi32, #tpu.memory_space<vmem>>, %arg3: memref<3x32xbf16, #tpu.memory_space<vmem>>, %arg4: memref<3x32xbf16, #tpu.memory_space<vmem>>, %arg5: memref<1x32xf32, #tpu.memory_space<vmem>>, %arg6: memref<3x64x32xbf16, #tpu.memory_space<vmem>>, %arg7: memref<3x64x64xf32, #tpu.memory_space<vmem>>) attributes {dimension_semantics = [#tpu.dimension_semantics<parallel>], iteration_bounds = array<i64: 2>, scalar_prefetch = 0 : i64, scratch_operands = 0 : i64, tpu.core_type = #tpu.core_type<tc>, window_params = [{transform_indices = @transform_0, window_bounds = array<i64: 3, 64, 3>}, {transform_indices = @transform_1, window_bounds = array<i64: 3, 8, 64>}, {pipeline_mode = #tpu.pipeline_mode<synchronous>, transform_indices = @transform_2, window_bounds = array<i64: 3, 32>}, {pipeline_mode = #tpu.pipeline_mode<synchronous>, transform_indices = @transform_3, window_bounds = array<i64: 3, 32>}, {pipeline_mode = #tpu.pipeline_mode<synchronous>, transform_indices = @transform_4, window_bounds = array<i64: 1, 32>}, {transform_indices = @transform_5, window_bounds = array<i64: 3, 64, 32>}, {transform_indices = @transform_6, window_bounds = array<i64: 3, 64, 64>}]} {
    %c0 = arith.constant 0 : index
    %c0_0 = arith.constant 0 : index
    %c0_1 = arith.constant 0 : index
    %0 = vector.load %arg1[%c0, %c0_0, %c0_1] : memref<3x64x3xf32, #tpu.memory_space<vmem>>, vector<3x64x3xf32>
    %c0_2 = arith.constant 0 : index
    %c0_3 = arith.constant 0 : index
    %c0_4 = arith.constant 0 : index
    %1 = vector.load %arg2[%c0_2, %c0_3, %c0_4] : memref<3x8x64xi32, #tpu.memory_space<vmem>>, vector<3x8x64xi32>
    %c0_5 = arith.constant 0 : index
    %c0_6 = arith.constant 0 : index
    %2 = vector.load %arg3[%c0_5, %c0_6] : memref<3x32xbf16, #tpu.memory_space<vmem>>, vector<3x32xbf16>
    %c0_7 = arith.constant 0 : index
    %c0_8 = arith.constant 0 : index
    %3 = vector.load %arg4[%c0_7, %c0_8] : memref<3x32xbf16, #tpu.memory_space<vmem>>, vector<3x32xbf16>
    %c0_9 = arith.constant 0 : index
    %c0_10 = arith.constant 0 : index
    %4 = vector.load %arg5[%c0_9, %c0_10] : memref<1x32xf32, #tpu.memory_space<vmem>>, vector<1x32xf32>
    %5 = arith.truncf %0 : vector<3x64x3xf32> to vector<3x64x3xbf16>
    %6 = vector.shape_cast %5 : vector<3x64x3xbf16> to vector<192x3xbf16>
    %cst = arith.constant dense<0.000000e+00> : vector<192x32xf32>
    %7 = tpu.matmul %6, %2, %cst {dimension_numbers = #tpu.dot_dimension_numbers<[1], [0], [0], [1], [0, 0, 1, 1], [], []>} : vector<192x3xbf16>, vector<3x32xbf16>, vector<192x32xf32> -> vector<192x32xf32>
    %cst_11 = arith.constant dense<0.000000e+00> : vector<192x32xf32>
    %8 = tpu.matmul %6, %3, %cst_11 {dimension_numbers = #tpu.dot_dimension_numbers<[1], [0], [0], [1], [0, 0, 1, 1], [], []>} : vector<192x3xbf16>, vector<3x32xbf16>, vector<192x32xf32> -> vector<192x32xf32>
    %9 = vector.broadcast %4 : vector<1x32xf32> to vector<192x32xf32>
    %10 = arith.addf %8, %9 : vector<192x32xf32>
    %11 = arith.truncf %7 : vector<192x32xf32> to vector<192x32xbf16>
    %12 = vector.shape_cast %11 : vector<192x32xbf16> to vector<3x64x32xbf16>
    %13 = vector.shape_cast %10 : vector<192x32xf32> to vector<3x64x32xf32>
    %14 = tpu.iota {dimensions = array<i32: 3>} : vector<3x8x64x64xi32>
    %15 = vector.shape_cast %1 : vector<3x8x64xi32> to vector<3x8x64x1xi32>
    %16 = vector.broadcast %15 : vector<3x8x64x1xi32> to vector<3x8x64x64xi32>
    %17 = arith.cmpi eq, %16, %14 : vector<3x8x64x64xi32>
    %18 = arith.extui %17 : vector<3x8x64x64xi1> to vector<3x8x64x64xi32>
    %19 = arith.sitofp %18 : vector<3x8x64x64xi32> to vector<3x8x64x64xf32>
    %20 = arith.truncf %19 : vector<3x8x64x64xf32> to vector<3x8x64x64xbf16>
    %21 = vector.shape_cast %20 : vector<3x8x64x64xbf16> to vector<3x512x64xbf16>
    "tpu.trace_start"() <{level = 10 : i32, message = "bpm,bmc->bpc"}> : () -> ()
    %cst_12 = arith.constant dense<0.000000e+00> : vector<3x512x32xf32>
    %22 = tpu.matmul %21, %12, %cst_12 {dimension_numbers = #tpu.dot_dimension_numbers<[2], [1], [1], [2], [0, 0, 0, 1, 1, 2], [0], [0]>} : vector<3x512x64xbf16>, vector<3x64x32xbf16>, vector<3x512x32xf32> -> vector<3x512x32xf32>
    "tpu.trace_stop"() : () -> ()
    %23 = vector.shape_cast %22 : vector<3x512x32xf32> to vector<3x8x64x32xf32>
    %24 = vector.extract_strided_slice %23 {offsets = [0, 0, 0, 0], sizes = [3, 1, 64, 32], strides = [1, 1, 1, 1]} : vector<3x8x64x32xf32> to vector<3x1x64x32xf32>
    %25 = vector.shape_cast %24 : vector<3x1x64x32xf32> to vector<3x64x32xf32>
    %26 = arith.addf %25, %13 : vector<3x64x32xf32>
    %cst_13 = arith.constant 0.000000e+00 : f32
    %27 = vector.broadcast %cst_13 : f32 to vector<3x64x32xf32>
    %28 = arith.cmpf ogt, %26, %27 : vector<3x64x32xf32>
    %cst_14 = arith.constant 2.000000e-01 : f32
    %29 = vector.broadcast %cst_14 : f32 to vector<3x64x32xf32>
    %30 = arith.mulf %29, %26 : vector<3x64x32xf32>
    %31 = arith.select %28, %26, %30 : vector<3x64x32xi1>, vector<3x64x32xf32>
    %32 = vector.extract_strided_slice %23 {offsets = [0, 1, 0, 0], sizes = [3, 1, 64, 32], strides = [1, 1, 1, 1]} : vector<3x8x64x32xf32> to vector<3x1x64x32xf32>
    %33 = vector.shape_cast %32 : vector<3x1x64x32xf32> to vector<3x64x32xf32>
    %34 = arith.addf %33, %13 : vector<3x64x32xf32>
    %cst_15 = arith.constant 0.000000e+00 : f32
    %35 = vector.broadcast %cst_15 : f32 to vector<3x64x32xf32>
    %36 = arith.cmpf ogt, %34, %35 : vector<3x64x32xf32>
    %cst_16 = arith.constant 2.000000e-01 : f32
    %37 = vector.broadcast %cst_16 : f32 to vector<3x64x32xf32>
    %38 = arith.mulf %37, %34 : vector<3x64x32xf32>
    %39 = arith.select %36, %34, %38 : vector<3x64x32xi1>, vector<3x64x32xf32>
    %40 = arith.maximumf %31, %39 : vector<3x64x32xf32>
    %41 = vector.extract_strided_slice %23 {offsets = [0, 2, 0, 0], sizes = [3, 1, 64, 32], strides = [1, 1, 1, 1]} : vector<3x8x64x32xf32> to vector<3x1x64x32xf32>
    %42 = vector.shape_cast %41 : vector<3x1x64x32xf32> to vector<3x64x32xf32>
    %43 = arith.addf %42, %13 : vector<3x64x32xf32>
    %cst_17 = arith.constant 0.000000e+00 : f32
    %44 = vector.broadcast %cst_17 : f32 to vector<3x64x32xf32>
    %45 = arith.cmpf ogt, %43, %44 : vector<3x64x32xf32>
    %cst_18 = arith.constant 2.000000e-01 : f32
    %46 = vector.broadcast %cst_18 : f32 to vector<3x64x32xf32>
    %47 = arith.mulf %46, %43 : vector<3x64x32xf32>
    %48 = arith.select %45, %43, %47 : vector<3x64x32xi1>, vector<3x64x32xf32>
    %49 = arith.maximumf %40, %48 : vector<3x64x32xf32>
    %50 = vector.extract_strided_slice %23 {offsets = [0, 3, 0, 0], sizes = [3, 1, 64, 32], strides = [1, 1, 1, 1]} : vector<3x8x64x32xf32> to vector<3x1x64x32xf32>
    %51 = vector.shape_cast %50 : vector<3x1x64x32xf32> to vector<3x64x32xf32>
    %52 = arith.addf %51, %13 : vector<3x64x32xf32>
    %cst_19 = arith.constant 0.000000e+00 : f32
    %53 = vector.broadcast %cst_19 : f32 to vector<3x64x32xf32>
    %54 = arith.cmpf ogt, %52, %53 : vector<3x64x32xf32>
    %cst_20 = arith.constant 2.000000e-01 : f32
    %55 = vector.broadcast %cst_20 : f32 to vector<3x64x32xf32>
    %56 = arith.mulf %55, %52 : vector<3x64x32xf32>
    %57 = arith.select %54, %52, %56 : vector<3x64x32xi1>, vector<3x64x32xf32>
    %58 = arith.maximumf %49, %57 : vector<3x64x32xf32>
    %59 = vector.extract_strided_slice %23 {offsets = [0, 4, 0, 0], sizes = [3, 1, 64, 32], strides = [1, 1, 1, 1]} : vector<3x8x64x32xf32> to vector<3x1x64x32xf32>
    %60 = vector.shape_cast %59 : vector<3x1x64x32xf32> to vector<3x64x32xf32>
    %61 = arith.addf %60, %13 : vector<3x64x32xf32>
    %cst_21 = arith.constant 0.000000e+00 : f32
    %62 = vector.broadcast %cst_21 : f32 to vector<3x64x32xf32>
    %63 = arith.cmpf ogt, %61, %62 : vector<3x64x32xf32>
    %cst_22 = arith.constant 2.000000e-01 : f32
    %64 = vector.broadcast %cst_22 : f32 to vector<3x64x32xf32>
    %65 = arith.mulf %64, %61 : vector<3x64x32xf32>
    %66 = arith.select %63, %61, %65 : vector<3x64x32xi1>, vector<3x64x32xf32>
    %67 = arith.maximumf %58, %66 : vector<3x64x32xf32>
    %68 = vector.extract_strided_slice %23 {offsets = [0, 5, 0, 0], sizes = [3, 1, 64, 32], strides = [1, 1, 1, 1]} : vector<3x8x64x32xf32> to vector<3x1x64x32xf32>
    %69 = vector.shape_cast %68 : vector<3x1x64x32xf32> to vector<3x64x32xf32>
    %70 = arith.addf %69, %13 : vector<3x64x32xf32>
    %cst_23 = arith.constant 0.000000e+00 : f32
    %71 = vector.broadcast %cst_23 : f32 to vector<3x64x32xf32>
    %72 = arith.cmpf ogt, %70, %71 : vector<3x64x32xf32>
    %cst_24 = arith.constant 2.000000e-01 : f32
    %73 = vector.broadcast %cst_24 : f32 to vector<3x64x32xf32>
    %74 = arith.mulf %73, %70 : vector<3x64x32xf32>
    %75 = arith.select %72, %70, %74 : vector<3x64x32xi1>, vector<3x64x32xf32>
    %76 = arith.maximumf %67, %75 : vector<3x64x32xf32>
    %77 = vector.extract_strided_slice %23 {offsets = [0, 6, 0, 0], sizes = [3, 1, 64, 32], strides = [1, 1, 1, 1]} : vector<3x8x64x32xf32> to vector<3x1x64x32xf32>
    %78 = vector.shape_cast %77 : vector<3x1x64x32xf32> to vector<3x64x32xf32>
    %79 = arith.addf %78, %13 : vector<3x64x32xf32>
    %cst_25 = arith.constant 0.000000e+00 : f32
    %80 = vector.broadcast %cst_25 : f32 to vector<3x64x32xf32>
    %81 = arith.cmpf ogt, %79, %80 : vector<3x64x32xf32>
    %cst_26 = arith.constant 2.000000e-01 : f32
    %82 = vector.broadcast %cst_26 : f32 to vector<3x64x32xf32>
    %83 = arith.mulf %82, %79 : vector<3x64x32xf32>
    %84 = arith.select %81, %79, %83 : vector<3x64x32xi1>, vector<3x64x32xf32>
    %85 = arith.maximumf %76, %84 : vector<3x64x32xf32>
    %86 = vector.extract_strided_slice %23 {offsets = [0, 7, 0, 0], sizes = [3, 1, 64, 32], strides = [1, 1, 1, 1]} : vector<3x8x64x32xf32> to vector<3x1x64x32xf32>
    %87 = vector.shape_cast %86 : vector<3x1x64x32xf32> to vector<3x64x32xf32>
    %88 = arith.addf %87, %13 : vector<3x64x32xf32>
    %cst_27 = arith.constant 0.000000e+00 : f32
    %89 = vector.broadcast %cst_27 : f32 to vector<3x64x32xf32>
    %90 = arith.cmpf ogt, %88, %89 : vector<3x64x32xf32>
    %cst_28 = arith.constant 2.000000e-01 : f32
    %91 = vector.broadcast %cst_28 : f32 to vector<3x64x32xf32>
    %92 = arith.mulf %91, %88 : vector<3x64x32xf32>
    %93 = arith.select %90, %88, %92 : vector<3x64x32xi1>, vector<3x64x32xf32>
    %94 = arith.maximumf %85, %93 : vector<3x64x32xf32>
    %95 = arith.truncf %94 : vector<3x64x32xf32> to vector<3x64x32xbf16>
    %c0_29 = arith.constant 0 : index
    %c0_30 = arith.constant 0 : index
    %c0_31 = arith.constant 0 : index
    %96 = vector.load %arg6[%c0_29, %c0_30, %c0_31] : memref<3x64x32xbf16, #tpu.memory_space<vmem>>, vector<3x64x32xbf16>
    tpu.vector_store %arg6[%c0_29, %c0_30, %c0_31], %95 {strides = array<i32>} : memref<3x64x32xbf16, #tpu.memory_space<vmem>>, vector<3x64x32xbf16>,
    "tpu.trace_start"() <{level = 10 : i32, message = "bic,bjc->bij"}> : () -> ()
    %cst_32 = arith.constant dense<0.000000e+00> : vector<3x64x64xf32>
    %97 = tpu.matmul %95, %95, %cst_32 {dimension_numbers = #tpu.dot_dimension_numbers<[2], [2], [1], [1], [0, 0, 0, 1, 1, 1], [0], [0]>} : vector<3x64x32xbf16>, vector<3x64x32xbf16>, vector<3x64x64xf32> -> vector<3x64x64xf32>
    "tpu.trace_stop"() : () -> ()
    %98 = arith.mulf %94, %94 : vector<3x64x32xf32>
    %cst_33 = arith.constant dense<0.000000e+00> : vector<3x64xf32>
    %99 = vector.multi_reduction <add>, %98, %cst_33 [2] : vector<3x64x32xf32> to vector<3x64xf32>
    %100 = vector.shape_cast %99 : vector<3x64xf32> to vector<3x64x1xf32>
    %cst_34 = arith.constant dense<0.000000e+00> : vector<3x64xf32>
    %101 = vector.multi_reduction <add>, %98, %cst_34 [2] : vector<3x64x32xf32> to vector<3x64xf32>
    %102 = vector.shape_cast %101 : vector<3x64xf32> to vector<3x1x64xf32>
    %cst_35 = arith.constant 2.000000e+00 : f32
    %103 = vector.broadcast %cst_35 : f32 to vector<3x64x64xf32>
    %104 = arith.mulf %103, %97 : vector<3x64x64xf32>
    %105 = vector.broadcast %100 : vector<3x64x1xf32> to vector<3x64x64xf32>
    %106 = arith.subf %104, %105 : vector<3x64x64xf32>
    %107 = vector.broadcast %102 : vector<3x1x64xf32> to vector<3x64x64xf32>
    %108 = arith.subf %106, %107 : vector<3x64x64xf32>
    %c0_36 = arith.constant 0 : index
    %c0_37 = arith.constant 0 : index
    %c0_38 = arith.constant 0 : index
    %109 = vector.load %arg7[%c0_36, %c0_37, %c0_38] : memref<3x64x64xf32, #tpu.memory_space<vmem>>, vector<3x64x64xf32>
    tpu.vector_store %arg7[%c0_36, %c0_37, %c0_38], %108 {strides = array<i32>} : memref<3x64x64xf32, #tpu.memory_space<vmem>>, vector<3x64x64xf32>,
    return
  }
  func.func @transform_0(%arg0: i32) -> (i32, i32, i32) {
    %c0_i32 = arith.constant 0 : i32
    %c0_i32_0 = arith.constant 0 : i32
    %c0_i32_1 = arith.constant 0 : i32
    return %arg0, %c0_i32, %c0_i32_0 : i32, i32, i32
  }
  func.func @transform_1(%arg0: i32) -> (i32, i32, i32) {
    %c0_i32 = arith.constant 0 : i32
    %c0_i32_0 = arith.constant 0 : i32
    %c0_i32_1 = arith.constant 0 : i32
    return %arg0, %c0_i32, %c0_i32_0 : i32, i32, i32
  }
  func.func @transform_2(%arg0: i32) -> (i32, i32) {
    %c0_i32 = arith.constant 0 : i32
    %c0_i32_0 = arith.constant 0 : i32
    %c0_i32_1 = arith.constant 0 : i32
    return %c0_i32, %c0_i32_0 : i32, i32
  }
  func.func @transform_3(%arg0: i32) -> (i32, i32) {
    %c0_i32 = arith.constant 0 : i32
    %c0_i32_0 = arith.constant 0 : i32
    %c0_i32_1 = arith.constant 0 : i32
    return %c0_i32, %c0_i32_0 : i32, i32
  }
  func.func @transform_4(%arg0: i32) -> (i32, i32) {
    %c0_i32 = arith.constant 0 : i32
    %c0_i32_0 = arith.constant 0 : i32
    %c0_i32_1 = arith.constant 0 : i32
    return %c0_i32, %c0_i32_0 : i32, i32
  }
  func.func @transform_5(%arg0: i32) -> (i32, i32, i32) {
    %c0_i32 = arith.constant 0 : i32
    %c0_i32_0 = arith.constant 0 : i32
    %c0_i32_1 = arith.constant 0 : i32
    return %arg0, %c0_i32, %c0_i32_0 : i32, i32, i32
  }
  func.func @transform_6(%arg0: i32) -> (i32, i32, i32) {
    %c0_i32 = arith.constant 0 : i32
    %c0_i32_0 = arith.constant 0 : i32
    %c0_i32_1 = arith.constant 0 : i32
    return %arg0, %c0_i32, %c0_i32_0 : i32, i32, i32
  }
}

</mosaic_0001>

<bundles_post_ra>
// kernel: tpu_custom_call.1
= control target key start
LH: loop header
LB: loop body
LE: loop exit
PB: predicated region body
PF: predicated region fallthrough
CT: control target
= control target key end

     0   :  { %12 = vsyncpa [#allocation3], 0  ;;  %s9071_s0 = inlined_call_operand.vmem [shape: f32[6,64,3], index: 0, kind: input, shape index: {}]   ;;  %s9072_s1 = inlined_call_operand.vmem [shape: s32[6,8,64], index: 1, kind: input, shape index: {}]   ;;  %s9073_s2 = inlined_call_operand.vmem [shape: bf16[3,32], index: 2, kind: input, shape index: {}]   ;;  %s9074_s3 = inlined_call_operand.vmem [shape: bf16[3,32], index: 3, kind: input, shape index: {}]   ;;  %s9075_s4 = inlined_call_operand.vmem [shape: f32[1,32], index: 4, kind: input, shape index: {}]   ;;  %s9076_s5 = inlined_call_operand.vmem [shape: bf16[6,64,32], index: 5, kind: output, shape index: {0}]   ;;  %s9077_s6 = inlined_call_operand.hbm [shape: f32[6,64,64], index: 6, kind: output, shape index: {1}]  }
   0x1   :  { %14 = vsyncpa [#allocation3 + $0x1], 0  ;;  %s6147_s21 = smov 0   ;;  %s6149_s22 = smov 0  }
   0x2   :  { %s6151_s23 = smov 0   ;;  %s6153_s24 = smov 0  }
   0x3 LB: > { %s6168_s25 = sadd.s32 4294967295, %s6105_s24   ;;  %s5118_s26 = sadd.s32 4294967294, %s6105_s24   ;;  %s6105_s24 = sphi %s6153_s24, %s9346_s24   ;;  %s6101_s23 = sphi %s6151_s23, %s9345_s23   ;;  %s6097_s22 = sphi %s6149_s22, %s9344_s22   ;;  %s6093_s21 = sphi %s6147_s21, %s9343_s21  }
   0x4   : > { %s6172_s27 = sadd.s32 1, %s6105_s24   ;;  %s168_s28 = sadd.s32 1, %s6101_s23 }
   0x5   : > { %s165_s29 = ssub.s32 %s6105_s24, %s6172_s27  ;;  %p178_p0 = scmp.ne.s32.totalorder %s6101_s23, %s6097_s22 }
   0x6   : > { %p166_p1 = scmp.eq.s32.totalorder %s165_s29, 0  ;;  %p179_p2 = scmp.eq.s32.totalorder %s6168_s25, 1 }
   0x7   : > { %p184_p3 = scmp.ne.s32.totalorder %s6097_s22, %s6093_s21  ;;  %p185_p4 = scmp.eq.s32.totalorder %s5118_s26, 1 }
   0x8   : > { %s6183_s30 = scalar_select %p166_p1, %s6101_s23, %s168_s28  }
   0x9   : > { %p6185_p5 = por %p179_p2, %p178_p0  ;;  %p6189_p6 = por %p185_p4, %p184_p3 }
   0xa   : > { %p5121_p7 = scmp.ge.s32.totalorder %s6105_s24, 1  ;;  %p231_p8 = scmp.lt.s32.totalorder %s6105_s24, 3 }
   0xc   : > { %p232_p9 = pnand %p5121_p7, %p231_p8 }
   0xe   : > { %235 = sbr.rel (%p232_p9) target bundleno = 1033 (0x409), region = 40 }
  0x15   : > { %v322_v0 = vld [vmem:[%s9073_s2] sm:$0x3]  ;;  %vm374_vm0 = vcmask 1040384   ;;  %vm375_vm1 = vcmask 1041408   ;;  %s273_s11 = smul.u32 3, %s6168_s25  ;;  %v660_v1 = vlaneseq  ;;  %v6107_v2 = vmov 65535  }
  0x16   : > { %v376_v3 = vsel %vm374_vm0, 4294967295, %v6107_v2  ;;  %vm337_vm2 = vcmask 23552   ;;  %v323_v52 = vld [vmem:[%s9074_s3] sm:$0x3]  ;;  %vm2174_vm5 = vcmask 523264   ;;  %s270_s13 = sand.u32 1, %s6097_s22  }
  0x17   : > { %v6199_v4 = vsel %vm375_vm1, %v376_v3, 0  ;;  %p274_p10 = scmp.lt.s32.totalorder %s273_s11, 5  ;;  %v6202_v5 = vshrl.u32 %v660_v1, 7  ;;  %v6351_v62 = vand.u32 127, %v660_v1  ;;  %s5997_s14 = smul.u32 192, %s270_s13 }
  0x18   : > { %v379_v6 = vand.u32 %v6199_v4, %v322_v0  ;;  %v517_v53 = vand.u32 %v6199_v4, %v323_v52  ;;  %v9078_v4 = vmov 0.0   ;;  %s9030_s20 = scalar_lea.sflag [#allocation3], %s270_s13  ;;  %s6109_s28 = smov [#allocation2]  }
  0x19   : > { %9148 = vst [vmem:[#allocation5_spill] sm:$0xff] %v6202_v5  ;;  %s9348_s11 = smov (!%p274_p10, %s273_s11), 5  ;;  %v6208_v7 = vsub.s32 0, %v6202_v5  ;;  %v6265_v33 = vsub.s32 1, %v6202_v5  ;;  %v6296_v48 = vsub.s32 2, %v6202_v5  ;;  %v6302_v50 = vsub.s32 3, %v6202_v5 }
  0x1a   : > { %5667 = vmatprep.subr.bf16.mxu0 %v379_v6  ;;  %5983 = vmatprep.subr.bf16.mxu1 %v379_v6  ;;  %s5124_s12 = sshll.u32 %s9348_s11, 3  ;;  %s5480_s16 = sshll.u32 %s9348_s11, 6  ;;  %v6315_v54 = vsub.s32 4, %v6202_v5  ;;  %v6326_v56 = vsub.s32 5, %v6202_v5  ;;  %v6339_v58 = vsub.s32 6, %v6202_v5  ;;  %9149 = vst [vmem:[#allocation6_spill] sm:$0xff] %v6351_v62 }
  0x1b   : > { %5668 = vmatpush3.bf16.msra.mxu0 %v379_v6  ;;  %5984 = vmatpush3.bf16.msra.mxu1 %v379_v6  ;;  %s6214_s15 = scalar_lea.vmem %s9072_s1, %s5124_s12  ;;  %s6225_s19 = scalar_lea.vmem %s9071_s0, %s5480_s16  ;;  %v6362_v1 = vsub.s32 7, %v6202_v5  ;;  %v9166_v5 = vmov 0.0  }
  0x1c   : > { %v6217_v8 = vld [vmem:[%s6214_s15] sm:$0xff]  ;;  %v296_v11 = vld [vmem:[%s6225_s19 + $0x8] sm:$0xff]  ;;  %v297_v12 = vld [vmem:[%s6225_s19 + $0x10] sm:$0xff]  ;;  %5693 = vmatprep.subr.bf16.mxu1 %v517_v53  ;;  %s5481_s9 = sshll.u32 %s9348_s11, 5  ;;  %s5508_s16 = smul.u32 3072, %s6168_s25 }
  0x1d   : > { %v665_v9 = vrot.slane %v6217_v8, %v6208_v7  ;;  %v295_v10 = vld [vmem:[%s6225_s19] sm:$0xff]  ;;  %v298_v14 = vld [vmem:[%s6225_s19 + $0x18] sm:$0xff]  ;;  %v300_v16 = vld [vmem:[%s6225_s19 + $0x28] sm:$0xff]  ;;  %v700_v40 = vrot.slane %v6217_v8, %v6265_v33  ;;  %v735_v49 = vrot.slane %v6217_v8, %v6296_v48  ;;  %v770_v51 = vrot.slane %v6217_v8, %v6302_v50  ;;  %9150 = vst [vmem:[#allocation7_spill] sm:$0xff] %v6362_v1  ;;  %s8048_s12 = scalar_lea.vmem %s9076_s5, %s5481_s9  ;;  %s6047_s29 = sshll.u32 %s6109_s28, 4  ;;  %s6048_s29 = int_to_ptr.vmem [resolvable:$false] %s6047_s29 }
  0x1e   : > { %v325_v13 = vpack.c.bf16 %v296_v11, %v295_v10  ;;  %v299_v15 = vld [vmem:[%s6225_s19 + $0x20] sm:$0xff]  ;;  %v6233_v17 = vpack.c.bf16 %v298_v14, %v297_v12  ;;  %v301_v19 = vld [vmem:[%s6225_s19 + $0x30] sm:$0xff]  ;;  %v302_v20 = vld [vmem:[%s6225_s19 + $0x38] sm:$0xff]  ;;  %v805_v55 = vrot.slane %v6217_v8, %v6315_v54  ;;  %v840_v57 = vrot.slane %v6217_v8, %v6326_v56  ;;  %s9022_s25 = scalar_lea.hbm %s9077_s6, %s5508_s16  ;;  %s6049_s9 = scalar_lea.vmem %s6048_s29, 6144 }
  0x1f   : > { %675 = vbcast.lane.b32.xlu1 %v665_v9, 272  ;;  %667 = vbcast.lane.b32.xlu0 %v665_v9, 256  ;;  %v6235_v18 = vpack.c.bf16 %v300_v16, %v299_v15  ;;  %v307_v21 = vld [vmem:[%s6225_s19 + $0x60] sm:$0xff]  ;;  %v308_v22 = vld [vmem:[%s6225_s19 + $0x68] sm:$0xff]  ;;  %v309_v23 = vld [vmem:[%s6225_s19 + $0x70] sm:$0xff]  ;;  %v6260_v32 = vpack.c.bf16 %v302_v20, %v301_v19  ;;  %v875_v59 = vrot.slane %v6217_v8, %v6339_v58 }
  0x20   : > { %5669 = vmatprep.mubr.msk.bf16.mxu0 %vm337_vm2, %v325_v13  ;;  %v6245_v24 = vpack.c.bf16 %v308_v22, %v307_v21  ;;  %v310_v25 = vld [vmem:[%s6225_s19 + $0x78] sm:$0xff]  ;;  %v311_v26 = vld [vmem:[%s6225_s19 + $0x80] sm:$0xff]  ;;  %v312_v27 = vld [vmem:[%s6225_s19 + $0x88] sm:$0xff] }
  0x21   : > { %5670 = vmatmul.mubr.msk.bf16.vlgmr.msra.gmra.mrb[0].mxu0 %vm337_vm2, %v6233_v17  ;;  %v6252_v28 = vpack.c.bf16 %v310_v25, %v309_v23  ;;  %v6254_v29 = vpack.c.bf16 %v312_v27, %v311_v26  ;;  %v303_v30 = vld [vmem:[%s6225_s19 + $0x40] sm:$0xff]  ;;  %v304_v31 = vld [vmem:[%s6225_s19 + $0x48] sm:$0xff]  ;;  %v313_v34 = vld [vmem:[%s6225_s19 + $0x90] sm:$0xff] }
  0x22   : > { %5673 = vmatprep.mubr.msk.bf16.mxu0 %vm337_vm2, %v6235_v18  ;;  %5681 = vmatprep.mubr.msk.bf16.mxu1 %vm337_vm2, %v6245_v24  ;;  %v314_v35 = vld [vmem:[%s6225_s19 + $0x98] sm:$0xff]  ;;  %v329_v36 = vpack.c.bf16 %v304_v31, %v303_v30  ;;  %v315_v37 = vld [vmem:[%s6225_s19 + $0xa0] sm:$0xff]  ;;  %v316_v38 = vld [vmem:[%s6225_s19 + $0xa8] sm:$0xff] }
  0x23   : > { %679 = vbcast.lane.b32.xlu1 %v665_v9, 280  ;;  %671 = vbcast.lane.b32.xlu0 %v665_v9, 264  ;;  %v6275_v39 = vpack.c.bf16 %v314_v35, %v313_v34  ;;  %v305_v41 = vld [vmem:[%s6225_s19 + $0x50] sm:$0xff]  ;;  %v306_v42 = vld [vmem:[%s6225_s19 + $0x58] sm:$0xff]  ;;  %v6282_v43 = vpack.c.bf16 %v316_v38, %v315_v37  ;;  %v6344_v60 = vld [vmem:[%s6214_s15 + $0x8] sm:$0xff] }
  0x24   : > { %5682 = vmatmul.mubr.msk.bf16.vlgmr.msra.gmra.mrb[0].mxu1 %vm337_vm2, %v6252_v28  ;;  %v330_v44 = vpack.c.bf16 %v306_v42, %v305_v41  ;;  %v317_v45 = vld [vmem:[%s6225_s19 + $0xb0] sm:$0xff]  ;;  %v318_v46 = vld [vmem:[%s6225_s19 + $0xb8] sm:$0xff]  ;;  %v945_v61 = vrot.slane %v6344_v60, %v6208_v7  ;;  %v980_v16 = vrot.slane %v6344_v60, %v6265_v33  ;;  %v1015_v30 = vrot.slane %v6344_v60, %v6296_v48 }
  0x25   : > { %5685 = vmatprep.mubr.msk.bf16.mxu1 %vm337_vm2, %v6254_v29  ;;  %v6291_v47 = vpack.c.bf16 %v318_v46, %v317_v45  ;;  %5694 = vmatpush3.bf16.msra.mxu1 %v517_v53  ;;  %v6408_v31 = vld [vmem:[%s6214_s15 + $0x10] sm:$0xff] }
  0x26   : > { %v1225_v35 = vrot.slane %v6408_v31, %v6208_v7 }
  0x27   : > { %687 = vbcast.lane.b32.xlu1 %v665_v9, 296  ;;  %683 = vbcast.lane.b32.xlu0 %v665_v9, 288 }
  0x29   : > { %5674 = vmatmul.mubr.msk.bf16.gmra.mrb[4].mxu0 %vm337_vm2, %v6260_v32 }
  0x2a   : > { %5677 = vmatprep.mubr.msk.bf16.mxu0 %vm337_vm2, %v329_v36 }
  0x2b   : > { %695 = vbcast.lane.b32.xlu1 %v665_v9, 312  ;;  %691 = vbcast.lane.b32.xlu0 %v665_v9, 304 }
  0x2c   : > { %5686 = vmatmul.mubr.msk.bf16.gmra.mrb[4].mxu1 %vm337_vm2, %v6275_v39 }
  0x2d   : > { %5689 = vmatprep.mubr.msk.bf16.mxu1 %vm337_vm2, %v6282_v43 }
  0x2f   : > { %706 = vbcast.lane.b32.xlu1 %v700_v40, 264  ;;  %702 = vbcast.lane.b32.xlu0 %v700_v40, 256 }
  0x31   : > { %5678 = vmatmul.mubr.msk.bf16.gmra.mrb[8].mxu0 %vm337_vm2, %v330_v44 }
  0x33   : > { %714 = vbcast.lane.b32.xlu1 %v700_v40, 280  ;;  %710 = vbcast.lane.b32.xlu0 %v700_v40, 272 }
  0x34   : > { %5690 = vmatmul.mubr.msk.bf16.gmra.mrb[8].mxu1 %vm337_vm2, %v6291_v47 }
  0x35   : > { %5695 = vmatprep.mubr.msk.bf16.mxu1 %vm337_vm2, %v325_v13  ;;  %v910_v13 = vrot.slane %v6217_v8, %v6362_v1 }
  0x37   : > { %722 = vbcast.lane.b32.xlu1 %v700_v40, 296  ;;  %718 = vbcast.lane.b32.xlu0 %v700_v40, 288 }
  0x3b   : > { %730 = vbcast.lane.b32.xlu1 %v700_v40, 312  ;;  %726 = vbcast.lane.b32.xlu0 %v700_v40, 304 }
  0x3c   : > { %5696 = vmatmul.mubr.msk.bf16.vlgmr.msra.gmra.mrb[12].mxu1 %vm337_vm2, %v6233_v17 }
  0x3d   : > { %5699 = vmatprep.mubr.msk.bf16.mxu1 %vm337_vm2, %v6235_v18 }
  0x3f   : > { %741 = vbcast.lane.b32.xlu1 %v735_v49, 264  ;;  %737 = vbcast.lane.b32.xlu0 %v735_v49, 256 }
  0x43   : > { %749 = vbcast.lane.b32.xlu1 %v735_v49, 280  ;;  %745 = vbcast.lane.b32.xlu0 %v735_v49, 272 }
  0x44   : > { %5700 = vmatmul.mubr.msk.bf16.gmra.mrb[16].mxu1 %vm337_vm2, %v6260_v32 }
  0x45   : > { %5703 = vmatprep.mubr.msk.bf16.mxu1 %vm337_vm2, %v329_v36 }
  0x47   : > { %757 = vbcast.lane.b32.xlu1 %v735_v49, 296  ;;  %753 = vbcast.lane.b32.xlu0 %v735_v49, 288 }
  0x4b   : > { %765 = vbcast.lane.b32.xlu1 %v735_v49, 312  ;;  %761 = vbcast.lane.b32.xlu0 %v735_v49, 304 }
  0x4c   : > { %5704 = vmatmul.mubr.msk.bf16.gmra.mrb[20].mxu1 %vm337_vm2, %v330_v44 }
  0x4d   : > { %5707 = vmatprep.mubr.msk.bf16.mxu1 %vm337_vm2, %v6245_v24 }
  0x4f   : > { %776 = vbcast.lane.b32.xlu1 %v770_v51, 264  ;;  %772 = vbcast.lane.b32.xlu0 %v770_v51, 256 }
  0x53   : > { %784 = vbcast.lane.b32.xlu1 %v770_v51, 280  ;;  %780 = vbcast.lane.b32.xlu0 %v770_v51, 272 }
  0x54   : > { %5708 = vmatmul.mubr.msk.bf16.gmra.mrb[24].mxu1 %vm337_vm2, %v6252_v28 }
  0x55   : > { %5711 = vmatprep.mubr.msk.bf16.mxu1 %vm337_vm2, %v6254_v29 }
  0x57   : > { %792 = vbcast.lane.b32.xlu1 %v770_v51, 296  ;;  %788 = vbcast.lane.b32.xlu0 %v770_v51, 288 }
  0x5b   : > { %800 = vbcast.lane.b32.xlu1 %v770_v51, 312  ;;  %796 = vbcast.lane.b32.xlu0 %v770_v51, 304  ;;  %v1050_v51 = vrot.slane %v6344_v60, %v6302_v50 }
  0x5c   : > { %5712 = vmatmul.mubr.msk.bf16.gmra.mrb[28].mxu1 %vm337_vm2, %v6275_v39 }
  0x5d   : > { %5715 = vmatprep.mubr.msk.bf16.mxu1 %vm337_vm2, %v6282_v43 }
  0x5f   : > { %811 = vbcast.lane.b32.xlu1 %v805_v55, 264  ;;  %807 = vbcast.lane.b32.xlu0 %v805_v55, 256 }
  0x63   : > { %819 = vbcast.lane.b32.xlu1 %v805_v55, 280  ;;  %815 = vbcast.lane.b32.xlu0 %v805_v55, 272 }
  0x64   : > { %5716 = vmatmul.mubr.msk.bf16.gmra.mrb[32].mxu1 %vm337_vm2, %v6291_v47 }
  0x67   : > { %827 = vbcast.lane.b32.xlu1 %v805_v55, 296  ;;  %823 = vbcast.lane.b32.xlu0 %v805_v55, 288 }
  0x6b   : > { %835 = vbcast.lane.b32.xlu1 %v805_v55, 312  ;;  %831 = vbcast.lane.b32.xlu0 %v805_v55, 304  ;;  %v1260_v55 = vrot.slane %v6408_v31, %v6265_v33 }
  0x6f   : > { %846 = vbcast.lane.b32.xlu1 %v840_v57, 264  ;;  %842 = vbcast.lane.b32.xlu0 %v840_v57, 256 }
  0x73   : > { %854 = vbcast.lane.b32.xlu1 %v840_v57, 280  ;;  %850 = vbcast.lane.b32.xlu0 %v840_v57, 272 }
  0x77   : > { %862 = vbcast.lane.b32.xlu1 %v840_v57, 296  ;;  %858 = vbcast.lane.b32.xlu0 %v840_v57, 288 }
  0x7b   : > { %870 = vbcast.lane.b32.xlu1 %v840_v57, 312  ;;  %866 = vbcast.lane.b32.xlu0 %v840_v57, 304 }
  0x7f   : > { %881 = vbcast.lane.b32.xlu1 %v875_v59, 264  ;;  %877 = vbcast.lane.b32.xlu0 %v875_v59, 256 }
  0x83   : > { %951 = vbcast.lane.b32.xlu1 %v945_v61, 264  ;;  %947 = vbcast.lane.b32.xlu0 %v945_v61, 256 }
  0x87   : > { %889 = vbcast.lane.b32.xlu1 %v875_v59, 280  ;;  %885 = vbcast.lane.b32.xlu0 %v875_v59, 272 }
  0x8b   : > { %959 = vbcast.lane.b32.xlu1 %v945_v61, 280  ;;  %955 = vbcast.lane.b32.xlu0 %v945_v61, 272 }
  0x8f   : > { %897 = vbcast.lane.b32.xlu1 %v875_v59, 296  ;;  %893 = vbcast.lane.b32.xlu0 %v875_v59, 288 }
  0x91   : > { %v6353_v63 = vpop.permute.xlu1 %675  ;;  %v668_v0 = vpop.permute.xlu0 %667 }
  0x92   : > { %vm1502_vm3 = vcmp.eq.s32.totalorder %v668_v0, %v6351_v62  ;;  %vm1504_vm11 = vcmp.eq.s32.totalorder %v6353_v63, %v6351_v62 }
  0x93   : > { %967 = vbcast.lane.b32.xlu1 %v945_v61, 296  ;;  %963 = vbcast.lane.b32.xlu0 %v945_v61, 288  ;;  %v5152_v6 = vsel %vm1502_vm3, 1.0, %v9078_v4 }
  0x95   : > { %v6356_v2 = vpop.permute.xlu1 %679  ;;  %v672_v3 = vpop.permute.xlu0 %671 }
  0x96   : > { %vm1503_vm4 = vcmp.eq.s32.totalorder %v672_v3, %v6351_v62  ;;  %vm1505_vm8 = vcmp.eq.s32.totalorder %v6356_v2, %v6351_v62 }
  0x97   : > { %v5153_v9 = vsel %vm1503_vm4, 1.0, %v9078_v4  ;;  %905 = vbcast.lane.b32.xlu1 %v875_v59, 312  ;;  %901 = vbcast.lane.b32.xlu0 %v875_v59, 304 }
  0x98   : > { %v2078_v10 = vpack.c.bf16 %v5153_v9, %v5152_v6 }
  0x99   : > { %v6364_v11 = vpop.permute.xlu1 %687  ;;  %v6366_v12 = vpop.permute.xlu0 %683 }
  0x9a   : > { %5727 = vmatprep.mubr.msk.bf16.mxu0 %vm2174_vm5, %v2078_v10  ;;  %vm1507_vm9 = vcmp.eq.s32.totalorder %v6364_v11, %v6351_v62  ;;  %vm1506_vm10 = vcmp.eq.s32.totalorder %v6366_v12, %v6351_v62 }
  0x9b   : > { %975 = vbcast.lane.b32.xlu1 %v945_v61, 312  ;;  %971 = vbcast.lane.b32.xlu0 %v945_v61, 304  ;;  %v5157_v12 = vsel %vm1507_vm9, 1.0, %v9166_v5 }
  0x9d   : > { %v6371_v14 = vpop.permute.xlu1 %695  ;;  %v6373_v15 = vpop.permute.xlu0 %691 }
  0x9e   : > { %vm1509_vm12 = vcmp.eq.s32.totalorder %v6371_v14, %v6351_v62  ;;  %vm1508_vm13 = vcmp.eq.s32.totalorder %v6373_v15, %v6351_v62 }
  0x9f   : > { %916 = vbcast.lane.b32.xlu1 %v910_v13, 264  ;;  %912 = vbcast.lane.b32.xlu0 %v910_v13, 256 }
  0xa1   : > { %v6377_v17 = vpop.permute.xlu1 %706  ;;  %v6379_v18 = vpop.permute.xlu0 %702 }
  0xa2   : > { %vm1511_vm14 = vcmp.eq.s32.totalorder %v6377_v17, %v6351_v62  ;;  %vm1510_vm15 = vcmp.eq.s32.totalorder %v6379_v18, %v6351_v62 }
  0xa3   : > { %986 = vbcast.lane.b32.xlu1 %v980_v16, 264  ;;  %982 = vbcast.lane.b32.xlu0 %v980_v16, 256  ;;  %v5161_v18 = vsel %vm1511_vm14, 1.0, %v9166_v5 }
  0xa5   : > { %v6381_v19 = vpop.permute.xlu1 %714  ;;  %v6383_v20 = vpop.permute.xlu0 %710 }
  0xa6   : > { %vm1513_vm0 = vcmp.eq.s32.totalorder %v6381_v19, %v6351_v62  ;;  %vm1512_vm1 = vcmp.eq.s32.totalorder %v6383_v20, %v6351_v62 }
  0xa7   : > { %924 = vbcast.lane.b32.xlu1 %v910_v13, 280  ;;  %920 = vbcast.lane.b32.xlu0 %v910_v13, 272 }
  0xa9   : > { %v6385_v8 = vpop.permute.xlu1 %722  ;;  %v6387_v21 = vpop.permute.xlu0 %718 }
  0xaa   : > { %vm1515_vm2 = vcmp.eq.s32.totalorder %v6385_v8, %v6351_v62 }
  0xab   : > { %994 = vbcast.lane.b32.xlu1 %v980_v16, 280  ;;  %990 = vbcast.lane.b32.xlu0 %v980_v16, 272 }
  0xad   : > { %v6389_v22 = vpop.permute.xlu1 %730  ;;  %v6391_v23 = vpop.permute.xlu0 %726 }
  0xae   : > { %vm1517_vm9 = vcmp.eq.s32.totalorder %v6389_v22, %v6351_v62 }
  0xaf   : > { %932 = vbcast.lane.b32.xlu1 %v910_v13, 296  ;;  %928 = vbcast.lane.b32.xlu0 %v910_v13, 288 }
  0xb1   : > { %v6393_v24 = vpop.permute.xlu1 %741  ;;  %v6395_v25 = vpop.permute.xlu0 %737 }
  0xb2   : > { %vm1518_vm14 = vcmp.eq.s32.totalorder %v6395_v25, %v6351_v62  ;;  %v5167_v25 = vsel %vm1517_vm9, 1.0, %v9166_v5 }
  0xb3   : > { %1002 = vbcast.lane.b32.xlu1 %v980_v16, 296  ;;  %998 = vbcast.lane.b32.xlu0 %v980_v16, 288 }
  0xb5   : > { %v6397_v26 = vpop.permute.xlu1 %749  ;;  %v6399_v27 = vpop.permute.xlu0 %745 }
  0xb7   : > { %940 = vbcast.lane.b32.xlu1 %v910_v13, 312  ;;  %936 = vbcast.lane.b32.xlu0 %v910_v13, 304 }
  0xb9   : > { %v6401_v28 = vpop.permute.xlu1 %757  ;;  %v6403_v29 = vpop.permute.xlu0 %753 }
  0xbb   : > { %1010 = vbcast.lane.b32.xlu1 %v980_v16, 312  ;;  %1006 = vbcast.lane.b32.xlu0 %v980_v16, 304 }
  0xbd   : > { %v6410_v32 = vpop.permute.xlu1 %765  ;;  %v6412_v34 = vpop.permute.xlu0 %761 }
  0xbf   : > { %1021 = vbcast.lane.b32.xlu1 %v1015_v30, 264  ;;  %1017 = vbcast.lane.b32.xlu0 %v1015_v30, 256 }
  0xc1   : > { %v6416_v36 = vpop.permute.xlu1 %776  ;;  %v6418_v37 = vpop.permute.xlu0 %772 }
  0xc3   : > { %1231 = vbcast.lane.b32.xlu1 %v1225_v35, 264  ;;  %1227 = vbcast.lane.b32.xlu0 %v1225_v35, 256 }
  0xc5   : > { %v6420_v38 = vpop.permute.xlu1 %784  ;;  %v6422_v39 = vpop.permute.xlu0 %780 }
  0xc7   : > { %1029 = vbcast.lane.b32.xlu1 %v1015_v30, 280  ;;  %1025 = vbcast.lane.b32.xlu0 %v1015_v30, 272 }
  0xc9   : > { %v6424_v40 = vpop.permute.xlu1 %792  ;;  %v6426_v41 = vpop.permute.xlu0 %788 }
  0xcb   : > { %1239 = vbcast.lane.b32.xlu1 %v1225_v35, 280  ;;  %1235 = vbcast.lane.b32.xlu0 %v1225_v35, 272 }
  0xcd   : > { %v6428_v42 = vpop.permute.xlu1 %800  ;;  %v6430_v7 = vpop.permute.xlu0 %796 }
  0xcf   : > { %1037 = vbcast.lane.b32.xlu1 %v1015_v30, 296  ;;  %1033 = vbcast.lane.b32.xlu0 %v1015_v30, 288 }
  0xd1   : > { %v6432_v43 = vpop.permute.xlu1 %811  ;;  %v6434_v44 = vpop.permute.xlu0 %807 }
  0xd3   : > { %1247 = vbcast.lane.b32.xlu1 %v1225_v35, 296  ;;  %1243 = vbcast.lane.b32.xlu0 %v1225_v35, 288 }
  0xd5   : > { %v6436_v45 = vpop.permute.xlu1 %819  ;;  %v6438_v46 = vpop.permute.xlu0 %815 }
  0xd6   : > { %9151 = vst [vmem:[#allocation8_spill] sm:$0xff] %v6438_v46 }
  0xd7   : > { %1045 = vbcast.lane.b32.xlu1 %v1015_v30, 312  ;;  %1041 = vbcast.lane.b32.xlu0 %v1015_v30, 304 }
  0xd9   : > { %v6440_v47 = vpop.permute.xlu1 %827  ;;  %v6442_v49 = vpop.permute.xlu0 %823 }
  0xda   : > { %9152 = vst [vmem:[#allocation9_spill] sm:$0xff] %v6440_v47  ;;  %9153 = vst [vmem:[#allocation10_spill] sm:$0xff] %v6442_v49 }
  0xdb   : > { %1255 = vbcast.lane.b32.xlu1 %v1225_v35, 312  ;;  %1251 = vbcast.lane.b32.xlu0 %v1225_v35, 304 }
  0xdd   : > { %v6446_v52 = vpop.permute.xlu1 %835  ;;  %v6448_v53 = vpop.permute.xlu0 %831 }
  0xde   : > { %9154 = vst [vmem:[#allocation11_spill] sm:$0xff] %v6446_v52  ;;  %9155 = vst [vmem:[#allocation12_spill] sm:$0xff] %v6448_v53 }
  0xdf   : > { %1056 = vbcast.lane.b32.xlu1 %v1050_v51, 264  ;;  %1052 = vbcast.lane.b32.xlu0 %v1050_v51, 256 }
  0xe1   : > { %v6452_v57 = vpop.permute.xlu1 %846  ;;  %v6454_v59 = vpop.permute.xlu0 %842 }
  0xe2   : > { %9156 = vst [vmem:[#allocation13_spill] sm:$0xff] %v6452_v57  ;;  %9157 = vst [vmem:[#allocation14_spill] sm:$0xff] %v6454_v59 }
  0xe3   : > { %1266 = vbcast.lane.b32.xlu1 %v1260_v55, 264  ;;  %1262 = vbcast.lane.b32.xlu0 %v1260_v55, 256 }
  0xe5   : > { %v6456_v61 = vpop.permute.xlu1 %854  ;;  %v6458_v0 = vpop.permute.xlu0 %850 }
  0xe6   : > { %9158 = vst [vmem:[#allocation15_spill] sm:$0xff] %v6456_v61  ;;  %9159 = vst [vmem:[#allocation16_spill] sm:$0xff] %v6458_v0 }
  0xe7   : > { %1064 = vbcast.lane.b32.xlu1 %v1050_v51, 280  ;;  %1060 = vbcast.lane.b32.xlu0 %v1050_v51, 272 }
  0xe9   : > { %v6460_v3 = vpop.permute.xlu1 %862  ;;  %v6462_v6 = vpop.permute.xlu0 %858 }
  0xea   : > { %9160 = vst [vmem:[#allocation17_spill] sm:$0xff] %v6460_v3  ;;  %9161 = vst [vmem:[#allocation18_spill] sm:$0xff] %v6462_v6 }
  0xeb   : > { %1274 = vbcast.lane.b32.xlu1 %v1260_v55, 280  ;;  %1270 = vbcast.lane.b32.xlu0 %v1260_v55, 272 }
  0xed   : > { %v6464_v9 = vpop.permute.xlu1 %870  ;;  %v6466_v33 = vpop.permute.xlu0 %866 }
  0xee   : > { %9162 = vst [vmem:[#allocation19_spill] sm:$0xff] %v6464_v9  ;;  %9163 = vst [vmem:[#allocation20_spill] sm:$0xff] %v6466_v33 }
  0xef   : > { %1072 = vbcast.lane.b32.xlu1 %v1050_v51, 296  ;;  %1068 = vbcast.lane.b32.xlu0 %v1050_v51, 288 }
  0xf1   : > { %v6468_v10 = vpop.permute.xlu1 %881  ;;  %v6470_v13 = vpop.permute.xlu0 %877 }
  0xf2   : > { %9164 = vst [vmem:[#allocation21_spill] sm:$0xff] %v6468_v10  ;;  %9165 = vst [vmem:[#allocation22_spill] sm:$0xff] %v6470_v13 }
  0xf3   : > { %1282 = vbcast.lane.b32.xlu1 %v1260_v55, 296  ;;  %1278 = vbcast.lane.b32.xlu0 %v1260_v55, 288 }
  0xf4   : > { %v5671_v16 = vpop.f32.mrb[0].mxu0 }
  0xf5   : > { %v952_v30 = vpop.permute.xlu1 %951  ;;  %v415_v35 = vpop.f32.mrb[1].mxu0 }
  0xf6   : > { %vm1567_vm6 = vcmp.eq.s32.totalorder %v952_v30, %v6351_v62  ;;  %v948_v4 = vpop.permute.xlu0 %947  ;;  %v5672_v9 = vpop.f32.mrb[2].mxu0 }
  0xf7   : > { %v5217_v1 = vsel %vm1567_vm6, 1.0, %v9166_v5  ;;  %vm1566_vm7 = vcmp.eq.s32.totalorder %v948_v4, %v6351_v62  ;;  %1080 = vbcast.lane.b32.xlu1 %v1050_v51, 312  ;;  %1076 = vbcast.lane.b32.xlu0 %v1050_v51, 304  ;;  %v649_v10 = vpack.c.bf16 %v5672_v9, %v5671_v16  ;;  %v418_v6 = vpop.f32.mrb[3].mxu0  ;;  %v5683_v61 = vpop.f32.mrb[0].mxu1  ;;  %v6482_v4 = vrot.slane %v6344_v60, %v6315_v54 }
  0xf8   : > { %v5216_v33 = vsel %vm1566_vm7, 1.0, %v9166_v5  ;;  %v648_v3 = vpack.c.bf16 %v418_v6, %v415_v35  ;;  %v463_v30 = vpop.f32.mrb[1].mxu1  ;;  %vm1514_vm6 = vcmp.eq.s32.totalorder %v6387_v21, %v6351_v62 }
  0xf9   : > { %v2110_v13 = vpack.c.bf16 %v5217_v1, %v5216_v33  ;;  %v6476_v0 = vpop.permute.xlu1 %889  ;;  %v5684_v57 = vpop.f32.mrb[2].mxu1  ;;  %v5164_v19 = vsel %vm1514_vm6, 1.0, %v9166_v5  ;;  %vm1523_vm6 = vcmp.eq.s32.totalorder %v6401_v28, %v6351_v62 }
  0xfa   : > { %9167 = vst [vmem:[#allocation23_spill] sm:$0xff] %v6476_v0  ;;  %v6478_v59 = vpop.permute.xlu0 %885  ;;  %5719 = vmatprep.subr.bf16.mxu0 %v648_v3  ;;  %v6484_v51 = vpack.c.bf16 %v5684_v57, %v5683_v61  ;;  %v466_v9 = vpop.f32.mrb[3].mxu1 }
  0xfb   : > { %9168 = vst [vmem:[#allocation24_spill] sm:$0xff] %v6478_v59  ;;  %1290 = vbcast.lane.b32.xlu1 %v1260_v55, 312  ;;  %5720 = vmatpush3.bf16.msra.mxu0 %v648_v3  ;;  %v6489_v33 = vpack.c.bf16 %v466_v9, %v463_v30 }
  0xfc   : > { %1286 = vbcast.lane.b32.xlu0 %v1260_v55, 304  ;;  %v5675_v1 = vpop.f32.mrb[4].mxu0  ;;  %5721 = vmatprep.subr.bf16.mxu0 %v649_v10  ;;  %v6496_v55 = vrot.slane %v6408_v31, %v6296_v48 }
  0xfd   : > { %v6486_v6 = vpop.permute.xlu1 %959  ;;  %5799 = vmatprep.mubr.msk.bf16.mxu1 %vm2174_vm5, %v2110_v13  ;;  %v431_v16 = vpop.f32.mrb[5].mxu0 }
  0xfe   : > { %v6491_v35 = vpop.permute.xlu0 %955  ;;  %v5676_v59 = vpop.f32.mrb[6].mxu0  ;;  %vm1569_vm3 = vcmp.eq.s32.totalorder %v6486_v6, %v6351_v62 }
  0xff   : > { %1091 = vbcast.lane.b32.xlu1 %v6482_v4, 264  ;;  %v651_v57 = vpack.c.bf16 %v5676_v59, %v5675_v1  ;;  %v434_v61 = vpop.f32.mrb[7].mxu0  ;;  %5722 = vmatpush3.bf16.msra.mxu0 %v649_v10  ;;  %v5687_v13 = vpop.f32.mrb[4].mxu1  ;;  %vm1568_vm4 = vcmp.eq.s32.totalorder %v6491_v35, %v6351_v62  ;;  %v5163_v35 = vsel %vm1513_vm0, 1.0, %v9166_v5 }
 0x100   : > { %1087 = vbcast.lane.b32.xlu0 %v6482_v4, 256  ;;  %v650_v3 = vpack.c.bf16 %v434_v61, %v431_v16  ;;  %v479_v9 = vpop.f32.mrb[5].mxu1  ;;  %v5155_v61 = vsel %vm1505_vm8, 1.0, %v9166_v5 }
 0x101   : > { %v6499_v0 = vpop.permute.xlu1 %897  ;;  %v5688_v48 = vpop.f32.mrb[6].mxu1 }
 0x102   : > { %9169 = vst [vmem:[#allocation25_spill] sm:$0xff] %v6499_v0  ;;  %v6501_v30 = vpop.permute.xlu0 %893  ;;  %5723 = vmatprep.subr.bf16.mxu0 %v650_v3  ;;  %v657_v59 = vpack.c.bf16 %v5688_v48, %v5687_v13  ;;  %v482_v10 = vpop.f32.mrb[7].mxu1  ;;  %v5154_v13 = vsel %vm1504_vm11, 1.0, %v9166_v5  ;;  %vm1519_vm11 = vcmp.eq.s32.totalorder %v6393_v24, %v6351_v62 }
 0x103   : > { %9170 = vst [vmem:[#allocation26_spill] sm:$0xff] %v6501_v30  ;;  %1301 = vbcast.lane.b32.xlu1 %v6496_v55, 264  ;;  %5724 = vmatpush3.bf16.msra.mxu0 %v650_v3  ;;  %v656_v16 = vpack.c.bf16 %v482_v10, %v479_v9  ;;  %v5156_v3 = vsel %vm1506_vm10, 1.0, %v9166_v5  ;;  %v2079_v9 = vpack.c.bf16 %v5155_v61, %v5154_v13  ;;  %v5158_v61 = vsel %vm1508_vm13, 1.0, %v9166_v5 }
 0x104   : > { %1297 = vbcast.lane.b32.xlu0 %v6496_v55, 256  ;;  %v5679_v1 = vpop.f32.mrb[8].mxu0  ;;  %5725 = vmatprep.subr.bf16.mxu0 %v651_v57  ;;  %v2080_v49 = vpack.c.bf16 %v5157_v12, %v5156_v3  ;;  %v5219_v3 = vsel %vm1569_vm3, 1.0, %v9166_v5  ;;  %v5218_v13 = vsel %vm1568_vm4, 1.0, %v9166_v5  ;;  %vm1516_vm10 = vcmp.eq.s32.totalorder %v6391_v23, %v6351_v62 }
 0x105   : > { %v6513_v2 = vpop.permute.xlu1 %967  ;;  %v447_v30 = vpop.f32.mrb[9].mxu0 }
 0x106   : > { %v6516_v11 = vpop.permute.xlu0 %963  ;;  %v5680_v0 = vpop.f32.mrb[10].mxu0  ;;  %vm1571_vm7 = vcmp.eq.s32.totalorder %v6513_v2, %v6351_v62 }
 0x107   : > { %1099 = vbcast.lane.b32.xlu1 %v6482_v4, 280  ;;  %v653_v63 = vpack.c.bf16 %v5680_v0, %v5679_v1  ;;  %v450_v48 = vpop.f32.mrb[11].mxu0  ;;  %5726 = vmatpush3.bf16.msra.mxu0 %v651_v57  ;;  %v5691_v52 = vpop.f32.mrb[8].mxu1  ;;  %v5159_v1 = vsel %vm1509_vm12, 1.0, %v9166_v5  ;;  %vm1570_vm8 = vcmp.eq.s32.totalorder %v6516_v11, %v6351_v62  ;;  %v5221_v20 = vsel %vm1571_vm7, 1.0, %v9166_v5 }
 0x108   : > { %1095 = vbcast.lane.b32.xlu0 %v6482_v4, 272  ;;  %v652_v10 = vpack.c.bf16 %v450_v48, %v447_v30  ;;  %5863 = vmatprep.subr.bf16.mxu0 %v656_v16  ;;  %v495_v46 = vpop.f32.mrb[9].mxu1  ;;  %v5220_v48 = vsel %vm1570_vm8, 1.0, %v9166_v5  ;;  %vm1522_vm7 = vcmp.eq.s32.totalorder %v6403_v29, %v6351_v62 }
 0x109   : > { %v6523_v53 = vpop.permute.xlu1 %905  ;;  %v5692_v0 = vpop.f32.mrb[10].mxu1  ;;  %v2112_v2 = vpack.c.bf16 %v5221_v20, %v5220_v48 }
 0x10a   : > { %v6525_v47 = vpop.permute.xlu0 %901  ;;  %5728 = vmatmul.mubr.msk.bf16.vlgmr.msra.gmra.mrb[12].mxu0 %vm2174_vm5, %v2079_v9  ;;  %5791 = vmatprep.subr.bf16.mxu1 %v652_v10  ;;  %v659_v57 = vpack.c.bf16 %v5692_v0, %v5691_v52  ;;  %v498_v30 = vpop.f32.mrb[11].mxu1  ;;  %v2081_v52 = vpack.c.bf16 %v5159_v1, %v5158_v61  ;;  %v2111_v9 = vpack.c.bf16 %v5219_v3, %v5218_v13  ;;  %v5166_v0 = vsel %vm1516_vm10, 1.0, %v9166_v5 }
 0x10b   : > { %5731 = vmatprep.mubr.msk.bf16.mxu0 %vm2174_vm5, %v2080_v49  ;;  %5792 = vmatpush3.bf16.msra.mxu1 %v652_v10  ;;  %v658_v15 = vpack.c.bf16 %v498_v30, %v495_v46  ;;  %v5160_v49 = vsel %vm1510_vm15, 1.0, %v9166_v5  ;;  %v2085_v61 = vpack.c.bf16 %v5167_v25, %v5166_v0  ;;  %vm1525_vm10 = vcmp.eq.s32.totalorder %v6410_v32, %v6351_v62 }
 0x10c   : > { %1309 = vbcast.lane.b32.xlu1 %v6496_v55, 280  ;;  %1305 = vbcast.lane.b32.xlu0 %v6496_v55, 272  ;;  %v2082_v12 = vpack.c.bf16 %v5161_v18, %v5160_v49  ;;  %v6656_v18 = vrot.slane %v6408_v31, %v6302_v50 }
 0x10d   : > { %v6539_v14 = vpop.permute.xlu1 %975  ;;  %5793 = vmatprep.subr.bf16.mxu1 %v653_v63  ;;  %5864 = vmatpush3.bf16.msra.mxu0 %v656_v16 }
 0x10e   : > { %v6543_v17 = vpop.permute.xlu0 %971  ;;  %5865 = vmatprep.subr.bf16.mxu0 %v657_v59  ;;  %vm1573_vm12 = vcmp.eq.s32.totalorder %v6539_v14, %v6351_v62  ;;  %v5169_v14 = vsel %vm1519_vm11, 1.0, %v9166_v5  ;;  %vm1524_vm11 = vcmp.eq.s32.totalorder %v6412_v34, %v6351_v62  ;;  %v5175_v34 = vsel %vm1525_vm10, 1.0, %v9166_v5 }
 0x10f   : > { %5794 = vmatpush3.bf16.msra.mxu1 %v653_v63  ;;  %v5165_v63 = vsel %vm1515_vm2, 1.0, %v9166_v5  ;;  %vm1572_vm13 = vcmp.eq.s32.totalorder %v6543_v17, %v6351_v62  ;;  %vm1520_vm2 = vcmp.eq.s32.totalorder %v6399_v27, %v6351_v62 }
 0x110   : > { %1107 = vbcast.lane.b32.xlu1 %v6482_v4, 296  ;;  %1103 = vbcast.lane.b32.xlu0 %v6482_v4, 288  ;;  %v2084_v10 = vpack.c.bf16 %v5165_v63, %v5164_v19  ;;  %v5222_v30 = vsel %vm1572_vm13, 1.0, %v9166_v5  ;;  %v5170_v27 = vsel %vm1520_vm2, 1.0, %v9166_v5  ;;  %vm1526_vm13 = vcmp.eq.s32.totalorder %v6418_v37, %v6351_v62 }
 0x111   : > { %v6549_v46 = vpop.permute.xlu1 %916  ;;  %5795 = vmatprep.subr.bf16.mxu1 %v6489_v33  ;;  %5866 = vmatpush3.bf16.msra.mxu0 %v657_v59  ;;  %v5162_v59 = vsel %vm1512_vm1, 1.0, %v9166_v5  ;;  %vm1521_vm1 = vcmp.eq.s32.totalorder %v6397_v26, %v6351_v62  ;;  %v5176_v37 = vsel %vm1526_vm13, 1.0, %v9166_v5  ;;  %vm1528_vm2 = vcmp.eq.s32.totalorder %v6422_v39, %v6351_v62 }
 0x112   : > { %v6555_v16 = vpop.permute.xlu0 %912  ;;  %5732 = vmatmul.mubr.msk.bf16.gmra.mrb[16].mxu0 %vm2174_vm5, %v2081_v52  ;;  %5867 = vmatprep.subr.bf16.mxu0 %v658_v15  ;;  %v2083_v8 = vpack.c.bf16 %v5163_v35, %v5162_v59  ;;  %v5171_v50 = vsel %vm1521_vm1, 1.0, %v9166_v5  ;;  %v5172_v35 = vsel %vm1522_vm7, 1.0, %v9166_v5  ;;  %vm1529_vm1 = vcmp.eq.s32.totalorder %v6420_v38, %v6351_v62 }
 0x113   : > { %5735 = vmatprep.mubr.msk.bf16.mxu0 %vm2174_vm5, %v2082_v12  ;;  %5796 = vmatpush3.bf16.msra.mxu1 %v6489_v33  ;;  %v2087_v13 = vpack.c.bf16 %v5171_v50, %v5170_v27 }
 0x114   : > { %1317 = vbcast.lane.b32.xlu1 %v6496_v55, 296  ;;  %1313 = vbcast.lane.b32.xlu0 %v6496_v55, 288 }
 0x115   : > { %v987_v6 = vpop.permute.xlu1 %986  ;;  %5797 = vmatprep.subr.bf16.mxu1 %v6484_v51  ;;  %5868 = vmatpush3.bf16.msra.mxu0 %v658_v15  ;;  %v5168_v15 = vsel %vm1518_vm14, 1.0, %v9166_v5 }
 0x116   : > { %v983_v33 = vpop.permute.xlu0 %982  ;;  %5869 = vmatprep.subr.bf16.mxu0 %v659_v57  ;;  %vm1575_vm15 = vcmp.eq.s32.totalorder %v987_v6, %v6351_v62  ;;  %v2086_v24 = vpack.c.bf16 %v5169_v14, %v5168_v15  ;;  %v5173_v6 = vsel %vm1523_vm6, 1.0, %v9166_v5  ;;  %vm1530_vm6 = vcmp.eq.s32.totalorder %v6426_v41, %v6351_v62 }
 0x117   : > { %5798 = vmatpush3.bf16.msra.mxu1 %v6484_v51  ;;  %vm1574_vm0 = vcmp.eq.s32.totalorder %v983_v33, %v6351_v62  ;;  %v6631_v51 = vrot.slane %v6344_v60, %v6326_v56  ;;  %v5225_v22 = vsel %vm1575_vm15, 1.0, %v9166_v5  ;;  %v2088_v20 = vpack.c.bf16 %v5173_v6, %v5172_v35 }
 0x118   : > { %1115 = vbcast.lane.b32.xlu1 %v6482_v4, 312  ;;  %1111 = vbcast.lane.b32.xlu0 %v6482_v4, 304  ;;  %v5224_v1 = vsel %vm1574_vm0, 1.0, %v9166_v5  ;;  %v5179_v15 = vsel %vm1529_vm1, 1.0, %v9166_v5  ;;  %v5180_v41 = vsel %vm1530_vm6, 1.0, %v9166_v5 }
 0x119   : > { %v6605_v21 = vpop.permute.xlu1 %924  ;;  %5870 = vmatpush3.bf16.msra.mxu0 %v659_v57  ;;  %v5223_v57 = vsel %vm1573_vm12, 1.0, %v9166_v5  ;;  %v2114_v49 = vpack.c.bf16 %v5225_v22, %v5224_v1  ;;  %vm1527_vm12 = vcmp.eq.s32.totalorder %v6416_v36, %v6351_v62  ;;  %v5178_v22 = vsel %vm1528_vm2, 1.0, %v9166_v5 }
 0x11a   : > { %v6611_v11 = vpop.permute.xlu0 %920  ;;  %5736 = vmatmul.mubr.msk.bf16.gmra.mrb[20].mxu0 %vm2174_vm5, %v2083_v8  ;;  %5800 = vmatmul.mubr.msk.bf16.vlgmr.msra.gmra.mrb[36].mxu1 %vm2174_vm5, %v2111_v9  ;;  %v2113_v17 = vpack.c.bf16 %v5223_v57, %v5222_v30  ;;  %v5174_v8 = vsel %vm1524_vm11, 1.0, %v9166_v5  ;;  %v5177_v36 = vsel %vm1527_vm12, 1.0, %v9166_v5  ;;  %vm1535_vm11 = vcmp.eq.s32.totalorder %v6432_v43, %v6351_v62 }
 0x11b   : > { %5739 = vmatprep.mubr.msk.bf16.mxu0 %vm2174_vm5, %v2084_v10  ;;  %5803 = vmatprep.mubr.msk.bf16.mxu1 %vm2174_vm5, %v2112_v2  ;;  %v2090_v57 = vpack.c.bf16 %v5177_v36, %v5176_v37  ;;  %vm1534_vm12 = vcmp.eq.s32.totalorder %v6434_v44, %v6351_v62 }
 0x11c   : > { %1325 = vbcast.lane.b32.xlu1 %v6496_v55, 312  ;;  %1321 = vbcast.lane.b32.xlu0 %v6496_v55, 304 }
 0x11d   : > { %v995_v4 = vpop.permute.xlu1 %994 }
 0x11e   : > { %v991_v55 = vpop.permute.xlu0 %990  ;;  %vm1577_vm3 = vcmp.eq.s32.totalorder %v995_v4, %v6351_v62  ;;  %v2089_v4 = vpack.c.bf16 %v5175_v34, %v5174_v8 }
 0x11f   : > { %vm1576_vm4 = vcmp.eq.s32.totalorder %v991_v55, %v6351_v62  ;;  %v5227_v12 = vsel %vm1577_vm3, 1.0, %v9166_v5 }
 0x120   : > { %1126 = vbcast.lane.b32.xlu1 %v6631_v51, 264  ;;  %1122 = vbcast.lane.b32.xlu0 %v6631_v51, 256  ;;  %v5226_v28 = vsel %vm1576_vm4, 1.0, %v9166_v5  ;;  %vm1531_vm4 = vcmp.eq.s32.totalorder %v6424_v40, %v6351_v62 }
 0x121   : > { %v6652_v23 = vpop.permute.xlu1 %932  ;;  %v2115_v33 = vpack.c.bf16 %v5227_v12, %v5226_v28  ;;  %v5181_v40 = vsel %vm1531_vm4, 1.0, %v9166_v5  ;;  %v5185_v12 = vsel %vm1535_vm11, 1.0, %v9166_v5  ;;  %v5184_v28 = vsel %vm1534_vm12, 1.0, %v9166_v5 }
 0x122   : > { %v6660_v52 = vpop.permute.xlu0 %928  ;;  %5740 = vmatmul.mubr.msk.bf16.gmra.mrb[24].mxu0 %vm2174_vm5, %v2085_v61  ;;  %5804 = vmatmul.mubr.msk.bf16.gmra.mrb[40].mxu1 %vm2174_vm5, %v2113_v17  ;;  %v2091_v61 = vpack.c.bf16 %v5179_v15, %v5178_v22  ;;  %v2094_v6 = vpack.c.bf16 %v5185_v12, %v5184_v28  ;;  %v9181_v12 = vld [vmem:[#allocation18_spill] sm:$0xff] }
 0x123   : > { %5743 = vmatprep.mubr.msk.bf16.mxu0 %vm2174_vm5, %v2086_v24  ;;  %5807 = vmatprep.mubr.msk.bf16.mxu1 %vm2174_vm5, %v2114_v49  ;;  %v2092_v24 = vpack.c.bf16 %v5181_v40, %v5180_v41 }
 0x124   : > { %1336 = vbcast.lane.b32.xlu1 %v6656_v18, 264  ;;  %1332 = vbcast.lane.b32.xlu0 %v6656_v18, 256 }
 0x125   : > { %v1003_v26 = vpop.permute.xlu1 %1002 }
 0x126   : > { %vm1579_vm8 = vcmp.eq.s32.totalorder %v1003_v26, %v6351_v62  ;;  %v999_v29 = vpop.permute.xlu0 %998  ;;  %v6764_v26 = vrot.slane %v6344_v60, %v6339_v58  ;;  %v6777_v60 = vrot.slane %v6408_v31, %v6315_v54  ;;  %v9173_v54 = vld [vmem:[#allocation10_spill] sm:$0xff] }
 0x127   : > { %v5229_v59 = vsel %vm1579_vm8, 1.0, %v9166_v5  ;;  %vm1578_vm9 = vcmp.eq.s32.totalorder %v999_v29, %v6351_v62  ;;  %vm1533_vm8 = vcmp.eq.s32.totalorder %v6428_v42, %v6351_v62  ;;  %vm1538_vm2 = vcmp.eq.s32.totalorder %v9173_v54, %v6351_v62 }
 0x128   : > { %v5228_v3 = vsel %vm1578_vm9, 1.0, %v9166_v5  ;;  %1134 = vbcast.lane.b32.xlu1 %v6631_v51, 280  ;;  %1130 = vbcast.lane.b32.xlu0 %v6631_v51, 272  ;;  %vm1532_vm9 = vcmp.eq.s32.totalorder %v6430_v7, %v6351_v62  ;;  %v5183_v43 = vsel %vm1533_vm8, 1.0, %v9166_v5 }
 0x129   : > { %v2116_v63 = vpack.c.bf16 %v5229_v59, %v5228_v3  ;;  %v6688_v19 = vpop.permute.xlu1 %940  ;;  %v5182_v27 = vsel %vm1532_vm9, 1.0, %v9166_v5  ;;  %v9171_v59 = vld [vmem:[#allocation8_spill] sm:$0xff] }
 0x12a   : > { %v6690_v48 = vpop.permute.xlu0 %936  ;;  %5744 = vmatmul.mubr.msk.bf16.gmra.mrb[28].mxu0 %vm2174_vm5, %v2087_v13  ;;  %5808 = vmatmul.mubr.msk.bf16.gmra.mrb[44].mxu1 %vm2174_vm5, %v2115_v33  ;;  %v2093_v29 = vpack.c.bf16 %v5183_v43, %v5182_v27  ;;  %v9172_v13 = vld [vmem:[#allocation9_spill] sm:$0xff] }
 0x12b   : > { %5747 = vmatprep.mubr.msk.bf16.mxu0 %vm2174_vm5, %v2088_v20  ;;  %5811 = vmatprep.mubr.msk.bf16.mxu1 %vm2174_vm5, %v2116_v63  ;;  %vm1539_vm1 = vcmp.eq.s32.totalorder %v9172_v13, %v6351_v62  ;;  %v9180_v27 = vld [vmem:[#allocation17_spill] sm:$0xff] }
 0x12c   : > { %1344 = vbcast.lane.b32.xlu1 %v6656_v18, 280  ;;  %1340 = vbcast.lane.b32.xlu0 %v6656_v18, 272  ;;  %v5189_v8 = vsel %vm1539_vm1, 1.0, %v9166_v5 }
 0x12d   : > { %v1011_v32 = vpop.permute.xlu1 %1010 }
 0x12e   : > { %vm1581_vm14 = vcmp.eq.s32.totalorder %v1011_v32, %v6351_v62  ;;  %v1007_v9 = vpop.permute.xlu0 %1006 }
 0x12f   : > { %v5231_v10 = vsel %vm1581_vm14, 1.0, %v9166_v5  ;;  %vm1580_vm15 = vcmp.eq.s32.totalorder %v1007_v9, %v6351_v62  ;;  %vm1537_vm14 = vcmp.eq.s32.totalorder %v6436_v45, %v6351_v62  ;;  %v5188_v9 = vsel %vm1538_vm2, 1.0, %v9166_v5 }
 0x130   : > { %v5230_v2 = vsel %vm1580_vm15, 1.0, %v9166_v5  ;;  %1142 = vbcast.lane.b32.xlu1 %v6631_v51, 296  ;;  %1138 = vbcast.lane.b32.xlu0 %v6631_v51, 288  ;;  %vm1536_vm15 = vcmp.eq.s32.totalorder %v9171_v59, %v6351_v62  ;;  %v5187_v20 = vsel %vm1537_vm14, 1.0, %v9166_v5  ;;  %vm1547_vm14 = vcmp.eq.s32.totalorder %v9180_v27, %v6351_v62 }
 0x131   : > { %v2117_v25 = vpack.c.bf16 %v5231_v10, %v5230_v2  ;;  %v1022_v0 = vpop.permute.xlu1 %1021  ;;  %v5186_v32 = vsel %vm1536_vm15, 1.0, %v9166_v5  ;;  %v2096_v10 = vpack.c.bf16 %v5189_v8, %v5188_v9  ;;  %vm1546_vm15 = vcmp.eq.s32.totalorder %v9181_v12, %v6351_v62 }
 0x132   : > { %vm1583_vm0 = vcmp.eq.s32.totalorder %v1022_v0, %v6351_v62  ;;  %v1018_v30 = vpop.permute.xlu0 %1017  ;;  %5748 = vmatmul.mubr.msk.bf16.gmra.mrb[32].mxu0 %vm2174_vm5, %v2089_v4  ;;  %v2095_v36 = vpack.c.bf16 %v5187_v20, %v5186_v32  ;;  %v9174_v4 = vld [vmem:[#allocation11_spill] sm:$0xff]  ;;  %v5197_v13 = vsel %vm1547_vm14, 1.0, %v9166_v5  ;;  %v5196_v54 = vsel %vm1546_vm15, 1.0, %v9166_v5 }
 0x133   : > { %v5233_v55 = vsel %vm1583_vm0, 1.0, %v9166_v5  ;;  %vm1582_vm3 = vcmp.eq.s32.totalorder %v1018_v30, %v6351_v62  ;;  %5812 = vmatmul.mubr.msk.bf16.gmra.mrb[48].mxu1 %vm2174_vm5, %v2117_v25  ;;  %5751 = vmatprep.mubr.msk.bf16.mxu0 %vm2174_vm5, %v2090_v57  ;;  %vm1541_vm4 = vcmp.eq.s32.totalorder %v9174_v4, %v6351_v62  ;;  %v9175_v25 = vld [vmem:[#allocation12_spill] sm:$0xff]  ;;  %v9176_v57 = vld [vmem:[#allocation13_spill] sm:$0xff]  ;;  %v9177_v30 = vld [vmem:[#allocation14_spill] sm:$0xff]  ;;  %v2100_v8 = vpack.c.bf16 %v5197_v13, %v5196_v54 }
 0x134   : > { %v5232_v14 = vsel %vm1582_vm3, 1.0, %v9166_v5  ;;  %1352 = vbcast.lane.b32.xlu1 %v6656_v18, 296  ;;  %1348 = vbcast.lane.b32.xlu0 %v6656_v18, 288  ;;  %vm1540_vm6 = vcmp.eq.s32.totalorder %v9175_v25, %v6351_v62  ;;  %vm1543_vm8 = vcmp.eq.s32.totalorder %v9176_v57, %v6351_v62  ;;  %vm1542_vm9 = vcmp.eq.s32.totalorder %v9177_v30, %v6351_v62  ;;  %v9184_v4 = vld [vmem:[#allocation21_spill] sm:$0xff]  ;;  %v9185_v25 = vld [vmem:[#allocation22_spill] sm:$0xff] }
 0x135   : > { %v2118_v38 = vpack.c.bf16 %v5233_v55, %v5232_v14  ;;  %v6733_v39 = vpop.permute.xlu1 %1231  ;;  %v5191_v15 = vsel %vm1541_vm4, 1.0, %v9166_v5  ;;  %v5190_v22 = vsel %vm1540_vm6, 1.0, %v9166_v5  ;;  %v5193_v41 = vsel %vm1543_vm8, 1.0, %v9166_v5 }
 0x136   : > { %v6737_v1 = vpop.permute.xlu0 %1227  ;;  %vm1551_vm4 = vcmp.eq.s32.totalorder %v9184_v4, %v6351_v62  ;;  %vm1550_vm6 = vcmp.eq.s32.totalorder %v9185_v25, %v6351_v62  ;;  %vm1556_vm15 = vcmp.eq.s32.totalorder %v6525_v47, %v6351_v62 }
 0x137   : > { %5815 = vmatprep.mubr.msk.bf16.mxu1 %vm2174_vm5, %v2118_v38 }
 0x138   : > { %1150 = vbcast.lane.b32.xlu1 %v6631_v51, 312  ;;  %1146 = vbcast.lane.b32.xlu0 %v6631_v51, 304 }
 0x139   : > { %v1030_v17 = vpop.permute.xlu1 %1029 }
 0x13a   : > { %vm1585_vm7 = vcmp.eq.s32.totalorder %v1030_v17, %v6351_v62  ;;  %v1026_v49 = vpop.permute.xlu0 %1025  ;;  %5752 = vmatmul.mubr.msk.bf16.gmra.mrb[36].mxu0 %vm2174_vm5, %v2091_v61  ;;  %v5192_v61 = vsel %vm1542_vm9, 1.0, %v9166_v5  ;;  %v2097_v17 = vpack.c.bf16 %v5191_v15, %v5190_v22  ;;  %v9186_v15 = vld [vmem:[#allocation7_spill] sm:$0xff] }
 0x13b   : > { %v5235_v50 = vsel %vm1585_vm7, 1.0, %v9166_v5  ;;  %vm1584_vm10 = vcmp.eq.s32.totalorder %v1026_v49, %v6351_v62  ;;  %5755 = vmatprep.mubr.msk.bf16.mxu0 %vm2174_vm5, %v2092_v24  ;;  %v2098_v49 = vpack.c.bf16 %v5193_v41, %v5192_v61 }
 0x13c   : > { %v5234_v51 = vsel %vm1584_vm10, 1.0, %v9166_v5  ;;  %1360 = vbcast.lane.b32.xlu1 %v6656_v18, 312  ;;  %1356 = vbcast.lane.b32.xlu0 %v6656_v18, 304 }
 0x13d   : > { %v2119_v42 = vpack.c.bf16 %v5235_v50, %v5234_v51  ;;  %v6760_v7 = vpop.permute.xlu1 %1239  ;;  %v9178_v51 = vld [vmem:[#allocation15_spill] sm:$0xff] }
 0x13e   : > { %v6768_v44 = vpop.permute.xlu0 %1235  ;;  %vm1545_vm11 = vcmp.eq.s32.totalorder %v9178_v51, %v6351_v62  ;;  %v6920_v51 = vld [vmem:[%s9075_s4] ss:$0 sm:$0xff] }
 0x13f   : > { %5816 = vmatmul.mubr.msk.bf16.gmra.mrb[52].mxu1 %vm2174_vm5, %v2119_v42  ;;  %v9179_v42 = vld [vmem:[#allocation16_spill] sm:$0xff] }
 0x140   : > { %1161 = vbcast.lane.b32.xlu1 %v6764_v26, 264  ;;  %1157 = vbcast.lane.b32.xlu0 %v6764_v26, 256  ;;  %vm1544_vm12 = vcmp.eq.s32.totalorder %v9179_v42, %v6351_v62 }
 0x141   : > { %v1038_v18 = vpop.permute.xlu1 %1037 }
 0x142   : > { %vm1587_vm13 = vcmp.eq.s32.totalorder %v1038_v18, %v6351_v62  ;;  %v1034_v35 = vpop.permute.xlu0 %1033  ;;  %5756 = vmatmul.mubr.msk.bf16.gmra.mrb[40].mxu0 %vm2174_vm5, %v2093_v29 }
 0x143   : > { %v5237_v3 = vsel %vm1587_vm13, 1.0, %v9166_v5  ;;  %vm1586_vm0 = vcmp.eq.s32.totalorder %v1034_v35, %v6351_v62  ;;  %5759 = vmatprep.mubr.msk.bf16.mxu0 %vm2174_vm5, %v2094_v6  ;;  %v5195_v6 = vsel %vm1545_vm11, 1.0, %v9166_v5  ;;  %v5194_v35 = vsel %vm1544_vm12, 1.0, %v9166_v5 }
 0x144   : > { %v5236_v33 = vsel %vm1586_vm0, 1.0, %v9166_v5  ;;  %1371 = vbcast.lane.b32.xlu1 %v6777_v60, 264  ;;  %1367 = vbcast.lane.b32.xlu0 %v6777_v60, 256 }
 0x145   : > { %v2120_v45 = vpack.c.bf16 %v5237_v3, %v5236_v33  ;;  %v6795_v63 = vpop.permute.xlu1 %1247  ;;  %v6855_v3 = vpop.f32.mrb[12].mxu1 }
 0x146   : > { %v6799_v34 = vpop.permute.xlu0 %1243  ;;  %v6860_v33 = vpop.f32.mrb[13].mxu1 }
 0x147   : > { %5819 = vmatprep.mubr.msk.bf16.mxu1 %vm2174_vm5, %v2120_v45  ;;  %v2099_v45 = vpack.c.bf16 %v5195_v6, %v5194_v35  ;;  %v6864_v32 = vpop.f32.mrb[14].mxu1  ;;  %v9188_v35 = vld [vmem:[#allocation23_spill] sm:$0xff] }
 0x148   : > { %1169 = vbcast.lane.b32.xlu1 %v6764_v26, 280  ;;  %1165 = vbcast.lane.b32.xlu0 %v6764_v26, 272 }
 0x149   : > { %v1046_v37 = vpop.permute.xlu1 %1045 }
 0x14a   : > { %vm1589_vm3 = vcmp.eq.s32.totalorder %v1046_v37, %v6351_v62  ;;  %v1042_v2 = vpop.permute.xlu0 %1041  ;;  %5760 = vmatmul.mubr.msk.bf16.gmra.mrb[44].mxu0 %vm2174_vm5, %v2095_v36  ;;  %v6867_v36 = vpop.f32.mrb[15].mxu1  ;;  %v9182_v37 = vld [vmem:[#allocation19_spill] sm:$0xff] }
 0x14b   : > { %v5239_v0 = vsel %vm1589_vm3, 1.0, %v9166_v5  ;;  %vm1588_vm7 = vcmp.eq.s32.totalorder %v1042_v2, %v6351_v62  ;;  %5763 = vmatprep.mubr.msk.bf16.mxu0 %vm2174_vm5, %v2096_v10  ;;  %vm1549_vm1 = vcmp.eq.s32.totalorder %v9182_v37, %v6351_v62  ;;  %v9183_v10 = vld [vmem:[#allocation20_spill] sm:$0xff] }
 0x14c   : > { %v5238_v55 = vsel %vm1588_vm7, 1.0, %v9166_v5  ;;  %1379 = vbcast.lane.b32.xlu1 %v6777_v60, 280  ;;  %1375 = vbcast.lane.b32.xlu0 %v6777_v60, 272  ;;  %vm1548_vm2 = vcmp.eq.s32.totalorder %v9183_v10, %v6351_v62  ;;  %v5199_v61 = vsel %vm1549_vm1, 1.0, %v9166_v5  ;;  %vm1553_vm7 = vcmp.eq.s32.totalorder %v9188_v35, %v6351_v62 }
 0x14d   : > { %v2121_v14 = vpack.c.bf16 %v5239_v0, %v5238_v55  ;;  %v6822_v38 = vpop.permute.xlu1 %1255  ;;  %vm1559_vm1 = vcmp.eq.s32.totalorder %v6549_v46, %v6351_v62 }
 0x14e   : > { %v6826_v40 = vpop.permute.xlu0 %1251 }
 0x14f   : > { %5820 = vmatmul.mubr.msk.bf16.gmra.mrb[56].mxu1 %vm2174_vm5, %v2121_v14  ;;  %v6041_v14 = vld [vmem:[%s6214_s15 + $0x8] sm:$0xff] }
 0x150   : > { %1177 = vbcast.lane.b32.xlu1 %v6764_v26, 296  ;;  %1173 = vbcast.lane.b32.xlu0 %v6764_v26, 288  ;;  %v6892_v22 = vrot.slane %v6041_v14, %v9186_v15 }
 0x151   : > { %v1057_v24 = vpop.permute.xlu1 %1056 }
 0x152   : > { %vm1591_vm10 = vcmp.eq.s32.totalorder %v1057_v24, %v6351_v62  ;;  %v1053_v50 = vpop.permute.xlu0 %1052  ;;  %5764 = vmatmul.mubr.msk.bf16.gmra.mrb[48].mxu0 %vm2174_vm5, %v2097_v17  ;;  %v5198_v17 = vsel %vm1548_vm2, 1.0, %v9166_v5  ;;  %vm1558_vm2 = vcmp.eq.s32.totalorder %v6555_v16, %v6351_v62 }
 0x153   : > { %v5241_v43 = vsel %vm1591_vm10, 1.0, %v9166_v5  ;;  %vm1590_vm13 = vcmp.eq.s32.totalorder %v1053_v50, %v6351_v62  ;;  %5767 = vmatprep.mubr.msk.bf16.mxu0 %vm2174_vm5, %v2098_v49  ;;  %v5201_v49 = vsel %vm1551_vm4, 1.0, %v9166_v5  ;;  %v5200_v50 = vsel %vm1550_vm6, 1.0, %v9166_v5 }
 0x154   : > { %v5240_v28 = vsel %vm1590_vm13, 1.0, %v9166_v5  ;;  %1387 = vbcast.lane.b32.xlu1 %v6777_v60, 296  ;;  %1383 = vbcast.lane.b32.xlu0 %v6777_v60, 288  ;;  %v2101_v12 = vpack.c.bf16 %v5199_v61, %v5198_v17  ;;  %v2102_v6 = vpack.c.bf16 %v5201_v49, %v5200_v50  ;;  %vm1557_vm13 = vcmp.eq.s32.totalorder %v6523_v53, %v6351_v62 }
 0x155   : > { %v2122_v29 = vpack.c.bf16 %v5241_v43, %v5240_v28  ;;  %v6849_v18 = vpop.permute.xlu1 %1266  ;;  %v5209_v53 = vsel %vm1559_vm1, 1.0, %v9166_v5  ;;  %v5208_v47 = vsel %vm1558_vm2, 1.0, %v9166_v5  ;;  %vm1561_vm4 = vcmp.eq.s32.totalorder %v6605_v21, %v6351_v62 }
 0x156   : > { %v6853_v59 = vpop.permute.xlu0 %1262  ;;  %vm1560_vm6 = vcmp.eq.s32.totalorder %v6611_v11, %v6351_v62  ;;  %vm1632_vm1 = vcmp.eq.s32.totalorder %v6768_v44, %v6351_v62  ;;  %vm1635_vm2 = vcmp.eq.s32.totalorder %v6795_v63, %v6351_v62 }
 0x157   : > { %5823 = vmatprep.mubr.msk.bf16.mxu1 %vm2174_vm5, %v2122_v29  ;;  %v6929_v29 = vrot.slane %v6408_v31, %v6326_v56  ;;  %v5282_v63 = vsel %vm1632_vm1, 1.0, %v9166_v5 }
 0x158   : > { %1185 = vbcast.lane.b32.xlu1 %v6764_v26, 312  ;;  %1181 = vbcast.lane.b32.xlu0 %v6764_v26, 304  ;;  %v6876_v26 = vpop.f32.mrb[16].mxu1 }
 0x159   : > { %v1065_v20 = vpop.permute.xlu1 %1064  ;;  %v6884_v57 = vpop.f32.mrb[17].mxu1 }
 0x15a   : > { %vm1593_vm0 = vcmp.eq.s32.totalorder %v1065_v20, %v6351_v62  ;;  %v1061_v9 = vpop.permute.xlu0 %1060  ;;  %5768 = vmatmul.mubr.msk.bf16.gmra.mrb[52].mxu0 %vm2174_vm5, %v2099_v45  ;;  %v6894_v41 = vpop.f32.mrb[18].mxu1  ;;  %v9189_v45 = vld [vmem:[#allocation24_spill] sm:$0xff] }
 0x15b   : > { %v5243_v2 = vsel %vm1593_vm0, 1.0, %v9166_v5  ;;  %vm1592_vm3 = vcmp.eq.s32.totalorder %v1061_v9, %v6351_v62  ;;  %5771 = vmatprep.mubr.msk.bf16.mxu0 %vm2174_vm5, %v2100_v8  ;;  %vm1552_vm9 = vcmp.eq.s32.totalorder %v9189_v45, %v6351_v62  ;;  %v9191_v8 = vld [vmem:[#allocation25_spill] sm:$0xff]  ;;  %v9192_v9 = vld [vmem:[#allocation26_spill] sm:$0xff] }
 0x15c   : > { %v5242_v0 = vsel %vm1592_vm3, 1.0, %v9166_v5  ;;  %1395 = vbcast.lane.b32.xlu1 %v6777_v60, 312  ;;  %1391 = vbcast.lane.b32.xlu0 %v6777_v60, 304  ;;  %v6906_v60 = vpop.f32.mrb[19].mxu1  ;;  %vm1555_vm11 = vcmp.eq.s32.totalorder %v9191_v8, %v6351_v62  ;;  %vm1554_vm12 = vcmp.eq.s32.totalorder %v9192_v9, %v6351_v62 }
 0x15d   : > { %v2123_v30 = vpack.c.bf16 %v5243_v2, %v5242_v0  ;;  %v6888_v55 = vpop.permute.xlu1 %1274  ;;  %v5705_v42 = vpop.f32.mrb[20].mxu1  ;;  %v5203_v0 = vsel %vm1553_vm7, 1.0, %v9166_v5  ;;  %v5205_v50 = vsel %vm1555_vm11, 1.0, %v9166_v5  ;;  %vm1565_vm11 = vcmp.eq.s32.totalorder %v6688_v19, %v6351_v62 }
 0x15e   : > { %v6904_v24 = vpop.permute.xlu0 %1270  ;;  %v6923_v43 = vadd.f32 %v5705_v42, %v6920_v51  ;;  %v585_v27 = vpop.f32.mrb[21].mxu1  ;;  %v5204_v42 = vsel %vm1554_vm12, 1.0, %v9166_v5  ;;  %vm1564_vm12 = vcmp.eq.s32.totalorder %v6690_v48, %v6351_v62  ;;  %v5215_v48 = vsel %vm1565_vm11, 1.0, %v9166_v5 }
 0x15f   : > { %5824 = vmatmul.mubr.msk.bf16.gmra.mrb[60].mxu1 %vm2174_vm5, %v2123_v30  ;;  %v5706_v54 = vpop.f32.mrb[22].mxu1  ;;  %v6940_v56 = vadd.f32 %v6920_v51, %v585_v27  ;;  %v5202_v30 = vsel %vm1552_vm9, 1.0, %v9166_v5  ;;  %v2104_v8 = vpack.c.bf16 %v5205_v50, %v5204_v42  ;;  %vm1562_vm9 = vcmp.eq.s32.totalorder %v6660_v52, %v6351_v62 }
 0x160   : > { %9187 = vst [vmem:[#allocation8_spill] sm:$0xff] %v6923_v43  ;;  %1196 = vbcast.lane.b32.xlu1 %v6892_v22, 264  ;;  %1192 = vbcast.lane.b32.xlu0 %v6892_v22, 256  ;;  %v588_v31 = vpop.f32.mrb[23].mxu1  ;;  %v6963_v61 = vadd.f32 %v5706_v54, %v6920_v51  ;;  %v2103_v54 = vpack.c.bf16 %v5203_v0, %v5202_v30 }
 0x161   : > { %v1073_v28 = vpop.permute.xlu1 %1072  ;;  %9190 = vst [vmem:[#allocation9_spill] sm:$0xff] %v6940_v56  ;;  %v5709_v10 = vpop.f32.mrb[24].mxu1  ;;  %v6966_v17 = vadd.f32 %v6920_v51, %v588_v31 }
 0x162   : > { %vm1595_vm8 = vcmp.eq.s32.totalorder %v1073_v28, %v6351_v62  ;;  %v1069_v13 = vpop.permute.xlu0 %1068  ;;  %5772 = vmatmul.mubr.msk.bf16.gmra.mrb[56].mxu0 %vm2174_vm5, %v2101_v12  ;;  %v601_v25 = vpop.f32.mrb[25].mxu1  ;;  %9193 = vst [vmem:[#allocation10_spill] sm:$0xff] %v6963_v61  ;;  %v6978_v27 = vadd.f32 %v5709_v10, %v6920_v51 }
 0x163   : > { %v5245_v20 = vsel %vm1595_vm8, 1.0, %v9166_v5  ;;  %vm1594_vm10 = vcmp.eq.s32.totalorder %v1069_v13, %v6351_v62  ;;  %5775 = vmatprep.mubr.msk.bf16.mxu0 %vm2174_vm5, %v2102_v6  ;;  %9194 = vst [vmem:[#allocation11_spill] sm:$0xff] %v6966_v17  ;;  %v5710_v49 = vpop.f32.mrb[26].mxu1  ;;  %v6981_v12 = vadd.f32 %v6920_v51, %v601_v25  ;;  %vm1563_vm8 = vcmp.eq.s32.totalorder %v6652_v23, %v6351_v62 }
 0x164   : > { %v5244_v37 = vsel %vm1594_vm10, 1.0, %v9166_v5  ;;  %1406 = vbcast.lane.b32.xlu1 %v6929_v29, 264  ;;  %1402 = vbcast.lane.b32.xlu0 %v6929_v29, 256  ;;  %9195 = vst [vmem:[#allocation12_spill] sm:$0xff] %v6978_v27  ;;  %v604_v28 = vpop.f32.mrb[27].mxu1  ;;  %v6984_v6 = vadd.f32 %v5710_v49, %v6920_v51  ;;  %v5213_v52 = vsel %vm1563_vm8, 1.0, %v9166_v5  ;;  %vm1636_vm8 = vcmp.eq.s32.totalorder %v6826_v40, %v6351_v62 }
 0x165   : > { %v2124_v2 = vpack.c.bf16 %v5245_v20, %v5244_v37  ;;  %v6950_v4 = vpop.permute.xlu1 %1282  ;;  %9196 = vst [vmem:[#allocation13_spill] sm:$0xff] %v6981_v12  ;;  %v6987_v35 = vadd.f32 %v6920_v51, %v604_v28  ;;  %v5713_v13 = vpop.f32.mrb[28].mxu1  ;;  %v5207_v28 = vsel %vm1557_vm13, 1.0, %v9166_v5 }
 0x166   : > { %v6960_v14 = vpop.permute.xlu0 %1278  ;;  %v6992_v20 = vadd.f32 %v5713_v13, %v6920_v51  ;;  %v617_v31 = vpop.f32.mrb[29].mxu1  ;;  %v5206_v13 = vsel %vm1556_vm15, 1.0, %v9166_v5  ;;  %vm1630_vm15 = vcmp.eq.s32.totalorder %v6737_v1, %v6351_v62 }
 0x167   : > { %5827 = vmatprep.mubr.msk.bf16.mxu1 %vm2174_vm5, %v2124_v2  ;;  %9197 = vst [vmem:[#allocation14_spill] sm:$0xff] %v6987_v35  ;;  %v5714_v37 = vpop.f32.mrb[30].mxu1  ;;  %v7003_v2 = vadd.f32 %v6920_v51, %v617_v31 }
 0x168   : > { %1204 = vbcast.lane.b32.xlu1 %v6892_v22, 280  ;;  %1200 = vbcast.lane.b32.xlu0 %v6892_v22, 272  ;;  %9198 = vst [vmem:[#allocation15_spill] sm:$0xff] %v6992_v20  ;;  %v620_v25 = vpop.f32.mrb[31].mxu1 }
 0x169   : > { %v1081_v45 = vpop.permute.xlu1 %1080  ;;  %9199 = vst [vmem:[#allocation16_spill] sm:$0xff] %v7003_v2  ;;  %v5717_v30 = vpop.f32.mrb[32].mxu1  ;;  %v7029_v31 = vadd.f32 %v6920_v51, %v620_v25 }
 0x16a   : > { %vm1597_vm14 = vcmp.eq.s32.totalorder %v1081_v45, %v6351_v62  ;;  %v1077_v9 = vpop.permute.xlu0 %1076  ;;  %5776 = vmatmul.mubr.msk.bf16.gmra.mrb[60].mxu0 %vm2174_vm5, %v2103_v54  ;;  %v633_v42 = vpop.f32.mrb[33].mxu1  ;;  %v7026_v45 = vadd.f32 %v5714_v37, %v6920_v51 }
 0x16b   : > { %v5247_v10 = vsel %vm1597_vm14, 1.0, %v9166_v5  ;;  %vm1596_vm0 = vcmp.eq.s32.totalorder %v1077_v9, %v6351_v62  ;;  %5779 = vmatprep.mubr.msk.bf16.mxu0 %vm2174_vm5, %v2104_v8  ;;  %9201 = vst [vmem:[#allocation18_spill] sm:$0xff] %v7029_v31  ;;  %v5718_v8 = vpop.f32.mrb[34].mxu1  ;;  %v7041_v9 = vadd.f32 %v5717_v30, %v6920_v51  ;;  %v7044_v37 = vadd.f32 %v6920_v51, %v633_v42 }
 0x16c   : > { %v5246_v0 = vsel %vm1596_vm0, 1.0, %v9166_v5  ;;  %1414 = vbcast.lane.b32.xlu1 %v6929_v29, 280  ;;  %1410 = vbcast.lane.b32.xlu0 %v6929_v29, 272  ;;  %9200 = vst [vmem:[#allocation17_spill] sm:$0xff] %v7026_v45  ;;  %v7047_v25 = vadd.f32 %v5718_v8, %v6920_v51  ;;  %v5210_v8 = vsel %vm1560_vm6, 1.0, %v9166_v5  ;;  %vm1631_vm14 = vcmp.eq.s32.totalorder %v6733_v39, %v6351_v62 }
 0x16d   : > { %v2125_v49 = vpack.c.bf16 %v5247_v10, %v5246_v0  ;;  %v7013_v50 = vpop.permute.xlu1 %1290  ;;  %9202 = vst [vmem:[#allocation19_spill] sm:$0xff] %v7041_v9  ;;  %9203 = vst [vmem:[#allocation20_spill] sm:$0xff] %v7044_v37  ;;  %v636_v10 = vpop.f32.mrb[35].mxu1  ;;  %v2105_v0 = vpack.c.bf16 %v5207_v28, %v5206_v13  ;;  %v5211_v13 = vsel %vm1561_vm4, 1.0, %v9166_v5  ;;  %v5280_v39 = vsel %vm1630_vm15, 1.0, %v9166_v5 }
 0x16e   : > { %v7023_v54 = vpop.permute.xlu0 %1286  ;;  %9204 = vst [vmem:[#allocation21_spill] sm:$0xff] %v7047_v25  ;;  %v7050_v46 = vadd.f32 %v6920_v51, %v636_v10  ;;  %v7082_v10 = vld [vmem:[%s6214_s15 + $0x10] sm:$0xff]  ;;  %vm1633_vm0 = vcmp.eq.s32.totalorder %v6760_v7, %v6351_v62  ;;  %vm1643_vm15 = vcmp.eq.s32.totalorder %v6950_v4, %v6351_v62  ;;  %s8917_s15 = scalar_lea.vmem [#allocation2], %s5997_s14 }
 0x16f   : > { %5828 = vmatmul.mubr.msk.bf16.gmra.mrb[64].mxu1 %vm2174_vm5, %v2125_v49  ;;  %v2106_v49 = vpack.c.bf16 %v5209_v53, %v5208_v47  ;;  %v5212_v53 = vsel %vm1562_vm9, 1.0, %v9166_v5  ;;  %v2107_v47 = vpack.c.bf16 %v5211_v13, %v5210_v8  ;;  %vm1639_vm9 = vcmp.eq.s32.totalorder %v6849_v18, %v6351_v62  ;;  %s5018_s17 = sshll.u32 %s8917_s15, 4  ;;  %s9015_s17 = int_to_ptr.vmem [resolvable:$true] %s5018_s17 }
 0x170   : > { %9205 = vst [vmem:[#allocation22_spill] sm:$0xff] %v7050_v46  ;;  %1422 = vbcast.lane.b32.xlu1 %v6929_v29, 296  ;;  %1418 = vbcast.lane.b32.xlu0 %v6929_v29, 288  ;;  %v1470_v18 = vrot.slane %v7082_v10, %v9186_v15  ;;  %s6043_s26 = scalar_lea.vmem %s9015_s17, 3072  ;;  %p6050_p0 = scmp.lt.s32.totalorder %s9015_s17, %s6048_s29 }
 0x171   : > { %v1092_v16 = vpop.permute.xlu1 %1091  ;;  %p6044_p11 = scmp.ne.s32.totalorder %s9015_s17, %s6043_s26  ;;  %p6051_p1 = scmp.lt.s32.totalorder %s6049_s9, %s6043_s26 }
 0x172   : > { %vm1599_vm3 = vcmp.eq.s32.totalorder %v1092_v16, %v6351_v62  ;;  %v1088_v30 = vpop.permute.xlu0 %1087  ;;  %5780 = vmatmul.mubr.msk.bf16.gmra.mrb[64].mxu0 %vm2174_vm5, %v2105_v0  ;;  %v7086_v0 = vrot.slane %v7082_v10, %v6339_v58  ;;  %v2108_v16 = vpack.c.bf16 %v5213_v52, %v5212_v53 }
 0x173   : > { %v5249_v42 = vsel %vm1599_vm3, 1.0, %v9166_v5  ;;  %vm1598_vm7 = vcmp.eq.s32.totalorder %v1088_v30, %v6351_v62  ;;  %5783 = vmatprep.mubr.msk.bf16.mxu0 %vm2174_vm5, %v2106_v49  ;;  %vm1634_vm3 = vcmp.eq.s32.totalorder %v6799_v34, %v6351_v62  ;;  %v5285_v34 = vsel %vm1635_vm2, 1.0, %v9166_v5  ;;  %p6045_p12 = pnand %p6044_p11, %p6185_p5  ;;  %p6052_p2 = por %p6051_p1, %p6050_p0 }
 0x174   : > { %v5248_v28 = vsel %vm1598_vm7, 1.0, %v9166_v5  ;;  %1430 = vbcast.lane.b32.xlu1 %v6929_v29, 312  ;;  %1426 = vbcast.lane.b32.xlu0 %v6929_v29, 304  ;;  %vm1637_vm7 = vcmp.eq.s32.totalorder %v6822_v38, %v6351_v62 }
 0x175   : > { %v2126_v21 = vpack.c.bf16 %v5249_v42, %v5248_v28  ;;  %v7070_v11 = vpop.permute.xlu1 %1301  ;;  %v5214_v42 = vsel %vm1564_vm12, 1.0, %v9166_v5  ;;  %v5281_v28 = vsel %vm1631_vm14, 1.0, %v9166_v5  ;;  %vm1640_vm14 = vcmp.eq.s32.totalorder %v6904_v24, %v6351_v62  ;;  %p6046_p13 = pneg %p6045_p12 }
 0x176   : > { %v7074_v23 = vpop.permute.xlu0 %1297  ;;  %v2109_v13 = vpack.c.bf16 %v5215_v48, %v5214_v42  ;;  %v2142_v8 = vpack.c.bf16 %v5281_v28, %v5280_v39  ;;  %v5287_v42 = vsel %vm1637_vm7, 1.0, %v9166_v5  ;;  %v5289_v39 = vsel %vm1639_vm9, 1.0, %v9166_v5 }
 0x177   : > { %5831 = vmatprep.mubr.msk.bf16.mxu1 %vm2174_vm5, %v2126_v21  ;;  %vm1646_vm7 = vcmp.eq.s32.totalorder %v7074_v23, %v6351_v62  ;;  %p6053_p3 = pnand %p6052_p2, %p6046_p13 }
 0x178   : > { %1212 = vbcast.lane.b32.xlu1 %v6892_v22, 296  ;;  %1208 = vbcast.lane.b32.xlu0 %v6892_v22, 288  ;;  %v5296_v23 = vsel %vm1646_vm7, 1.0, %v9166_v5 }
 0x179   : > { %v1100_v29 = vpop.permute.xlu1 %1099 }
 0x17a   : > { %vm1601_vm10 = vcmp.eq.s32.totalorder %v1100_v29, %v6351_v62  ;;  %v1096_v49 = vpop.permute.xlu0 %1095  ;;  %5784 = vmatmul.mubr.msk.bf16.gmra.mrb[68].mxu0 %vm2174_vm5, %v2107_v47  ;;  %v5284_v29 = vsel %vm1634_vm3, 1.0, %v9166_v5  ;;  %vm1645_vm3 = vcmp.eq.s32.totalorder %v7013_v50, %v6351_v62 }
 0x17b   : > { %v5251_v30 = vsel %vm1601_vm10, 1.0, %v9166_v5  ;;  %vm1600_vm13 = vcmp.eq.s32.totalorder %v1096_v49, %v6351_v62  ;;  %5787 = vmatprep.mubr.msk.bf16.mxu0 %vm2174_vm5, %v2108_v16  ;;  %vm1638_vm10 = vcmp.eq.s32.totalorder %v6853_v59, %v6351_v62  ;;  %v5286_v59 = vsel %vm1636_vm8, 1.0, %v9166_v5 }
 0x17c   : > { %v5250_v58 = vsel %vm1600_vm13, 1.0, %v9166_v5  ;;  %1441 = vbcast.lane.b32.xlu1 %v7086_v0, 264  ;;  %1437 = vbcast.lane.b32.xlu0 %v7086_v0, 256  ;;  %vm1641_vm13 = vcmp.eq.s32.totalorder %v6888_v55, %v6351_v62 }
 0x17d   : > { %v2127_v19 = vpack.c.bf16 %v5251_v30, %v5250_v58  ;;  %v2144_v58 = vpack.c.bf16 %v5285_v34, %v5284_v29 }
 0x17e   : > { %v7108_v21 = vpop.permute.xlu1 %1309  ;;  %v7110_v1 = vpop.permute.xlu0 %1305 }
 0x17f   : > { %5832 = vmatmul.mubr.msk.bf16.gmra.mrb[68].mxu1 %vm2174_vm5, %v2127_v19 }
 0x180   : > { %1220 = vbcast.lane.b32.xlu1 %v6892_v22, 312  ;;  %1216 = vbcast.lane.b32.xlu0 %v6892_v22, 304  ;;  %v5283_v22 = vsel %vm1633_vm0, 1.0, %v9166_v5  ;;  %vm1642_vm0 = vcmp.eq.s32.totalorder %v6960_v14, %v6351_v62 }
 0x181   : > { %v2143_v30 = vpack.c.bf16 %v5283_v22, %v5282_v63  ;;  %v5293_v22 = vsel %vm1643_vm15, 1.0, %v9166_v5  ;;  %v5292_v14 = vsel %vm1642_vm0, 1.0, %v9166_v5 }
 0x182   : > { %v1108_v52 = vpop.permute.xlu1 %1107  ;;  %v1104_v53 = vpop.permute.xlu0 %1103  ;;  %5788 = vmatmul.mubr.msk.bf16.gmra.mrb[72].mxu0 %vm2174_vm5, %v2109_v13  ;;  %v5288_v13 = vsel %vm1638_vm10, 1.0, %v9166_v5  ;;  %v2148_v29 = vpack.c.bf16 %v5293_v22, %v5292_v14  ;;  %vm1649_vm10 = vcmp.eq.s32.totalorder %v7108_v21, %v6351_v62 }
 0x183   : > { %vm1603_vm4 = vcmp.eq.s32.totalorder %v1108_v52, %v6351_v62  ;;  %vm1602_vm6 = vcmp.eq.s32.totalorder %v1104_v53, %v6351_v62  ;;  %5871 = vmatprep.mubr.msk.bf16.mxu0 %vm2174_vm5, %v2142_v8  ;;  %v2145_v53 = vpack.c.bf16 %v5287_v42, %v5286_v59 }
 0x184   : > { %v5253_v7 = vsel %vm1603_vm4, 1.0, %v9166_v5  ;;  %v5252_v44 = vsel %vm1602_vm6, 1.0, %v9166_v5  ;;  %1449 = vbcast.lane.b32.xlu1 %v7086_v0, 280  ;;  %1445 = vbcast.lane.b32.xlu0 %v7086_v0, 272  ;;  %vm1644_vm4 = vcmp.eq.s32.totalorder %v7023_v54, %v6351_v62  ;;  %vm1647_vm6 = vcmp.eq.s32.totalorder %v7070_v11, %v6351_v62 }
 0x185   : > { %v2128_v47 = vpack.c.bf16 %v5253_v7, %v5252_v44  ;;  %v5291_v7 = vsel %vm1641_vm13, 1.0, %v9166_v5  ;;  %v5290_v44 = vsel %vm1640_vm14, 1.0, %v9166_v5 }
 0x186   : > { %v7135_v16 = vpop.permute.xlu1 %1317  ;;  %v7137_v49 = vpop.permute.xlu0 %1313  ;;  %v2147_v34 = vpack.c.bf16 %v5291_v7, %v5290_v44 }
 0x187   : > { %5835 = vmatprep.mubr.msk.bf16.mxu1 %vm2174_vm5, %v2128_v47  ;;  %vm1650_vm13 = vcmp.eq.s32.totalorder %v7137_v49, %v6351_v62 }
 0x188   : > { %1457 = vbcast.lane.b32.xlu1 %v7086_v0, 296  ;;  %1453 = vbcast.lane.b32.xlu0 %v7086_v0, 288 }
 0x18a   : > { %v1116_v19 = vpop.permute.xlu1 %1115  ;;  %v1112_v48 = vpop.permute.xlu0 %1111  ;;  %5872 = vmatmul.mubr.msk.bf16.vlgmr.msra.gmra.mrb[76].mxu0 %vm2174_vm5, %v2143_v30 }
 0x18b   : > { %vm1605_vm11 = vcmp.eq.s32.totalorder %v1116_v19, %v6351_v62  ;;  %vm1604_vm12 = vcmp.eq.s32.totalorder %v1112_v48, %v6351_v62  ;;  %5875 = vmatprep.mubr.msk.bf16.mxu0 %vm2174_vm5, %v2144_v58  ;;  %v5295_v19 = vsel %vm1645_vm3, 1.0, %v9166_v5  ;;  %v5294_v48 = vsel %vm1644_vm4, 1.0, %v9166_v5 }
 0x18c   : > { %v5255_v38 = vsel %vm1605_vm11, 1.0, %v9166_v5  ;;  %v5254_v40 = vsel %vm1604_vm12, 1.0, %v9166_v5  ;;  %1465 = vbcast.lane.b32.xlu1 %v7086_v0, 312  ;;  %1461 = vbcast.lane.b32.xlu0 %v7086_v0, 304  ;;  %v2146_v0 = vpack.c.bf16 %v5289_v39, %v5288_v13  ;;  %v2149_v59 = vpack.c.bf16 %v5295_v19, %v5294_v48 }
 0x18d   : > { %v2129_v28 = vpack.c.bf16 %v5255_v38, %v5254_v40  ;;  %v5297_v38 = vsel %vm1647_vm6, 1.0, %v9166_v5  ;;  %vm1648_vm11 = vcmp.eq.s32.totalorder %v7110_v1, %v6351_v62  ;;  %vm1651_vm12 = vcmp.eq.s32.totalorder %v7135_v16, %v6351_v62 }
 0x18e   : > { %v7164_v8 = vpop.permute.xlu1 %1325  ;;  %v7166_v52 = vpop.permute.xlu0 %1321  ;;  %v5299_v13 = vsel %vm1649_vm10, 1.0, %v9166_v5  ;;  %v5301_v16 = vsel %vm1651_vm12, 1.0, %v9166_v5 }
 0x18f   : > { %5836 = vmatmul.mubr.msk.bf16.gmra.mrb[72].mxu1 %vm2174_vm5, %v2129_v28  ;;  %v2150_v28 = vpack.c.bf16 %v5297_v38, %v5296_v23  ;;  %vm1653_vm0 = vcmp.eq.s32.totalorder %v7164_v8, %v6351_v62 }
 0x190   : > { %1476 = vbcast.lane.b32.xlu1 %v1470_v18, 264  ;;  %1472 = vbcast.lane.b32.xlu0 %v1470_v18, 256 }
 0x192   : > { %v1127_v15 = vpop.permute.xlu1 %1126  ;;  %v1123_v10 = vpop.permute.xlu0 %1122  ;;  %5876 = vmatmul.mubr.msk.bf16.gmra.mrb[80].mxu0 %vm2174_vm5, %v2145_v53  ;;  %v5298_v53 = vsel %vm1648_vm11, 1.0, %v9166_v5 }
 0x193   : > { %vm1607_vm1 = vcmp.eq.s32.totalorder %v1127_v15, %v6351_v62  ;;  %vm1606_vm2 = vcmp.eq.s32.totalorder %v1123_v10, %v6351_v62  ;;  %5879 = vmatprep.mubr.msk.bf16.mxu0 %vm2174_vm5, %v2146_v0  ;;  %v5300_v15 = vsel %vm1650_vm13, 1.0, %v9166_v5 }
 0x194   : > { %v5257_v55 = vsel %vm1607_vm1, 1.0, %v9166_v5  ;;  %v5256_v24 = vsel %vm1606_vm2, 1.0, %v9166_v5  ;;  %1484 = vbcast.lane.b32.xlu1 %v1470_v18, 280  ;;  %1480 = vbcast.lane.b32.xlu0 %v1470_v18, 272  ;;  %vm1652_vm1 = vcmp.eq.s32.totalorder %v7166_v52, %v6351_v62 }
 0x195   : > { %v2130_v4 = vpack.c.bf16 %v5257_v55, %v5256_v24  ;;  %v2151_v55 = vpack.c.bf16 %v5299_v13, %v5298_v53  ;;  %v2152_v24 = vpack.c.bf16 %v5301_v16, %v5300_v15  ;;  %v5302_v22 = vsel %vm1652_vm1, 1.0, %v9166_v5 }
 0x196   : > { %v7187_v63 = vpop.permute.xlu1 %1336  ;;  %v7189_v47 = vpop.permute.xlu0 %1332 }
 0x197   : > { %5839 = vmatprep.mubr.msk.bf16.mxu1 %vm2174_vm5, %v2130_v4  ;;  %vm1655_vm2 = vcmp.eq.s32.totalorder %v7187_v63, %v6351_v62  ;;  %vm1654_vm3 = vcmp.eq.s32.totalorder %v7189_v47, %v6351_v62  ;;  %v5303_v4 = vsel %vm1653_vm0, 1.0, %v9166_v5 }
 0x198   : > { %1492 = vbcast.lane.b32.xlu1 %v1470_v18, 296  ;;  %1488 = vbcast.lane.b32.xlu0 %v1470_v18, 288  ;;  %v5305_v63 = vsel %vm1655_vm2, 1.0, %v9166_v5 }
 0x19a   : > { %v1135_v30 = vpop.permute.xlu1 %1134  ;;  %v1131_v58 = vpop.permute.xlu0 %1130  ;;  %5880 = vmatmul.mubr.msk.bf16.gmra.mrb[84].mxu0 %vm2174_vm5, %v2147_v34  ;;  %v5304_v34 = vsel %vm1654_vm3, 1.0, %v9166_v5 }
 0x19b   : > { %vm1609_vm8 = vcmp.eq.s32.totalorder %v1135_v30, %v6351_v62  ;;  %vm1608_vm9 = vcmp.eq.s32.totalorder %v1131_v58, %v6351_v62  ;;  %5883 = vmatprep.mubr.msk.bf16.mxu0 %vm2174_vm5, %v2148_v29  ;;  %v2153_v30 = vpack.c.bf16 %v5303_v4, %v5302_v22  ;;  %v2154_v58 = vpack.c.bf16 %v5305_v63, %v5304_v34 }
 0x19c   : > { %v5259_v50 = vsel %vm1609_vm8, 1.0, %v9166_v5  ;;  %v5258_v54 = vsel %vm1608_vm9, 1.0, %v9166_v5  ;;  %1500 = vbcast.lane.b32.xlu1 %v1470_v18, 312  ;;  %1496 = vbcast.lane.b32.xlu0 %v1470_v18, 304 }
 0x19d   : > { %v2131_v11 = vpack.c.bf16 %v5259_v50, %v5258_v54 }
 0x19e   : > { %v1345_v40 = vpop.permute.xlu1 %1344  ;;  %v1341_v42 = vpop.permute.xlu0 %1340 }
 0x19f   : > { %5840 = vmatmul.mubr.msk.bf16.gmra.mrb[76].mxu1 %vm2174_vm5, %v2131_v11  ;;  %vm1657_vm7 = vcmp.eq.s32.totalorder %v1345_v40, %v6351_v62  ;;  %vm1656_vm8 = vcmp.eq.s32.totalorder %v1341_v42, %v6351_v62 }
 0x1a0   : > { %v5307_v11 = vsel %vm1657_vm7, 1.0, %v9166_v5  ;;  %v5306_v38 = vsel %vm1656_vm8, 1.0, %v9166_v5 }
 0x1a2   : > { %v1143_v18 = vpop.permute.xlu1 %1142  ;;  %v1139_v39 = vpop.permute.xlu0 %1138  ;;  %5884 = vmatmul.mubr.msk.bf16.gmra.mrb[88].mxu0 %vm2174_vm5, %v2149_v59 }
 0x1a3   : > { %vm1611_vm14 = vcmp.eq.s32.totalorder %v1143_v18, %v6351_v62  ;;  %vm1610_vm15 = vcmp.eq.s32.totalorder %v1139_v39, %v6351_v62  ;;  %5887 = vmatprep.mubr.msk.bf16.mxu0 %vm2174_vm5, %v2150_v28  ;;  %v2155_v18 = vpack.c.bf16 %v5307_v11, %v5306_v38 }
 0x1a4   : > { %v5261_v21 = vsel %vm1611_vm14, 1.0, %v9166_v5  ;;  %v5260_v1 = vsel %vm1610_vm15, 1.0, %v9166_v5 }
 0x1a5   : > { %v2132_v0 = vpack.c.bf16 %v5261_v21, %v5260_v1 }
 0x1a6   : > { %v1353_v49 = vpop.permute.xlu1 %1352  ;;  %v1349_v10 = vpop.permute.xlu0 %1348 }
 0x1a7   : > { %5843 = vmatprep.mubr.msk.bf16.mxu1 %vm2174_vm5, %v2132_v0  ;;  %vm1659_vm9 = vcmp.eq.s32.totalorder %v1353_v49, %v6351_v62  ;;  %vm1658_vm10 = vcmp.eq.s32.totalorder %v1349_v10, %v6351_v62 }
 0x1a8   : > { %v5309_v40 = vsel %vm1659_vm9, 1.0, %v9166_v5  ;;  %v5308_v42 = vsel %vm1658_vm10, 1.0, %v9166_v5 }
 0x1a9   : > { %v2156_v39 = vpack.c.bf16 %v5309_v40, %v5308_v42 }
 0x1aa   : > { %v1151_v7 = vpop.permute.xlu1 %1150  ;;  %v1147_v44 = vpop.permute.xlu0 %1146  ;;  %5888 = vmatmul.mubr.msk.bf16.gmra.mrb[92].mxu0 %vm2174_vm5, %v2151_v55 }
 0x1ab   : > { %vm1613_vm4 = vcmp.eq.s32.totalorder %v1151_v7, %v6351_v62  ;;  %vm1612_vm6 = vcmp.eq.s32.totalorder %v1147_v44, %v6351_v62  ;;  %5891 = vmatprep.mubr.msk.bf16.mxu0 %vm2174_vm5, %v2152_v24 }
 0x1ac   : > { %v5263_v8 = vsel %vm1613_vm4, 1.0, %v9166_v5  ;;  %v5262_v52 = vsel %vm1612_vm6, 1.0, %v9166_v5 }
 0x1ad   : > { %v2133_v14 = vpack.c.bf16 %v5263_v8, %v5262_v52 }
 0x1ae   : > { %v1361_v47 = vpop.permute.xlu1 %1360  ;;  %v1357_v29 = vpop.permute.xlu0 %1356 }
 0x1af   : > { %5844 = vmatmul.mubr.msk.bf16.gmra.mrb[80].mxu1 %vm2174_vm5, %v2133_v14  ;;  %vm1661_vm13 = vcmp.eq.s32.totalorder %v1361_v47, %v6351_v62  ;;  %vm1660_vm14 = vcmp.eq.s32.totalorder %v1357_v29, %v6351_v62 }
 0x1b0   : > { %v5311_v0 = vsel %vm1661_vm13, 1.0, %v9166_v5  ;;  %v5310_v16 = vsel %vm1660_vm14, 1.0, %v9166_v5 }
 0x1b1   : > { %v2157_v7 = vpack.c.bf16 %v5311_v0, %v5310_v16 }
 0x1b2   : > { %v1162_v50 = vpop.permute.xlu1 %1161  ;;  %v1158_v54 = vpop.permute.xlu0 %1157  ;;  %5892 = vmatmul.mubr.msk.bf16.gmra.mrb[96].mxu0 %vm2174_vm5, %v2153_v30 }
 0x1b3   : > { %vm1615_vm11 = vcmp.eq.s32.totalorder %v1162_v50, %v6351_v62  ;;  %vm1614_vm12 = vcmp.eq.s32.totalorder %v1158_v54, %v6351_v62  ;;  %5895 = vmatprep.mubr.msk.bf16.mxu0 %vm2174_vm5, %v2154_v58 }
 0x1b4   : > { %v5265_v19 = vsel %vm1615_vm11, 1.0, %v9166_v5  ;;  %v5264_v48 = vsel %vm1614_vm12, 1.0, %v9166_v5 }
 0x1b5   : > { %v2134_v23 = vpack.c.bf16 %v5265_v19, %v5264_v48 }
 0x1b6   : > { %v1372_v59 = vpop.permute.xlu1 %1371  ;;  %v1368_v28 = vpop.permute.xlu0 %1367 }
 0x1b7   : > { %5847 = vmatprep.mubr.msk.bf16.mxu1 %vm2174_vm5, %v2134_v23  ;;  %vm1663_vm15 = vcmp.eq.s32.totalorder %v1372_v59, %v6351_v62  ;;  %vm1662_vm0 = vcmp.eq.s32.totalorder %v1368_v28, %v6351_v62 }
 0x1b8   : > { %v5313_v49 = vsel %vm1663_vm15, 1.0, %v9166_v5  ;;  %v5312_v10 = vsel %vm1662_vm0, 1.0, %v9166_v5 }
 0x1b9   : > { %v2158_v44 = vpack.c.bf16 %v5313_v49, %v5312_v10 }
 0x1ba   : > { %v1170_v21 = vpop.permute.xlu1 %1169  ;;  %v1166_v1 = vpop.permute.xlu0 %1165  ;;  %5896 = vmatmul.mubr.msk.bf16.gmra.mrb[100].mxu0 %vm2174_vm5, %v2155_v18 }
 0x1bb   : > { %vm1617_vm1 = vcmp.eq.s32.totalorder %v1170_v21, %v6351_v62  ;;  %vm1616_vm2 = vcmp.eq.s32.totalorder %v1166_v1, %v6351_v62  ;;  %5899 = vmatprep.mubr.msk.bf16.mxu0 %vm2174_vm5, %v2156_v39 }
 0x1bc   : > { %v5267_v13 = vsel %vm1617_vm1, 1.0, %v9166_v5  ;;  %v5266_v53 = vsel %vm1616_vm2, 1.0, %v9166_v5 }
 0x1bd   : > { %v2135_v15 = vpack.c.bf16 %v5267_v13, %v5266_v53 }
 0x1be   : > { %v1380_v55 = vpop.permute.xlu1 %1379  ;;  %v1376_v24 = vpop.permute.xlu0 %1375 }
 0x1bf   : > { %5848 = vmatmul.mubr.msk.bf16.gmra.mrb[84].mxu1 %vm2174_vm5, %v2135_v15  ;;  %vm1665_vm3 = vcmp.eq.s32.totalorder %v1380_v55, %v6351_v62  ;;  %vm1664_vm4 = vcmp.eq.s32.totalorder %v1376_v24, %v6351_v62  ;;  %v7317_v55 = vadd.f32 %v6855_v3, %v6920_v51  ;;  %v7330_v3 = vadd.f32 %v6864_v32, %v6920_v51 }
 0x1c0   : > { %v5315_v14 = vsel %vm1665_vm3, 1.0, %v9166_v5  ;;  %v5314_v63 = vsel %vm1664_vm4, 1.0, %v9166_v5 }
 0x1c1   : > { %v2159_v30 = vpack.c.bf16 %v5315_v14, %v5314_v63  ;;  %9206 = vst [vmem:[#allocation7_spill] sm:$0xff] %v7317_v55  ;;  %v7334_v14 = vadd.f32 %v6920_v51, %v6867_v36 }
 0x1c2   : > { %v1178_v8 = vpop.permute.xlu1 %1177  ;;  %v1174_v52 = vpop.permute.xlu0 %1173  ;;  %5900 = vmatmul.mubr.msk.bf16.gmra.mrb[104].mxu0 %vm2174_vm5, %v2157_v7 }
 0x1c3   : > { %vm1619_vm6 = vcmp.eq.s32.totalorder %v1178_v8, %v6351_v62  ;;  %vm1618_vm7 = vcmp.eq.s32.totalorder %v1174_v52, %v6351_v62  ;;  %5903 = vmatprep.mubr.msk.bf16.mxu0 %vm2174_vm5, %v2158_v44  ;;  %v7326_v52 = vadd.f32 %v6920_v51, %v6860_v33 }
 0x1c4   : > { %v5269_v4 = vsel %vm1619_vm6, 1.0, %v9166_v5  ;;  %v5268_v22 = vsel %vm1618_vm7, 1.0, %v9166_v5 }
 0x1c5   : > { %v2136_v34 = vpack.c.bf16 %v5269_v4, %v5268_v22 }
 0x1c6   : > { %v1388_v47 = vpop.permute.xlu1 %1387  ;;  %v1384_v29 = vpop.permute.xlu0 %1383 }
 0x1c7   : > { %vm1667_vm8 = vcmp.eq.s32.totalorder %v1388_v47, %v6351_v62  ;;  %vm1666_vm9 = vcmp.eq.s32.totalorder %v1384_v29, %v6351_v62  ;;  %5851 = vmatprep.mubr.msk.bf16.mxu1 %vm2174_vm5, %v2136_v34 }
 0x1c8   : > { %v5317_v58 = vsel %vm1667_vm8, 1.0, %v9166_v5  ;;  %v5316_v50 = vsel %vm1666_vm9, 1.0, %v9166_v5 }
 0x1c9   : > { %v2160_v54 = vpack.c.bf16 %v5317_v58, %v5316_v50 }
 0x1ca   : > { %v1186_v19 = vpop.permute.xlu1 %1185  ;;  %v1182_v48 = vpop.permute.xlu0 %1181  ;;  %5904 = vmatmul.mubr.msk.bf16.gmra.mrb[108].mxu0 %vm2174_vm5, %v2159_v30 }
 0x1cb   : > { %vm1621_vm10 = vcmp.eq.s32.totalorder %v1186_v19, %v6351_v62  ;;  %vm1620_vm11 = vcmp.eq.s32.totalorder %v1182_v48, %v6351_v62  ;;  %5907 = vmatprep.mubr.msk.bf16.mxu0 %vm2174_vm5, %v2160_v54  ;;  %v7346_v48 = vadd.f32 %v6876_v26, %v6920_v51  ;;  %v7362_v26 = vadd.f32 %v6920_v51, %v6906_v60 }
 0x1cc   : > { %v5271_v11 = vsel %vm1621_vm10, 1.0, %v9166_v5  ;;  %v5270_v38 = vsel %vm1620_vm11, 1.0, %v9166_v5 }
 0x1cd   : > { %v2137_v23 = vpack.c.bf16 %v5271_v11, %v5270_v38 }
 0x1ce   : > { %v1396_v40 = vpop.permute.xlu1 %1395  ;;  %v1392_v42 = vpop.permute.xlu0 %1391 }
 0x1cf   : > { %vm1669_vm12 = vcmp.eq.s32.totalorder %v1396_v40, %v6351_v62  ;;  %vm1668_vm13 = vcmp.eq.s32.totalorder %v1392_v42, %v6351_v62  ;;  %5852 = vmatmul.mubr.msk.bf16.gmra.mrb[88].mxu1 %vm2174_vm5, %v2137_v23  ;;  %v7352_v40 = vadd.f32 %v6920_v51, %v6884_v57  ;;  %v7356_v42 = vadd.f32 %v6894_v41, %v6920_v51 }
 0x1d0   : > { %v5319_v59 = vsel %vm1669_vm12, 1.0, %v9166_v5  ;;  %v5318_v28 = vsel %vm1668_vm13, 1.0, %v9166_v5 }
 0x1d1   : > { %v2161_v18 = vpack.c.bf16 %v5319_v59, %v5318_v28 }
 0x1d2   : > { %v1197_v39 = vpop.permute.xlu1 %1196  ;;  %v1193_v21 = vpop.permute.xlu0 %1192 }
 0x1d3   : > { %vm1623_vm14 = vcmp.eq.s32.totalorder %v1197_v39, %v6351_v62  ;;  %vm1622_vm15 = vcmp.eq.s32.totalorder %v1193_v21, %v6351_v62  ;;  %5908 = vmatmul.mubr.msk.bf16.gmra.mrb[112].mxu0 %vm2174_vm5, %v2161_v18 }
 0x1d4   : > { %v5273_v1 = vsel %vm1623_vm14, 1.0, %v9166_v5  ;;  %v5272_v13 = vsel %vm1622_vm15, 1.0, %v9166_v5 }
 0x1d5   : > { %v2138_v53 = vpack.c.bf16 %v5273_v1, %v5272_v13 }
 0x1d6   : > { %v1407_v0 = vpop.permute.xlu1 %1406  ;;  %v1403_v16 = vpop.permute.xlu0 %1402 }
 0x1d7   : > { %vm1671_vm0 = vcmp.eq.s32.totalorder %v1407_v0, %v6351_v62  ;;  %vm1670_vm1 = vcmp.eq.s32.totalorder %v1403_v16, %v6351_v62  ;;  %5855 = vmatprep.mubr.msk.bf16.mxu1 %vm2174_vm5, %v2138_v53 }
 0x1d8   : > { %v5321_v15 = vsel %vm1671_vm0, 1.0, %v9166_v5  ;;  %v5320_v49 = vsel %vm1670_vm1, 1.0, %v9166_v5 }
 0x1d9   : > { %v2162_v10 = vpack.c.bf16 %v5321_v15, %v5320_v49 }
 0x1da   : > { %v1205_v24 = vpop.permute.xlu1 %1204  ;;  %v1201_v7 = vpop.permute.xlu0 %1200 }
 0x1db   : > { %vm1625_vm2 = vcmp.eq.s32.totalorder %v1205_v24, %v6351_v62  ;;  %vm1624_vm3 = vcmp.eq.s32.totalorder %v1201_v7, %v6351_v62  ;;  %5911 = vmatprep.mubr.msk.bf16.mxu0 %vm2174_vm5, %v2162_v10 }
 0x1dc   : > { %v5275_v44 = vsel %vm1625_vm2, 1.0, %v9166_v5  ;;  %v5274_v8 = vsel %vm1624_vm3, 1.0, %v9166_v5 }
 0x1dd   : > { %v2139_v4 = vpack.c.bf16 %v5275_v44, %v5274_v8  ;;  %v5729_v22 = vpop.f32.mrb[12].mxu0 }
 0x1de   : > { %v3332_v63 = vadd.f32 %v5729_v22, %v7317_v55  ;;  %v1415_v34 = vpop.permute.xlu1 %1414  ;;  %v1411_v47 = vpop.permute.xlu0 %1410 }
 0x1df   : > { %vm1673_vm4 = vcmp.eq.s32.totalorder %v1415_v34, %v6351_v62  ;;  %vm1672_vm6 = vcmp.eq.s32.totalorder %v1411_v47, %v6351_v62  ;;  %v2305_v33 = vpop.f32.mrb[13].mxu0  ;;  %5856 = vmatmul.mubr.msk.bf16.gmra.mrb[92].mxu1 %vm2174_vm5, %v2139_v4 }
 0x1e0   : > { %v5323_v32 = vsel %vm1673_vm4, 1.0, %v9166_v5  ;;  %v5322_v29 = vsel %vm1672_vm6, 1.0, %v9166_v5  ;;  %v5730_v30 = vpop.f32.mrb[14].mxu0  ;;  %v3380_v58 = vmul.f32 0.2, %v3332_v63  ;;  %v3330_v36 = vadd.f32 %v2305_v33, %v7326_v52 }
 0x1e1   : > { %v2163_v50 = vpack.c.bf16 %v5323_v32, %v5322_v29  ;;  %v3333_v54 = vadd.f32 %v5730_v30, %v7330_v3  ;;  %v2308_v19 = vpop.f32.mrb[15].mxu0  ;;  %vm3356_vm7 = vcmp.gt.f32.partialorder %v3332_v63, 0.0 }
 0x1e2   : > { %v3331_v11 = vadd.f32 %v2308_v19, %v7334_v14  ;;  %v1423_v38 = vpop.permute.xlu1 %1422  ;;  %v1419_v23 = vpop.permute.xlu0 %1418  ;;  %v7364_v59 = vsel %vm3356_vm7, %v3332_v63, %v3380_v58  ;;  %v3378_v39 = vmul.f32 0.2, %v3330_v36  ;;  %vm3354_vm10 = vcmp.gt.f32.partialorder %v3330_v36, 0.0 }
 0x1e3   : > { %5912 = vmatmul.mubr.msk.bf16.gmra.mrb[116].mxu0 %vm2174_vm5, %v2163_v50  ;;  %vm1675_vm8 = vcmp.eq.s32.totalorder %v1423_v38, %v6351_v62  ;;  %vm1674_vm9 = vcmp.eq.s32.totalorder %v1419_v23, %v6351_v62  ;;  %v3381_v21 = vmul.f32 0.2, %v3333_v54  ;;  %vm3357_vm11 = vcmp.gt.f32.partialorder %v3333_v54, 0.0 }
 0x1e4   : > { %v5325_v28 = vsel %vm1675_vm8, 1.0, %v9166_v5  ;;  %v5324_v18 = vsel %vm1674_vm9, 1.0, %v9166_v5  ;;  %vm3355_vm14 = vcmp.gt.f32.partialorder %v3331_v11, 0.0  ;;  %v3379_v51 = vmul.f32 0.2, %v3331_v11 }
 0x1e5   : > { %v5733_v57 = vpop.f32.mrb[16].mxu0  ;;  %v2164_v1 = vpack.c.bf16 %v5325_v28, %v5324_v18  ;;  %v7377_v8 = vsel %vm3354_vm10, %v3330_v36, %v3378_v39  ;;  %v7380_v4 = vsel %vm3357_vm11, %v3333_v54, %v3381_v21 }
 0x1e6   : > { %v3336_v41 = vadd.f32 %v5733_v57, %v7346_v48  ;;  %v1431_v13 = vpop.permute.xlu1 %1430  ;;  %v1427_v53 = vpop.permute.xlu0 %1426  ;;  %v7387_v29 = vsel %vm3355_vm14, %v3331_v11, %v3379_v51 }
 0x1e7   : > { %vm1677_vm12 = vcmp.eq.s32.totalorder %v1431_v13, %v6351_v62  ;;  %vm1676_vm13 = vcmp.eq.s32.totalorder %v1427_v53, %v6351_v62  ;;  %v2321_v60 = vpop.f32.mrb[17].mxu0  ;;  %5915 = vmatprep.mubr.msk.bf16.mxu0 %vm2174_vm5, %v2164_v1 }
 0x1e8   : > { %v5327_v0 = vsel %vm1677_vm12, 1.0, %v9166_v5  ;;  %v5326_v16 = vsel %vm1676_vm13, 1.0, %v9166_v5  ;;  %v5734_v15 = vpop.f32.mrb[18].mxu0  ;;  %v3384_v49 = vmul.f32 0.2, %v3336_v41  ;;  %v3334_v24 = vadd.f32 %v2321_v60, %v7352_v40 }
 0x1e9   : > { %v2165_v10 = vpack.c.bf16 %v5327_v0, %v5326_v16  ;;  %v3337_v7 = vadd.f32 %v5734_v15, %v7356_v42  ;;  %v2324_v44 = vpop.f32.mrb[19].mxu0  ;;  %vm3360_vm15 = vcmp.gt.f32.partialorder %v3336_v41, 0.0 }
 0x1ea   : > { %v3335_v22 = vadd.f32 %v2324_v44, %v7362_v26  ;;  %v1213_v63 = vpop.permute.xlu1 %1212  ;;  %v1209_v34 = vpop.permute.xlu0 %1208  ;;  %vm3358_vm0 = vcmp.gt.f32.partialorder %v3334_v24, 0.0  ;;  %v3382_v47 = vmul.f32 0.2, %v3334_v24  ;;  %v7389_v30 = vsel %vm3360_vm15, %v3336_v41, %v3384_v49 }
 0x1eb   : > { %vm3361_vm1 = vcmp.gt.f32.partialorder %v3337_v7, 0.0  ;;  %v3385_v33 = vmul.f32 0.2, %v3337_v7  ;;  %5916 = vmatmul.mubr.msk.bf16.gmra.mrb[120].mxu0 %vm2174_vm5, %v2165_v10  ;;  %vm1627_vm3 = vcmp.eq.s32.totalorder %v1213_v63, %v6351_v62  ;;  %vm1626_vm4 = vcmp.eq.s32.totalorder %v1209_v34, %v6351_v62 }
 0x1ec   : > { %vm3359_vm2 = vcmp.gt.f32.partialorder %v3335_v22, 0.0  ;;  %v3383_v32 = vmul.f32 0.2, %v3335_v22  ;;  %v5277_v58 = vsel %vm1627_vm3, 1.0, %v9166_v5  ;;  %v5276_v50 = vsel %vm1626_vm4, 1.0, %v9166_v5 }
 0x1ed   : > { %v5737_v36 = vpop.f32.mrb[20].mxu0  ;;  %v5801_v54 = vpop.f32.mrb[36].mxu1  ;;  %v7393_v19 = vsel %vm3358_vm0, %v3334_v24, %v3382_v47  ;;  %v2140_v38 = vpack.c.bf16 %v5277_v58, %v5276_v50  ;;  %v7398_v11 = vsel %vm3361_vm1, %v3337_v7, %v3385_v33 }
 0x1ee   : > { %v3428_v23 = vadd.f32 %v5737_v36, %v7317_v55  ;;  %v3340_v28 = vadd.f32 %v5801_v54, %v6923_v43  ;;  %v1442_v18 = vpop.permute.xlu1 %1441  ;;  %v1438_v57 = vpop.permute.xlu0 %1437  ;;  %v7401_v39 = vsel %vm3359_vm2, %v3335_v22, %v3383_v32 }
 0x1ef   : > { %vm1679_vm6 = vcmp.eq.s32.totalorder %v1442_v18, %v6351_v62  ;;  %vm1678_vm7 = vcmp.eq.s32.totalorder %v1438_v57, %v6351_v62  ;;  %v2337_v21 = vpop.f32.mrb[21].mxu0  ;;  %v2690_v1 = vpop.f32.mrb[37].mxu1  ;;  %5859 = vmatprep.mubr.msk.bf16.mxu1 %vm2174_vm5, %v2140_v38 }
 0x1f0   : > { %vm3452_vm8 = vcmp.gt.f32.partialorder %v3428_v23, 0.0  ;;  %v3476_v41 = vmul.f32 0.2, %v3428_v23  ;;  %vm3364_vm9 = vcmp.gt.f32.partialorder %v3340_v28, 0.0  ;;  %v3388_v13 = vmul.f32 0.2, %v3340_v28 }
 0x1f1   : > { %v5329_v53 = vsel %vm1679_vm6, 1.0, %v9166_v5  ;;  %v5328_v60 = vsel %vm1678_vm7, 1.0, %v9166_v5  ;;  %v3426_v51 = vadd.f32 %v2337_v21, %v7326_v52  ;;  %v3338_v0 = vadd.f32 %v2690_v1, %v6940_v56  ;;  %v5738_v16 = vpop.f32.mrb[22].mxu0  ;;  %v5802_v15 = vpop.f32.mrb[38].mxu1 }
 0x1f2   : > { %v7410_v49 = vsel %vm3452_vm8, %v3428_v23, %v3476_v41  ;;  %v7412_v10 = vsel %vm3364_vm9, %v3340_v28, %v3388_v13  ;;  %v2166_v24 = vpack.c.bf16 %v5329_v53, %v5328_v60  ;;  %v3429_v7 = vadd.f32 %v5738_v16, %v7330_v3  ;;  %v2340_v44 = vpop.f32.mrb[23].mxu0  ;;  %v2693_v22 = vpop.f32.mrb[39].mxu1 }
 0x1f3   : > { %vm3450_vm10 = vcmp.gt.f32.partialorder %v3426_v51, 0.0  ;;  %v3474_v34 = vmul.f32 0.2, %v3426_v51  ;;  %vm3362_vm11 = vcmp.gt.f32.partialorder %v3338_v0, 0.0  ;;  %v1221_v47 = vpop.permute.xlu1 %1220  ;;  %v1217_v33 = vpop.permute.xlu0 %1216  ;;  %v3386_v32 = vmul.f32 0.2, %v3338_v0 }
 0x1f4   : > { %vm3453_vm12 = vcmp.gt.f32.partialorder %v3429_v7, 0.0  ;;  %v3477_v58 = vmul.f32 0.2, %v3429_v7  ;;  %v3341_v50 = vadd.f32 %v5802_v15, %v6963_v61  ;;  %5919 = vmatprep.mubr.msk.bf16.mxu0 %vm2174_vm5, %v2166_v24  ;;  %v3427_v54 = vadd.f32 %v2340_v44, %v7334_v14 }
 0x1f5   : > { %v7419_v36 = vsel %vm3450_vm10, %v3426_v51, %v3474_v34  ;;  %v3339_v38 = vadd.f32 %v2693_v22, %v6966_v17  ;;  %vm1629_vm13 = vcmp.eq.s32.totalorder %v1221_v47, %v6351_v62  ;;  %v5741_v23 = vpop.f32.mrb[24].mxu0  ;;  %v5805_v28 = vpop.f32.mrb[40].mxu1  ;;  %v7426_v57 = vsel %vm3362_vm11, %v3338_v0, %v3386_v32 }
 0x1f6   : > { %v7428_v21 = vsel %vm3453_vm12, %v3429_v7, %v3477_v58  ;;  %vm3365_vm14 = vcmp.gt.f32.partialorder %v3341_v50, 0.0  ;;  %v2353_v1 = vpop.f32.mrb[25].mxu0  ;;  %v2706_v41 = vpop.f32.mrb[41].mxu1  ;;  %v3389_v53 = vmul.f32 0.2, %v3341_v50  ;;  %vm3451_vm15 = vcmp.gt.f32.partialorder %v3427_v54, 0.0 }
 0x1f7   : > { %v3475_v60 = vmul.f32 0.2, %v3427_v54  ;;  %v1450_v51 = vpop.permute.xlu1 %1449  ;;  %v1446_v16 = vpop.permute.xlu0 %1445  ;;  %vm3363_vm0 = vcmp.gt.f32.partialorder %v3339_v38, 0.0  ;;  %v3387_v15 = vmul.f32 0.2, %v3339_v38  ;;  %v5279_v0 = vsel %vm1629_vm13, 1.0, %v9166_v5 }
 0x1f8   : > { %vm1628_vm1 = vcmp.eq.s32.totalorder %v1217_v33, %v6351_v62  ;;  %v5742_v24 = vpop.f32.mrb[26].mxu0  ;;  %v5806_v7 = vpop.f32.mrb[42].mxu1  ;;  %v7436_v44 = vsel %vm3365_vm14, %v3341_v50, %v3389_v53  ;;  %v3432_v32 = vadd.f32 %v5741_v23, %v7346_v48  ;;  %v3344_v33 = vadd.f32 %v5805_v28, %v6978_v27 }
 0x1f9   : > { %v7438_v22 = vsel %vm3451_vm15, %v3427_v54, %v3475_v60  ;;  %v5278_v34 = vsel %vm1628_vm1, 1.0, %v9166_v5  ;;  %v2356_v58 = vpop.f32.mrb[27].mxu0  ;;  %v2709_v13 = vpop.f32.mrb[43].mxu1  ;;  %v7444_v63 = vsel %vm3363_vm0, %v3339_v38, %v3387_v15  ;;  %vm1681_vm3 = vcmp.eq.s32.totalorder %v1450_v51, %v6351_v62 }
 0x1fa   : > { %v2141_v47 = vpack.c.bf16 %v5279_v0, %v5278_v34  ;;  %vm3456_vm2 = vcmp.gt.f32.partialorder %v3432_v32, 0.0  ;;  %v3480_v46 = vmul.f32 0.2, %v3432_v32  ;;  %vm1680_vm4 = vcmp.eq.s32.totalorder %v1446_v16, %v6351_v62 }
 0x1fb   : > { %v1458_v50 = vpop.permute.xlu1 %1457  ;;  %vm3368_vm6 = vcmp.gt.f32.partialorder %v3344_v33, 0.0  ;;  %v3392_v54 = vmul.f32 0.2, %v3344_v33  ;;  %v5331_v23 = vsel %vm1681_vm3, 1.0, %v9166_v5  ;;  %v5330_v53 = vsel %vm1680_vm4, 1.0, %v9166_v5  ;;  %v1454_v38 = vpop.permute.xlu0 %1453 }
 0x1fc   : > { %5860 = vmatmul.mubr.msk.bf16.gmra.mrb[96].mxu1 %vm2174_vm5, %v2141_v47  ;;  %v7452_v60 = vsel %vm3456_vm2, %v3432_v32, %v3480_v46  ;;  %v2167_v15 = vpack.c.bf16 %v5331_v23, %v5330_v53  ;;  %v3430_v28 = vadd.f32 %v2353_v1, %v7352_v40  ;;  %v3342_v0 = vadd.f32 %v2706_v41, %v6981_v12 }
 0x1fd   : > { %v5745_v51 = vpop.f32.mrb[28].mxu0  ;;  %v5809_v34 = vpop.f32.mrb[44].mxu1  ;;  %v7458_v18 = vsel %vm3368_vm6, %v3344_v33, %v3392_v54  ;;  %v3433_v25 = vadd.f32 %v5742_v24, %v7356_v42  ;;  %v3345_v37 = vadd.f32 %v5806_v7, %v6984_v6  ;;  %v3431_v24 = vadd.f32 %v2356_v58, %v7362_v26 }
 0x1fe   : > { %v2369_v47 = vpop.f32.mrb[29].mxu0  ;;  %v2722_v9 = vpop.f32.mrb[45].mxu1  ;;  %vm3454_vm7 = vcmp.gt.f32.partialorder %v3430_v28, 0.0  ;;  %v3478_v46 = vmul.f32 0.2, %v3430_v28  ;;  %vm3366_vm8 = vcmp.gt.f32.partialorder %v3342_v0, 0.0  ;;  %5920 = vmatmul.mubr.msk.bf16.gmra.mrb[124].mxu0 %vm2174_vm5, %v2167_v15  ;;  %v3343_v7 = vadd.f32 %v2709_v13, %v6987_v35 }
 0x1ff   : > { %v3390_v32 = vmul.f32 0.2, %v3342_v0  ;;  %vm3457_vm9 = vcmp.gt.f32.partialorder %v3433_v25, 0.0  ;;  %v3481_v1 = vmul.f32 0.2, %v3433_v25  ;;  %vm3369_vm10 = vcmp.gt.f32.partialorder %v3345_v37, 0.0  ;;  %v1466_v23 = vpop.permute.xlu1 %1465 }
 0x200   : > { %v3393_v41 = vmul.f32 0.2, %v3345_v37  ;;  %v7463_v53 = vsel %vm3454_vm7, %v3430_v28, %v3478_v46  ;;  %v5746_v54 = vpop.f32.mrb[30].mxu0  ;;  %v5810_v16 = vpop.f32.mrb[46].mxu1  ;;  %vm1683_vm11 = vcmp.eq.s32.totalorder %v1458_v50, %v6351_v62  ;;  %vm3455_vm12 = vcmp.gt.f32.partialorder %v3431_v24, 0.0 }
 0x201   : > { %v7465_v33 = vsel %vm3366_vm8, %v3342_v0, %v3390_v32  ;;  %v7471_v45 = vsel %vm3457_vm9, %v3433_v25, %v3481_v1  ;;  %v2372_v2 = vpop.f32.mrb[31].mxu0  ;;  %v2725_v28 = vpop.f32.mrb[47].mxu1  ;;  %v3479_v58 = vmul.f32 0.2, %v3431_v24  ;;  %vm3367_vm13 = vcmp.gt.f32.partialorder %v3343_v7, 0.0 }
 0x202   : > { %v7473_v15 = vsel %vm3369_vm10, %v3345_v37, %v3393_v41  ;;  %v3391_v13 = vmul.f32 0.2, %v3343_v7  ;;  %v5333_v46 = vsel %vm1683_vm11, 1.0, %v9166_v5  ;;  %vm1682_vm14 = vcmp.eq.s32.totalorder %v1454_v38, %v6351_v62  ;;  %v1462_v32 = vpop.permute.xlu0 %1461 }
 0x203   : > { %9207 = vst [vmem:[#allocation23_spill] sm:$0xff] %v7473_v15  ;;  %v3548_v25 = vadd.f32 %v5745_v51, %v7317_v55  ;;  %v7481_v37 = vsel %vm3455_vm12, %v3431_v24, %v3479_v58  ;;  %v5332_v50 = vsel %vm1682_vm14, 1.0, %v9166_v5  ;;  %v3436_v1 = vadd.f32 %v5809_v34, %v6923_v43  ;;  %v1477_v43 = vpop.permute.xlu1 %1476 }
 0x204   : > { %9208 = vst [vmem:[#allocation24_spill] sm:$0xff] %v7481_v37  ;;  %vm1685_vm15 = vcmp.eq.s32.totalorder %v1466_v23, %v6351_v62  ;;  %v7492_v20 = vsel %vm3367_vm13, %v3343_v7, %v3391_v13  ;;  %v2168_v38 = vpack.c.bf16 %v5333_v46, %v5332_v50  ;;  %vm1684_vm2 = vcmp.eq.s32.totalorder %v1462_v32, %v6351_v62 }
 0x205   : > { %v7486_v41 = vpop.f32.mrb[32].mxu0  ;;  %9209 = vst [vmem:[#allocation25_spill] sm:$0xff] %v7492_v20  ;;  %vm3572_vm0 = vcmp.gt.f32.partialorder %v3548_v25, 0.0  ;;  %v3596_v58 = vmul.f32 0.2, %v3548_v25  ;;  %vm3460_vm1 = vcmp.gt.f32.partialorder %v3436_v1, 0.0  ;;  %v3546_v15 = vadd.f32 %v2369_v47, %v7326_v52 }
 0x206   : > { %v7488_v0 = vpop.f32.mrb[48].mxu1  ;;  %v7494_v51 = vpop.f32.mrb[33].mxu0  ;;  %v3484_v34 = vmul.f32 0.2, %v3436_v1  ;;  %v5335_v23 = vsel %vm1685_vm15, 1.0, %v9166_v5  ;;  %v3434_v31 = vadd.f32 %v2722_v9, %v6940_v56  ;;  %v3549_v7 = vadd.f32 %v5746_v54, %v7330_v3  ;;  %5923 = vmatprep.mubr.msk.bf16.mxu0 %vm2174_vm5, %v2168_v38 }
 0x207   : > { %v7496_v24 = vpop.f32.mrb[49].mxu1  ;;  %v5750_v13 = vpop.f32.mrb[34].mxu0  ;;  %v3620_v50 = vsel %vm3572_vm0, %v3548_v25, %v3596_v58  ;;  %v5334_v55 = vsel %vm1684_vm2, 1.0, %v9166_v5  ;;  %v3437_v35 = vadd.f32 %v5810_v16, %v6963_v61  ;;  %v9211_v9 = vmax.f32 %v7364_v59, %v7410_v49 }
 0x208   : > { %v7504_v46 = vpop.f32.mrb[50].mxu1  ;;  %v7506_v20 = vsel %vm3460_vm1, %v3436_v1, %v3484_v34  ;;  %v7510_v37 = vpop.f32.mrb[35].mxu0  ;;  %v2169_v38 = vpack.c.bf16 %v5335_v23, %v5334_v55  ;;  %vm3570_vm3 = vcmp.gt.f32.partialorder %v3546_v15, 0.0  ;;  %v3594_v1 = vmul.f32 0.2, %v3546_v15 }
 0x209   : > { %9210 = vst [vmem:[#allocation26_spill] sm:$0xff] %v7506_v20  ;;  %v7512_v32 = vpop.f32.mrb[51].mxu1  ;;  %v7517_v47 = vmax.f32 %v9211_v9, %v3620_v50  ;;  %v1473_v25 = vpop.permute.xlu0 %1472  ;;  %vm3458_vm4 = vcmp.gt.f32.partialorder %v3434_v31, 0.0  ;;  %v3482_v58 = vmul.f32 0.2, %v3434_v31  ;;  %vm3573_vm6 = vcmp.gt.f32.partialorder %v3549_v7, 0.0 }
 0x20a   : > { %v3597_v16 = vmul.f32 0.2, %v3549_v7  ;;  %vm3461_vm7 = vcmp.gt.f32.partialorder %v3437_v35, 0.0  ;;  %v3485_v34 = vmul.f32 0.2, %v3437_v35  ;;  %v3547_v61 = vadd.f32 %v2372_v2, %v7334_v14  ;;  %5924 = vmatmul.mubr.msk.bf16.gmra.mrb[128].mxu0 %vm2174_vm5, %v2169_v38 }
 0x20b   : > { %v3618_v59 = vsel %vm3570_vm3, %v3546_v15, %v3594_v1  ;;  %v7523_v49 = vsel %vm3458_vm4, %v3434_v31, %v3482_v58  ;;  %v3435_v50 = vadd.f32 %v2725_v28, %v6966_v17  ;;  %vm1687_vm8 = vcmp.eq.s32.totalorder %v1477_v43, %v6351_v62  ;;  %v1485_v15 = vpop.permute.xlu1 %1484 }
 0x20c   : > { %v9212_v23 = vmax.f32 %v7377_v8, %v7419_v36  ;;  %v3621_v2 = vsel %vm3573_vm6, %v3549_v7, %v3597_v16  ;;  %v7536_v20 = vsel %vm3461_vm7, %v3437_v35, %v3485_v34  ;;  %v9213_v28 = vmax.f32 %v7380_v4, %v7428_v21 }
 0x20d   : > { %v7527_v55 = vpop.f32.mrb[36].mxu0  ;;  %vm3571_vm9 = vcmp.gt.f32.partialorder %v3547_v61, 0.0  ;;  %v3595_v8 = vmul.f32 0.2, %v3547_v61  ;;  %vm3459_vm10 = vcmp.gt.f32.partialorder %v3435_v50, 0.0  ;;  %v5337_v1 = vsel %vm1687_vm8, 1.0, %v9166_v5  ;;  %v1481_v35 = vpop.permute.xlu0 %1480 }
 0x20e   : > { %v7532_v9 = vmax.f32 %v9212_v23, %v3618_v59  ;;  %v7538_v31 = vpop.f32.mrb[37].mxu0  ;;  %v7543_v43 = vmax.f32 %v9213_v28, %v3621_v2  ;;  %v3483_v36 = vmul.f32 0.2, %v3435_v50  ;;  %vm1686_vm11 = vcmp.eq.s32.totalorder %v1473_v25, %v6351_v62 }
 0x20f   : > { %v7549_v7 = vpop.f32.mrb[38].mxu0  ;;  %v3619_v58 = vsel %vm3571_vm9, %v3547_v61, %v3595_v8  ;;  %v5336_v16 = vsel %vm1686_vm11, 1.0, %v9166_v5  ;;  %v3552_v4 = vadd.f32 %v7486_v41, %v7346_v48  ;;  %vm1689_vm12 = vcmp.eq.s32.totalorder %v1485_v15, %v6351_v62 }
 0x210   : > { %v7555_v21 = vpop.f32.mrb[39].mxu0  ;;  %v9214_v59 = vmax.f32 %v7387_v29, %v7438_v22  ;;  %v7564_v25 = vsel %vm3459_vm10, %v3435_v50, %v3483_v36  ;;  %v2170_v2 = vpack.c.bf16 %v5337_v1, %v5336_v16  ;;  %v5339_v61 = vsel %vm1689_vm12, 1.0, %v9166_v5  ;;  %v1493_v1 = vpop.permute.xlu1 %1492 }
 0x211   : > { %9215 = vst [vmem:[#allocation27_spill] sm:$0xff] %v7564_v25  ;;  %vm3576_vm13 = vcmp.gt.f32.partialorder %v3552_v4, 0.0  ;;  %v3600_v15 = vmul.f32 0.2, %v3552_v4  ;;  %vm1688_vm14 = vcmp.eq.s32.totalorder %v1481_v35, %v6351_v62  ;;  %v3550_v22 = vadd.f32 %v7494_v51, %v7352_v40 }
 0x212   : > { %v7557_v34 = vpop.f32.mrb[52].mxu1  ;;  %v7562_v23 = vmax.f32 %v9214_v59, %v3619_v58  ;;  %v5338_v29 = vsel %vm1688_vm14, 1.0, %v9166_v5  ;;  %v3440_v50 = vadd.f32 %v7488_v0, %v6978_v27  ;;  %v3553_v36 = vadd.f32 %v5750_v13, %v7356_v42  ;;  %5927 = vmatprep.mubr.msk.bf16.mxu0 %vm2174_vm5, %v2170_v2  ;;  %v1489_v2 = vpop.permute.xlu0 %1488 }
 0x213   : > { %v7567_v28 = vpop.f32.mrb[53].mxu1  ;;  %v3624_v16 = vsel %vm3576_vm13, %v3552_v4, %v3600_v15  ;;  %v2171_v59 = vpack.c.bf16 %v5339_v61, %v5338_v29  ;;  %v3438_v35 = vadd.f32 %v7496_v24, %v6981_v12  ;;  %v3551_v41 = vadd.f32 %v7510_v37, %v7362_v26 }
 0x214   : > { %v7572_v8 = vpop.f32.mrb[54].mxu1  ;;  %v9216_v0 = vmax.f32 %v7389_v30, %v7452_v60  ;;  %vm3574_vm15 = vcmp.gt.f32.partialorder %v3550_v22, 0.0  ;;  %v3598_v13 = vmul.f32 0.2, %v3550_v22  ;;  %vm3464_vm0 = vcmp.gt.f32.partialorder %v3440_v50, 0.0 }
 0x215   : > { %v7581_v58 = vpop.f32.mrb[55].mxu1  ;;  %v7587_v38 = vpop.f32.mrb[40].mxu0  ;;  %v3488_v4 = vmul.f32 0.2, %v3440_v50  ;;  %vm3577_vm1 = vcmp.gt.f32.partialorder %v3553_v36, 0.0  ;;  %vm3462_vm2 = vcmp.gt.f32.partialorder %v3438_v35, 0.0  ;;  %5928 = vmatmul.mubr.msk.bf16.gmra.mrb[132].mxu0 %vm2174_vm5, %v2171_v59  ;;  %v9217_v30 = vmax.f32 %v7393_v19, %v7463_v53 }
 0x216   : > { %v7592_v51 = vmax.f32 %v9216_v0, %v3624_v16  ;;  %v7594_v54 = vpop.f32.mrb[41].mxu0  ;;  %v3601_v61 = vmul.f32 0.2, %v3553_v36  ;;  %v3622_v37 = vsel %vm3574_vm15, %v3550_v22, %v3598_v13  ;;  %v3486_v24 = vmul.f32 0.2, %v3438_v35  ;;  %v1501_v53 = vpop.permute.xlu1 %1500 }
 0x217   : > { %vm3575_vm3 = vcmp.gt.f32.partialorder %v3551_v41, 0.0  ;;  %v3599_v15 = vmul.f32 0.2, %v3551_v41  ;;  %v7597_v29 = vpop.f32.mrb[42].mxu0  ;;  %v7602_v60 = vmax.f32 %v9217_v30, %v3622_v37  ;;  %v7604_v16 = vsel %vm3464_vm0, %v3440_v50, %v3488_v4  ;;  %v9221_v37 = vld [vmem:[#allocation14_spill] sm:$0xff] }
 0x218   : > { %v3625_v0 = vsel %vm3577_vm1, %v3553_v36, %v3601_v61  ;;  %v3441_v12 = vadd.f32 %v7504_v46, %v6984_v6  ;;  %v7608_v27 = vpop.f32.mrb[43].mxu0  ;;  %v9218_v59 = vmax.f32 %v7398_v11, %v7471_v45  ;;  %v7617_v25 = vsel %vm3462_vm2, %v3438_v35, %v3486_v24  ;;  %v9219_v36 = vld [vmem:[#allocation24_spill] sm:$0xff]  ;;  %v9222_v45 = vld [vmem:[#allocation7_spill] sm:$0xff] }
 0x219   : > { %v3623_v19 = vsel %vm3575_vm3, %v3551_v41, %v3599_v15  ;;  %v9220_v46 = vmax.f32 %v7401_v39, %v9219_v36  ;;  %v3439_v30 = vadd.f32 %v7512_v32, %v9221_v37  ;;  %vm1691_vm6 = vcmp.eq.s32.totalorder %v1493_v1, %v6351_v62  ;;  %v1497_v41 = vpop.permute.xlu0 %1496 }
 0x21a   : > { %v7615_v13 = vmax.f32 %v9218_v59, %v3625_v0  ;;  %vm3465_vm4 = vcmp.gt.f32.partialorder %v3441_v12, 0.0  ;;  %v3489_v61 = vmul.f32 0.2, %v3441_v12  ;;  %vm1690_vm7 = vcmp.eq.s32.totalorder %v1489_v2, %v6351_v62  ;;  %v9227_v0 = vld [vmem:[#allocation8_spill] sm:$0xff] }
 0x21b   : > { %v7624_v4 = vmax.f32 %v9220_v46, %v3623_v19  ;;  %v3668_v11 = vadd.f32 %v7527_v55, %v9222_v45  ;;  %v5341_v24 = vsel %vm1691_vm6, 1.0, %v9166_v5  ;;  %v5340_v39 = vsel %vm1690_vm7, 1.0, %v9166_v5 }
 0x21c   : > { %v7632_v35 = vsel %vm3465_vm4, %v3441_v12, %v3489_v61  ;;  %vm1693_vm8 = vcmp.eq.s32.totalorder %v1501_v53, %v6351_v62  ;;  %vm3463_vm9 = vcmp.gt.f32.partialorder %v3439_v30, 0.0  ;;  %v3487_v1 = vmul.f32 0.2, %v3439_v30 }
 0x21d   : > { %9223 = vst [vmem:[#allocation24_spill] sm:$0xff] %v7632_v35  ;;  %v7637_v15 = vpop.f32.mrb[44].mxu0  ;;  %v2172_v2 = vpack.c.bf16 %v5341_v24, %v5340_v39  ;;  %vm3692_vm10 = vcmp.gt.f32.partialorder %v3668_v11, 0.0  ;;  %v3716_v55 = vmul.f32 0.2, %v3668_v11  ;;  %v5343_v12 = vsel %vm1693_vm8, 1.0, %v9166_v5 }
 0x21e   : > { %v7641_v59 = vpop.f32.mrb[45].mxu0  ;;  %vm1692_vm11 = vcmp.eq.s32.totalorder %v1497_v41, %v6351_v62  ;;  %v7647_v36 = vsel %vm3463_vm9, %v3439_v30, %v3487_v1  ;;  %v3666_v46 = vadd.f32 %v7538_v31, %v7326_v52  ;;  %v3669_v61 = vadd.f32 %v7549_v7, %v7330_v3 }
 0x21f   : > { %v7645_v19 = vpop.f32.mrb[46].mxu0  ;;  %9225 = vst [vmem:[#allocation7_spill] sm:$0xff] %v7647_v36  ;;  %v5342_v53 = vsel %vm1692_vm11, 1.0, %v9166_v5  ;;  %5931 = vmatprep.mubr.msk.bf16.mxu0 %vm2174_vm5, %v2172_v2  ;;  %v7659_v41 = vsel %vm3692_vm10, %v3668_v11, %v3716_v55  ;;  %v3667_v30 = vadd.f32 %v7555_v21, %v7334_v14  ;;  %v3556_v11 = vadd.f32 %v7557_v34, %v9227_v0 }
 0x220   : > { %v7655_v24 = vpop.f32.mrb[47].mxu0  ;;  %v2173_v50 = vpack.c.bf16 %v5343_v12, %v5342_v53  ;;  %vm3690_vm12 = vcmp.gt.f32.partialorder %v3666_v46, 0.0  ;;  %v3714_v7 = vmul.f32 0.2, %v3666_v46  ;;  %vm3693_vm13 = vcmp.gt.f32.partialorder %v3669_v61, 0.0  ;;  %v9228_v53 = vld [vmem:[#allocation10_spill] sm:$0xff] }
 0x221   : > { %v3717_v2 = vmul.f32 0.2, %v3669_v61  ;;  %vm3691_vm14 = vcmp.gt.f32.partialorder %v3667_v30, 0.0  ;;  %v3715_v22 = vmul.f32 0.2, %v3667_v30  ;;  %v3554_v12 = vadd.f32 %v7567_v28, %v6940_v56 }
 0x222   : > { %v7663_v5 = vpop.f32.mrb[56].mxu1  ;;  %5932 = vmatmul.mubr.msk.bf16.gmra.mrb[136].mxu0 %vm2174_vm5, %v2173_v50  ;;  %v7674_v21 = vsel %vm3690_vm12, %v3666_v46, %v3714_v7  ;;  %v3557_v31 = vadd.f32 %v7572_v8, %v9228_v53  ;;  %v3672_v62 = vadd.f32 %v7587_v38, %v7346_v48  ;;  %vm3580_vm15 = vcmp.gt.f32.partialorder %v3556_v11, 0.0 }
 0x223   : > { %v7667_v1 = vpop.f32.mrb[57].mxu1  ;;  %v7686_v0 = vsel %vm3693_vm13, %v3669_v61, %v3717_v2  ;;  %v7688_v50 = vsel %vm3691_vm14, %v3667_v30, %v3715_v22  ;;  %v3604_v7 = vmul.f32 0.2, %v3556_v11  ;;  %vm3578_vm0 = vcmp.gt.f32.partialorder %v3554_v12, 0.0 }
 0x224   : > { %v7672_v55 = vpop.f32.mrb[58].mxu1  ;;  %v3765_v28 = vmax.f32 %v7543_v43, %v7686_v0  ;;  %v3602_v53 = vmul.f32 0.2, %v3554_v12  ;;  %vm3581_vm1 = vcmp.gt.f32.partialorder %v3557_v31, 0.0  ;;  %v3605_v34 = vmul.f32 0.2, %v3557_v31 }
 0x225   : > { %v7682_v36 = vpop.f32.mrb[59].mxu1  ;;  %v7690_v46 = vpop.f32.mrb[48].mxu0  ;;  %vm3696_vm2 = vcmp.gt.f32.partialorder %v3672_v62, 0.0  ;;  %v3628_v61 = vsel %vm3580_vm15, %v3556_v11, %v3604_v7  ;;  %v3720_v22 = vmul.f32 0.2, %v3672_v62  ;;  %v3555_v30 = vadd.f32 %v7581_v58, %v6966_v17  ;;  %v9229_v0 = vld [vmem:[#allocation26_spill] sm:$0xff] }
 0x226   : > { %v7696_v38 = vpop.f32.mrb[49].mxu0  ;;  %v3670_v2 = vadd.f32 %v7594_v54, %v7352_v40  ;;  %v9230_v8 = vmax.f32 %v7412_v10, %v9229_v0  ;;  %v3626_v39 = vsel %vm3578_vm0, %v3554_v12, %v3602_v53  ;;  %v3629_v35 = vsel %vm3581_vm1, %v3557_v31, %v3605_v34  ;;  %v9234_v34 = vld [vmem:[#allocation27_spill] sm:$0xff] }
 0x227   : > { %v7702_v43 = vpop.f32.mrb[50].mxu0  ;;  %v3673_v32 = vadd.f32 %v7597_v29, %v7356_v42  ;;  %v9231_v58 = vmax.f32 %v7426_v57, %v7523_v49  ;;  %v9232_v54 = vmax.f32 %v7436_v44, %v7536_v20  ;;  %v7723_v10 = vsel %vm3696_vm2, %v3672_v62, %v3720_v22 }
 0x228   : > { %v7707_v56 = vmax.f32 %v9230_v8, %v3628_v61  ;;  %v7711_v11 = vpop.f32.mrb[51].mxu0  ;;  %vm3579_vm3 = vcmp.gt.f32.partialorder %v3555_v30, 0.0  ;;  %v3603_v12 = vmul.f32 0.2, %v3555_v30  ;;  %vm3694_vm4 = vcmp.gt.f32.partialorder %v3670_v2, 0.0 }
 0x229   : > { %v7716_v7 = vmax.f32 %v9231_v58, %v3626_v39  ;;  %v7721_v17 = vmax.f32 %v9232_v54, %v3629_v35  ;;  %v3718_v29 = vmul.f32 0.2, %v3670_v2  ;;  %vm3697_vm6 = vcmp.gt.f32.partialorder %v3673_v32, 0.0 }
 0x22a   : > { %v3721_v53 = vmul.f32 0.2, %v3673_v32  ;;  %v3671_v57 = vadd.f32 %v7608_v27, %v7362_v26  ;;  %v3788_v49 = vadd.f32 %v7637_v15, %v9222_v45  ;;  %v3627_v20 = vsel %vm3579_vm3, %v3555_v30, %v3603_v12  ;;  %v9237_v12 = vld [vmem:[#allocation12_spill] sm:$0xff] }
 0x22b   : > { %9233 = vst [vmem:[#allocation26_spill] sm:$0xff] %v7721_v17  ;;  %v7731_v44 = vsel %vm3694_vm4, %v3670_v2, %v3718_v29  ;;  %v3786_v62 = vadd.f32 %v7641_v59, %v7326_v52  ;;  %v3789_v35 = vadd.f32 %v7645_v19, %v7330_v3  ;;  %v9235_v8 = vmax.f32 %v7444_v63, %v9234_v34 }
 0x22c   : > { %v7746_v15 = vsel %vm3697_vm6, %v3673_v32, %v3721_v53  ;;  %vm3695_vm7 = vcmp.gt.f32.partialorder %v3671_v57, 0.0  ;;  %v3719_v30 = vmul.f32 0.2, %v3671_v57  ;;  %vm3812_vm8 = vcmp.gt.f32.partialorder %v3788_v49, 0.0 }
 0x22d   : > { %v7737_v39 = vpop.f32.mrb[52].mxu0  ;;  %v7742_v61 = vmax.f32 %v9235_v8, %v3627_v20  ;;  %v3836_v19 = vmul.f32 0.2, %v3788_v49  ;;  %vm3810_vm9 = vcmp.gt.f32.partialorder %v3786_v62, 0.0  ;;  %v3834_v63 = vmul.f32 0.2, %v3786_v62 }
 0x22e   : > { %v7748_v22 = vpop.f32.mrb[53].mxu0  ;;  %vm3813_vm10 = vcmp.gt.f32.partialorder %v3789_v35, 0.0  ;;  %v3837_v0 = vmul.f32 0.2, %v3789_v35  ;;  %v7754_v58 = vsel %vm3695_vm7, %v3671_v57, %v3719_v30  ;;  %v3787_v32 = vadd.f32 %v7655_v24, %v7334_v14 }
 0x22f   : > { %9236 = vst [vmem:[#allocation27_spill] sm:$0xff] %v7742_v61  ;;  %v7752_v2 = vpop.f32.mrb[54].mxu0  ;;  %v3860_v54 = vsel %vm3812_vm8, %v3788_v49, %v3836_v19  ;;  %v3560_v29 = vadd.f32 %v7663_v5, %v9237_v12  ;;  %v9238_v8 = vmax.f32 %v7517_v47, %v7659_v41  ;;  %v3858_v57 = vsel %vm3810_vm9, %v3786_v62, %v3834_v63  ;;  %v9240_v47 = vld [vmem:[#allocation13_spill] sm:$0xff] }
 0x230   : > { %v2468_v53 = vpop.f32.mrb[55].mxu0  ;;  %v3861_v30 = vsel %vm3813_vm10, %v3789_v35, %v3837_v0  ;;  %v9239_v24 = vmax.f32 %v7532_v9, %v7674_v21  ;;  %vm3811_vm11 = vcmp.gt.f32.partialorder %v3787_v32, 0.0  ;;  %v3835_v27 = vmul.f32 0.2, %v3787_v32 }
 0x231   : > { %v7767_v59 = vmax.f32 %v9238_v8, %v3860_v54  ;;  %v7776_v5 = vmax.f32 %v3765_v28, %v3861_v30  ;;  %vm3584_vm12 = vcmp.gt.f32.partialorder %v3560_v29, 0.0  ;;  %v3608_v34 = vmul.f32 0.2, %v3560_v29 }
 0x232   : > { %v7760_v20 = vpop.f32.mrb[60].mxu1  ;;  %v7774_v19 = vmax.f32 %v9239_v24, %v3858_v57  ;;  %v3558_v41 = vadd.f32 %v7667_v1, %v9240_v47  ;;  %v3561_v62 = vadd.f32 %v7672_v55, %v6984_v6  ;;  %v3859_v63 = vsel %vm3811_vm11, %v3787_v32, %v3835_v27 }
 0x233   : > { %v7769_v49 = vpop.f32.mrb[61].mxu1  ;;  %v3792_v9 = vadd.f32 %v7690_v46, %v7346_v48  ;;  %v3559_v21 = vadd.f32 %v7682_v36, %v9221_v37  ;;  %v3790_v28 = vadd.f32 %v7696_v38, %v7352_v40  ;;  %v9241_v1 = vmax.f32 %v7562_v23, %v7688_v50 }
 0x234   : > { %v7778_v31 = vpop.f32.mrb[62].mxu1  ;;  %v3632_v55 = vsel %vm3584_vm12, %v3560_v29, %v3608_v34  ;;  %vm3582_vm13 = vcmp.gt.f32.partialorder %v3558_v41, 0.0  ;;  %v3606_v8 = vmul.f32 0.2, %v3558_v41  ;;  %v9242_v46 = vmax.f32 %v7458_v18, %v7604_v16  ;;  %v9245_v16 = vld [vmem:[#allocation23_spill] sm:$0xff] }
 0x235   : > { %v7784_v35 = vpop.f32.mrb[63].mxu1  ;;  %v7792_v0 = vpop.f32.mrb[56].mxu0  ;;  %v7797_v54 = vmax.f32 %v9241_v1, %v3859_v63  ;;  %vm3585_vm14 = vcmp.gt.f32.partialorder %v3561_v62, 0.0  ;;  %v3609_v36 = vmul.f32 0.2, %v3561_v62  ;;  %vm3816_vm15 = vcmp.gt.f32.partialorder %v3792_v9, 0.0 }
 0x236   : > { %v7799_v27 = vpop.f32.mrb[57].mxu0  ;;  %v7804_v32 = vmax.f32 %v9242_v46, %v3632_v55  ;;  %v3630_v57 = vsel %vm3582_vm13, %v3558_v41, %v3606_v8  ;;  %v3840_v30 = vmul.f32 0.2, %v3792_v9  ;;  %vm3583_vm0 = vcmp.gt.f32.partialorder %v3559_v21, 0.0  ;;  %v9246_v63 = vld [vmem:[#allocation24_spill] sm:$0xff] }
 0x237   : > { %v7806_v38 = vpop.f32.mrb[58].mxu0  ;;  %v3607_v23 = vmul.f32 0.2, %v3559_v21  ;;  %v9244_v29 = vmax.f32 %v7465_v33, %v7617_v25  ;;  %v3633_v24 = vsel %vm3585_vm14, %v3561_v62, %v3609_v36  ;;  %vm3814_vm1 = vcmp.gt.f32.partialorder %v3790_v28, 0.0  ;;  %v9249_v33 = vld [vmem:[#allocation25_spill] sm:$0xff]  ;;  %v9250_v25 = vld [vmem:[#allocation7_spill] sm:$0xff] }
 0x238   : > { %9243 = vst [vmem:[#allocation28_spill] sm:$0xff] %v7804_v32  ;;  %v7808_v50 = vpop.f32.mrb[59].mxu0  ;;  %v3838_v18 = vmul.f32 0.2, %v3790_v28  ;;  %v9247_v1 = vmax.f32 %v9245_v16, %v9246_v63  ;;  %v3864_v46 = vsel %vm3816_vm15, %v3792_v9, %v3840_v30  ;;  %v3793_v8 = vadd.f32 %v7702_v43, %v7356_v42 }
 0x239   : > { %v7813_v34 = vmax.f32 %v9244_v29, %v3630_v57  ;;  %v3631_v41 = vsel %vm3583_vm0, %v3559_v21, %v3607_v23  ;;  %v9248_v32 = vmax.f32 %v7592_v51, %v7723_v10  ;;  %v9251_v62 = vmax.f32 %v9249_v33, %v9250_v25  ;;  %v9255_v33 = vld [vmem:[#allocation8_spill] sm:$0xff] }
 0x23a   : > { %v7818_v55 = vmax.f32 %v9247_v1, %v3633_v24  ;;  %v3862_v57 = vsel %vm3814_vm1, %v3790_v28, %v3838_v18  ;;  %v3791_v29 = vadd.f32 %v7711_v11, %v7362_v26  ;;  %v9252_v9 = vmax.f32 %v7602_v60, %v7731_v44 }
 0x23b   : > { %v7825_v37 = vmax.f32 %v9248_v32, %v3864_v46  ;;  %v7830_v36 = vmax.f32 %v9251_v62, %v3631_v41  ;;  %vm3817_vm2 = vcmp.gt.f32.partialorder %v3793_v8, 0.0  ;;  %v3841_v43 = vmul.f32 0.2, %v3793_v8  ;;  %v9256_v62 = vld [vmem:[#allocation9_spill] sm:$0xff] }
 0x23c   : > { %v7837_v21 = vmax.f32 %v9252_v9, %v3862_v57  ;;  %v3908_v51 = vadd.f32 %v7737_v39, %v9222_v45  ;;  %vm3815_vm3 = vcmp.gt.f32.partialorder %v3791_v29, 0.0  ;;  %v3839_v10 = vmul.f32 0.2, %v3791_v29 }
 0x23d   : > { %v3906_v32 = vadd.f32 %v7748_v22, %v7326_v52  ;;  %v3909_v28 = vadd.f32 %v7752_v2, %v7330_v3  ;;  %v7845_v30 = vpop.f32.mrb[60].mxu0  ;;  %v3865_v11 = vsel %vm3817_vm2, %v3793_v8, %v3841_v43  ;;  %v3907_v44 = vadd.f32 %v2468_v53, %v7334_v14 }
 0x23e   : > { %vm3932_vm4 = vcmp.gt.f32.partialorder %v3908_v51, 0.0  ;;  %v3956_v60 = vmul.f32 0.2, %v3908_v51  ;;  %v2497_v23 = vpop.f32.mrb[61].mxu0  ;;  %v9253_v24 = vmax.f32 %v7615_v13, %v7746_v15  ;;  %v3863_v18 = vsel %vm3815_vm3, %v3791_v29, %v3839_v10 }
 0x23f   : > { %vm3930_vm6 = vcmp.gt.f32.partialorder %v3906_v32, 0.0  ;;  %v3954_v16 = vmul.f32 0.2, %v3906_v32  ;;  %v5778_v22 = vpop.f32.mrb[62].mxu0  ;;  %v9254_v2 = vmax.f32 %v7624_v4, %v7754_v58  ;;  %vm3933_vm7 = vcmp.gt.f32.partialorder %v3909_v28, 0.0 }
 0x240   : > { %v7851_v39 = vmax.f32 %v9253_v24, %v3865_v11  ;;  %v7858_v1 = vsel %vm3932_vm4, %v3908_v51, %v3956_v60  ;;  %v3957_v46 = vmul.f32 0.2, %v3909_v28  ;;  %v7860_v53 = vpop.f32.mrb[63].mxu0  ;;  %vm3931_vm8 = vcmp.gt.f32.partialorder %v3907_v44, 0.0  ;;  %v9257_v51 = vld [vmem:[#allocation10_spill] sm:$0xff] }
 0x241   : > { %v7856_v63 = vmax.f32 %v9254_v2, %v3863_v18  ;;  %v7864_v15 = vsel %vm3930_vm6, %v3906_v32, %v3954_v16  ;;  %v3955_v41 = vmul.f32 0.2, %v3907_v44  ;;  %v3676_v25 = vadd.f32 %v7760_v20, %v9255_v33  ;;  %v9258_v18 = vld [vmem:[#allocation11_spill] sm:$0xff] }
 0x242   : > { %v7866_v8 = vpop.f32.mrb[64].mxu1  ;;  %v7870_v58 = vsel %vm3933_vm7, %v3909_v28, %v3957_v46  ;;  %v3674_v57 = vadd.f32 %v7769_v49, %v9256_v62  ;;  %v3677_v10 = vadd.f32 %v7778_v31, %v9257_v51  ;;  %v3912_v32 = vadd.f32 %v7792_v0, %v7346_v48 }
 0x243   : > { %v7876_v29 = vpop.f32.mrb[65].mxu1  ;;  %v7880_v43 = vsel %vm3931_vm8, %v3907_v44, %v3955_v41  ;;  %vm3700_vm9 = vcmp.gt.f32.partialorder %v3676_v25, 0.0  ;;  %v3724_v49 = vmul.f32 0.2, %v3676_v25  ;;  %v3675_v0 = vadd.f32 %v7784_v35, %v9258_v18 }
 0x244   : > { %v7886_v28 = vpop.f32.mrb[66].mxu1  ;;  %vm3698_vm10 = vcmp.gt.f32.partialorder %v3674_v57, 0.0  ;;  %v3722_v60 = vmul.f32 0.2, %v3674_v57  ;;  %vm3701_vm11 = vcmp.gt.f32.partialorder %v3677_v10, 0.0  ;;  %vm3936_vm12 = vcmp.gt.f32.partialorder %v3912_v32, 0.0 }
 0x245   : > { %v7890_v11 = vpop.f32.mrb[67].mxu1  ;;  %v3725_v44 = vmul.f32 0.2, %v3677_v10  ;;  %v7892_v24 = vsel %vm3700_vm9, %v3676_v25, %v3724_v49  ;;  %v3960_v31 = vmul.f32 0.2, %v3912_v32  ;;  %v3910_v16 = vadd.f32 %v7799_v27, %v7352_v40  ;;  %v5781_v2 = vpop.f32.mrb[64].mxu0 }
 0x246   : > { %v7900_v41 = vsel %vm3698_vm10, %v3674_v57, %v3722_v60  ;;  %v3913_v9 = vadd.f32 %v7806_v38, %v7356_v42  ;;  %v2513_v25 = vpop.f32.mrb[65].mxu0  ;;  %vm3699_vm13 = vcmp.gt.f32.partialorder %v3675_v0, 0.0  ;;  %v3911_v49 = vadd.f32 %v7808_v50, %v7362_v26 }
 0x247   : > { %9259 = vst [vmem:[#allocation23_spill] sm:$0xff] %v7900_v41  ;;  %v7902_v20 = vsel %vm3701_vm11, %v3677_v10, %v3725_v44  ;;  %v7910_v4 = vsel %vm3936_vm12, %v3912_v32, %v3960_v31  ;;  %v7912_v27 = vpop.f32.mrb[66].mxu0  ;;  %v3723_v10 = vmul.f32 0.2, %v3675_v0  ;;  %vm3934_vm14 = vcmp.gt.f32.partialorder %v3910_v16, 0.0 }
 0x248   : > { %9260 = vst [vmem:[#allocation24_spill] sm:$0xff] %v7902_v20  ;;  %v3958_v60 = vmul.f32 0.2, %v3910_v16  ;;  %v7916_v44 = vpop.f32.mrb[67].mxu0  ;;  %vm3937_vm15 = vcmp.gt.f32.partialorder %v3913_v9, 0.0  ;;  %v4028_v32 = vadd.f32 %v7845_v30, %v9222_v45  ;;  %v4026_v46 = vadd.f32 %v2497_v23, %v7326_v52 }
 0x249   : > { %v3961_v38 = vmul.f32 0.2, %v3913_v9  ;;  %v7922_v31 = vsel %vm3699_vm13, %v3675_v0, %v3723_v10  ;;  %v4029_v57 = vadd.f32 %v5778_v22, %v7330_v3  ;;  %vm3935_vm0 = vcmp.gt.f32.partialorder %v3911_v49, 0.0 }
 0x24a   : > { %9261 = vst [vmem:[#allocation25_spill] sm:$0xff] %v7922_v31  ;;  %v7924_v35 = vsel %vm3934_vm14, %v3910_v16, %v3958_v60  ;;  %v3959_v30 = vmul.f32 0.2, %v3911_v49  ;;  %vm4052_vm1 = vcmp.gt.f32.partialorder %v4028_v32, 0.0  ;;  %v4076_v0 = vmul.f32 0.2, %v4028_v32 }
 0x24b   : > { %v7932_v17 = vsel %vm3937_vm15, %v3913_v9, %v3961_v38  ;;  %vm4050_vm2 = vcmp.gt.f32.partialorder %v4026_v46, 0.0  ;;  %v4074_v23 = vmul.f32 0.2, %v4026_v46  ;;  %vm4053_vm3 = vcmp.gt.f32.partialorder %v4029_v57, 0.0 }
 0x24c   : > { %v4077_v22 = vmul.f32 0.2, %v4029_v57  ;;  %v7938_v10 = vsel %vm3935_vm0, %v3911_v49, %v3959_v30  ;;  %v4100_v60 = vsel %vm4052_vm1, %v4028_v32, %v4076_v0  ;;  %v4027_v9 = vadd.f32 %v7860_v53, %v7334_v14 }
 0x24d   : > { %v7936_v16 = vpop.f32.mrb[68].mxu0  ;;  %v3680_v38 = vadd.f32 %v7866_v8, %v9237_v12  ;;  %v9262_v20 = vmax.f32 %v7767_v59, %v7858_v1  ;;  %v4098_v61 = vsel %vm4050_vm2, %v4026_v46, %v4074_v23  ;;  %v9263_v32 = vmax.f32 %v7774_v19, %v7864_v15 }
 0x24e   : > { %v2529_v13 = vpop.f32.mrb[69].mxu0  ;;  %v4101_v41 = vsel %vm4053_vm3, %v4029_v57, %v4077_v22  ;;  %v9264_v53 = vmax.f32 %v7776_v5, %v7870_v58  ;;  %vm4051_vm4 = vcmp.gt.f32.partialorder %v4027_v9, 0.0  ;;  %v4075_v0 = vmul.f32 0.2, %v4027_v9  ;;  %v9265_v58 = vld [vmem:[#allocation14_spill] sm:$0xff] }
 0x24f   : > { %v7949_v31 = vmax.f32 %v9262_v20, %v4100_v60  ;;  %v5786_v49 = vpop.f32.mrb[70].mxu0  ;;  %v7954_v30 = vmax.f32 %v9263_v32, %v4098_v61  ;;  %vm3704_vm6 = vcmp.gt.f32.partialorder %v3680_v38, 0.0  ;;  %v3728_v59 = vmul.f32 0.2, %v3680_v38 }
 0x250   : > { %v7959_v8 = vmax.f32 %v9264_v53, %v4101_v41  ;;  %v2532_v50 = vpop.f32.mrb[71].mxu0  ;;  %v3678_v1 = vadd.f32 %v7876_v29, %v9240_v47  ;;  %v3681_v19 = vadd.f32 %v7886_v28, %v6984_v6  ;;  %v4099_v15 = vsel %vm4051_vm4, %v4027_v9, %v4075_v0 }
 0x251   : > { %v4032_v5 = vadd.f32 %v5781_v2, %v7346_v48  ;;  %v3679_v20 = vadd.f32 %v7890_v11, %v9265_v58  ;;  %v4030_v46 = vadd.f32 %v2513_v25, %v7352_v40  ;;  %v9266_v57 = vmax.f32 %v7797_v54, %v7880_v43  ;;  %v9267_v2 = vld [vmem:[#allocation28_spill] sm:$0xff] }
 0x252   : > { %v7961_v12 = vpop.f32.mrb[68].mxu1  ;;  %v7980_v29 = vsel %vm3704_vm6, %v3680_v38, %v3728_v59  ;;  %vm3702_vm7 = vcmp.gt.f32.partialorder %v3678_v1, 0.0  ;;  %v3726_v28 = vmul.f32 0.2, %v3678_v1  ;;  %vm3705_vm8 = vcmp.gt.f32.partialorder %v3681_v19, 0.0 }
 0x253   : > { %v7967_v61 = vpop.f32.mrb[69].mxu1  ;;  %v7978_v23 = vmax.f32 %v9266_v57, %v4099_v15  ;;  %v3729_v11 = vmul.f32 0.2, %v3681_v19  ;;  %vm4056_vm9 = vcmp.gt.f32.partialorder %v4032_v5, 0.0  ;;  %v4080_v32 = vmul.f32 0.2, %v4032_v5 }
 0x254   : > { %v7973_v41 = vpop.f32.mrb[70].mxu1  ;;  %v7988_v9 = vsel %vm3702_vm7, %v3678_v1, %v3726_v28  ;;  %vm3703_vm10 = vcmp.gt.f32.partialorder %v3679_v20, 0.0  ;;  %v3727_v54 = vmul.f32 0.2, %v3679_v20  ;;  %vm4054_vm11 = vcmp.gt.f32.partialorder %v4030_v46, 0.0 }
 0x255   : > { %v7982_v22 = vpop.f32.mrb[71].mxu1  ;;  %v7986_v25 = vpop.f32.mrb[72].mxu0  ;;  %9268 = vst [vmem:[#allocation7_spill] sm:$0xff] %v7988_v9  ;;  %v7994_v53 = vsel %vm3705_vm8, %v3681_v19, %v3729_v11  ;;  %v4078_v0 = vmul.f32 0.2, %v4030_v46  ;;  %v4104_v57 = vsel %vm4056_vm9, %v4032_v5, %v4080_v32  ;;  %v4033_v28 = vadd.f32 %v7912_v27, %v7356_v42 }
 0x256   : > { %v7990_v43 = vpop.f32.mrb[73].mxu0  ;;  %v3777_v15 = vmax.f32 %v7818_v55, %v7994_v53  ;;  %v8000_v1 = vsel %vm3703_vm10, %v3679_v20, %v3727_v54  ;;  %vm4362_vm12 = vcmask 257024   ;;  %v9269_v19 = vmax.f32 %v7825_v37, %v7910_v4 }
 0x257   : > { %v7996_v59 = vpop.f32.mrb[74].mxu0  ;;  %v4102_v9 = vsel %vm4054_vm11, %v4030_v46, %v4078_v0  ;;  %v4031_v5 = vadd.f32 %v7916_v44, %v7362_v26  ;;  %v9270_v20 = vmax.f32 %v7837_v21, %v7924_v35  ;;  %vm4057_vm13 = vcmp.gt.f32.partialorder %v4033_v28, 0.0 }
 0x258   : > { %v8004_v60 = vpop.f32.mrb[75].mxu0  ;;  %v8009_v11 = vmax.f32 %v9269_v19, %v4104_v57  ;;  %v4081_v32 = vmul.f32 0.2, %v4033_v28  ;;  %v4148_v37 = vadd.f32 %v7936_v16, %v9222_v45  ;;  %v4146_v54 = vadd.f32 %v2529_v13, %v7326_v52 }
 0x259   : > { %v8018_v27 = vmax.f32 %v9270_v20, %v4102_v9  ;;  %vm4055_vm14 = vcmp.gt.f32.partialorder %v4031_v5, 0.0  ;;  %v4079_v4 = vmul.f32 0.2, %v4031_v5  ;;  %v4149_v57 = vadd.f32 %v5786_v49, %v7330_v3 }
 0x25a   : > { %v4105_v46 = vsel %vm4057_vm13, %v4033_v28, %v4081_v32  ;;  %vm4172_vm15 = vcmp.gt.f32.partialorder %v4148_v37, 0.0  ;;  %v4196_v0 = vmul.f32 0.2, %v4148_v37  ;;  %v4147_v44 = vadd.f32 %v2532_v50, %v7334_v14 }
 0x25b   : > { %v9271_v21 = vmax.f32 %v7851_v39, %v7932_v17  ;;  %v4103_v9 = vsel %vm4055_vm14, %v4031_v5, %v4079_v4  ;;  %vm4170_vm0 = vcmp.gt.f32.partialorder %v4146_v54, 0.0  ;;  %v4194_v45 = vmul.f32 0.2, %v4146_v54 }
 0x25c   : > { %v9272_v52 = vmax.f32 %v7856_v63, %v7938_v10  ;;  %v4220_v13 = vsel %vm4172_vm15, %v4148_v37, %v4196_v0  ;;  %vm4173_vm1 = vcmp.gt.f32.partialorder %v4149_v57, 0.0  ;;  %v4197_v49 = vmul.f32 0.2, %v4149_v57 }
 0x25d   : > { %v8029_v35 = vmax.f32 %v9271_v21, %v4105_v46  ;;  %v8031_v16 = vpop.f32.mrb[76].mxu0  ;;  %v8041_v50 = vmax.f32 %v7949_v31, %v4220_v13  ;;  %v4218_v17 = vsel %vm4170_vm0, %v4146_v54, %v4194_v45  ;;  %vm4171_vm2 = vcmp.gt.f32.partialorder %v4147_v44, 0.0 }
 0x25e   : > { %v8036_v3 = vmax.f32 %v9272_v52, %v4103_v9  ;;  %v8038_v14 = vpop.f32.mrb[77].mxu0  ;;  %v4195_v39 = vmul.f32 0.2, %v4147_v44  ;;  %v8051_v63 = vmax.f32 %v7954_v30, %v4218_v17  ;;  %v4221_v10 = vsel %vm4173_vm1, %v4149_v57, %v4197_v49 }
 0x25f   : > { %v8043_v28 = vpop.f32.mrb[78].mxu0  ;;  %v3796_v19 = vadd.f32 %v7961_v12, %v9255_v33  ;;  %v3794_v31 = vadd.f32 %v7967_v61, %v9256_v62  ;;  %vm4387_vm3 = vcmask 261120   ;;  %v5484_v20 = vpack.c.bf16 %v8041_v50, %v8041_v50 }
 0x260   : > { %v8057_v5 = vpop.f32.mrb[79].mxu0  ;;  %v8062_v32 = vmax.f32 %v7959_v8, %v4221_v10  ;;  %v4219_v37 = vsel %vm4171_vm2, %v4147_v44, %v4195_v39  ;;  %v3797_v30 = vadd.f32 %v7973_v41, %v9257_v51  ;;  %v5482_v12 = vpack.c.bf16 %v8051_v63, %v8051_v63 }
 0x261   : > { %v4243_v4 = vmax.f32 %v7978_v23, %v4219_v37  ;;  %vm3820_vm4 = vcmp.gt.f32.partialorder %v3796_v19, 0.0  ;;  %v3844_v61 = vmul.f32 0.2, %v3796_v19  ;;  %4365 = vst.msk [vmem:[%s8048_s12 + $0x8] sm:$0xf] %vm4362_vm12, %v5484_v20  ;;  %vm3818_vm6 = vcmp.gt.f32.partialorder %v3794_v31, 0.0 }
 0x262   : > { %v8069_v54 = vpop.f32.mrb[72].mxu1  ;;  %v5485_v8 = vpack.c.bf16 %v8062_v32, %v8062_v32  ;;  %v3842_v57 = vmul.f32 0.2, %v3794_v31  ;;  %vm3821_vm7 = vcmp.gt.f32.partialorder %v3797_v30, 0.0  ;;  %4363 = vst.msk [vmem:[%s8048_s12] sm:$0xf] %vm4362_vm12, %v5482_v12  ;;  %v4152_v44 = vadd.f32 %v7986_v25, %v7346_v48 }
 0x263   : > { %v8075_v41 = vpop.f32.mrb[73].mxu1  ;;  %v5483_v46 = vpack.c.bf16 %v4243_v4, %v4243_v4  ;;  %v3868_v23 = vsel %vm3820_vm4, %v3796_v19, %v3844_v61  ;;  %v3845_v0 = vmul.f32 0.2, %v3797_v30  ;;  %v9273_v9 = vmax.f32 %v7707_v56, %v7892_v24  ;;  %v9274_v48 = vld [vmem:[#allocation23_spill] sm:$0xff] }
 0x264   : > { %v8081_v21 = vpop.f32.mrb[74].mxu1  ;;  %4366 = vst.msk [vmem:[%s8048_s12 + $0xc] sm:$0xf] %vm4362_vm12, %v5485_v8  ;;  %v3866_v52 = vsel %vm3818_vm6, %v3794_v31, %v3842_v57  ;;  %v3795_v13 = vadd.f32 %v7982_v22, %v9258_v18  ;;  %v4150_v49 = vadd.f32 %v7990_v43, %v7352_v40  ;;  %v9275_v25 = vmax.f32 %v7716_v7, %v9274_v48  ;;  %v9276_v22 = vld [vmem:[#allocation26_spill] sm:$0xff]  ;;  %v9277_v31 = vld [vmem:[#allocation24_spill] sm:$0xff] }
 0x265   : > { %v8088_v45 = vmax.f32 %v9273_v9, %v3868_v23  ;;  %v8094_v17 = vpop.f32.mrb[75].mxu1  ;;  %v8096_v39 = vpop.f32.mrb[80].mxu0  ;;  %4364 = vst.msk [vmem:[%s8048_s12 + $0x4] sm:$0xf] %vm4362_vm12, %v5483_v46  ;;  %v3869_v56 = vsel %vm3821_vm7, %v3797_v30, %v3845_v0  ;;  %vm4176_vm8 = vcmp.gt.f32.partialorder %v4152_v44, 0.0  ;;  %v9278_v40 = vmax.f32 %v9276_v22, %v9277_v31  ;;  %v9280_v9 = vld [vmem:[#allocation25_spill] sm:$0xff] }
 0x266   : > { %v8103_v10 = vmax.f32 %v9275_v25, %v3866_v52  ;;  %v4200_v24 = vmul.f32 0.2, %v4152_v44  ;;  %v8106_v19 = vpop.f32.mrb[81].mxu0  ;;  %vm3819_vm9 = vcmp.gt.f32.partialorder %v3795_v13, 0.0  ;;  %v3843_v20 = vmul.f32 0.2, %v3795_v13 }
 0x267   : > { %v8111_v43 = vmax.f32 %v9278_v40, %v3869_v56  ;;  %vm4174_vm10 = vcmp.gt.f32.partialorder %v4150_v49, 0.0  ;;  %v8113_v37 = vpop.f32.mrb[82].mxu0  ;;  %v4198_v7 = vmul.f32 0.2, %v4150_v49  ;;  %v4153_v61 = vadd.f32 %v7996_v59, %v7356_v42 }
 0x268   : > { %v4224_v12 = vsel %vm4176_vm8, %v4152_v44, %v4200_v24  ;;  %v4621_v30 = vmul.f32 %v8041_v50, %v8041_v50  ;;  %v8119_v8 = vpop.f32.mrb[83].mxu0  ;;  %v3867_v46 = vsel %vm3819_vm9, %v3795_v13, %v3843_v20  ;;  %v4151_v23 = vadd.f32 %v8004_v60, %v7362_v26  ;;  %v9279_v44 = vld [vmem:[#allocation27_spill] sm:$0xff] }
 0x269   : > { %v8122_v57 = vmax.f32 %v8009_v11, %v4224_v12  ;;  %v4619_v0 = vmul.f32 %v8051_v63, %v8051_v63  ;;  %v9281_v52 = vmax.f32 %v9279_v44, %v9280_v9  ;;  %v4222_v59 = vsel %vm4174_vm10, %v4150_v49, %v4198_v7  ;;  %v9285_v44 = vld [vmem:[#allocation17_spill] sm:$0xff] }
 0x26a   : > { %vm4177_vm11 = vcmp.gt.f32.partialorder %v4153_v61, 0.0  ;;  %v4201_v48 = vmul.f32 0.2, %v4153_v61  ;;  %v8136_v13 = vmax.f32 %v8018_v27, %v4222_v59  ;;  %v4649_v25 = vsel %vm4387_vm3, %v4621_v30, 0.0 }
 0x26b   : > { %v8131_v42 = vmax.f32 %v9281_v52, %v3867_v46  ;;  %v5488_v11 = vpack.c.bf16 %v8122_v57, %v8122_v57  ;;  %vm4175_vm13 = vcmp.gt.f32.partialorder %v4151_v23, 0.0  ;;  %4650 = vadd.xlane.f32.xlu1 %v4649_v25  ;;  %v4199_v60 = vmul.f32 0.2, %v4151_v23  ;;  %v9284_v46 = vld [vmem:[#allocation16_spill] sm:$0xff]  ;;  %v9286_v25 = vld [vmem:[#allocation18_spill] sm:$0xff] }
 0x26c   : > { %v4225_v26 = vsel %vm4177_vm11, %v4153_v61, %v4201_v48  ;;  %v4643_v56 = vsel %vm4387_vm3, %v4619_v0, 0.0  ;;  %v4266_v24 = vpack.c.bf16 %v4243_v4, %v8051_v63  ;;  %v5486_v49 = vpack.c.bf16 %v8136_v13, %v8136_v13 }
 0x26d   : > { %9282 = vst [vmem:[#allocation8_spill] sm:$0xff] %v8131_v42  ;;  %4369 = vst.msk [vmem:[%s8048_s12 + $0x18] sm:$0xf] %vm4362_vm12, %v5488_v11  ;;  %v8146_v22 = vmax.f32 %v8029_v35, %v4225_v26  ;;  %4644 = vadd.xlane.f32.xlu0 %v4643_v56  ;;  %v4620_v27 = vmul.f32 %v4243_v4, %v4243_v4  ;;  %v8150_v31 = vpack.c.bf16 %v8062_v32, %v8041_v50  ;;  %v8152_v40 = vpop.f32.mrb[84].mxu0  ;;  %v9283_v35 = vld [vmem:[#allocation15_spill] sm:$0xff] }
 0x26e   : > { %v4223_v20 = vsel %vm4175_vm13, %v4151_v23, %v4199_v60  ;;  %5985 = vmatprep.subr.msk.bf16.mxu1 %vm4387_vm3, %v4266_v24  ;;  %5943 = vmatprep.mubr.msk.bf16.mxu1 %vm4387_vm3, %v4266_v24  ;;  %v4389_v63 = vsel %vm4387_vm3, %v4266_v24, 0  ;;  %v4622_v12 = vmul.f32 %v8062_v32, %v8062_v32  ;;  %v3348_v7 = vadd.f32 %v8031_v16, %v9283_v35  ;;  %v8161_v4 = vpop.f32.mrb[85].mxu0 }
 0x26f   : > { %4367 = vst.msk [vmem:[%s8048_s12 + $0x10] sm:$0xf] %vm4362_vm12, %v5486_v49  ;;  %v5489_v50 = vpack.c.bf16 %v8146_v22, %v8146_v22  ;;  %v8168_v61 = vmax.f32 %v8036_v3, %v4223_v20  ;;  %5936 = vmatpush3.bf16.xpose.msra.mxu1 %v4389_v63  ;;  %v4646_v30 = vsel %vm4387_vm3, %v4620_v27, 0.0  ;;  %v3346_v32 = vadd.f32 %v8038_v14, %v9284_v46  ;;  %v8173_v23 = vpop.f32.mrb[86].mxu0  ;;  %v9287_v49 = vld [vmem:[#allocation12_spill] sm:$0xff] }
 0x270   : > { %4647 = vadd.xlane.f32.xlu1 %v4646_v30  ;;  %5986 = vmatprep.subr.msk.bf16.mxu1 %vm4387_vm3, %v8150_v31  ;;  %v4652_v16 = vsel %vm4387_vm3, %v4622_v12, 0.0  ;;  %vm3372_vm14 = vcmp.gt.f32.partialorder %v3348_v7, 0.0  ;;  %v3396_v0 = vmul.f32 0.2, %v3348_v7  ;;  %v3349_v3 = vadd.f32 %v8043_v28, %v9285_v44  ;;  %v8180_v9 = vpop.f32.mrb[87].mxu0 }
 0x271   : > { %4370 = vst.msk [vmem:[%s8048_s12 + $0x1c] sm:$0xf] %vm4362_vm12, %v5489_v50  ;;  %v5487_v14 = vpack.c.bf16 %v8168_v61, %v8168_v61  ;;  %4653 = vadd.xlane.f32.xlu0 %v4652_v16  ;;  %vm3370_vm15 = vcmp.gt.f32.partialorder %v3346_v32, 0.0  ;;  %v3394_v52 = vmul.f32 0.2, %v3346_v32  ;;  %v4625_v59 = vmul.f32 %v8122_v57, %v8122_v57 }
 0x272   : > { %v8188_v48 = vsel %vm3372_vm14, %v3348_v7, %v3396_v0  ;;  %vm3373_vm0 = vcmp.gt.f32.partialorder %v3349_v3, 0.0  ;;  %v3397_v11 = vmul.f32 0.2, %v3349_v3  ;;  %v3347_v28 = vadd.f32 %v8057_v5, %v9286_v25  ;;  %v8192_v26 = vpop.f32.mrb[76].mxu1 }
 0x273   : > { %4368 = vst.msk [vmem:[%s8048_s12 + $0x14] sm:$0xf] %vm4362_vm12, %v5487_v14  ;;  %v8196_v60 = vsel %vm3370_vm15, %v3346_v32, %v3394_v52  ;;  %v4661_v56 = vsel %vm4387_vm3, %v4625_v59, 0.0  ;;  %v4626_v24 = vmul.f32 %v8146_v22, %v8146_v22  ;;  %v3800_v27 = vadd.f32 %v8069_v54, %v9287_v49  ;;  %v8203_v20 = vpop.f32.mrb[77].mxu1 }
 0x274   : > { %v8205_v63 = vsel %vm3373_vm0, %v3349_v3, %v3397_v11  ;;  %4662 = vadd.xlane.f32.xlu1 %v4661_v56  ;;  %vm3371_vm1 = vcmp.gt.f32.partialorder %v3347_v28, 0.0  ;;  %v3395_v5 = vmul.f32 0.2, %v3347_v28  ;;  %v3798_v12 = vadd.f32 %v8075_v41, %v9240_v47  ;;  %v8209_v7 = vpop.f32.mrb[78].mxu1 }
 0x275   : > { %v4664_v50 = vsel %vm4387_vm3, %v4626_v24, 0.0  ;;  %vm3824_vm2 = vcmp.gt.f32.partialorder %v3800_v27, 0.0  ;;  %v3848_v30 = vmul.f32 0.2, %v3800_v27  ;;  %v4392_v32 = vsel %vm4387_vm3, %v8150_v31, 0  ;;  %v8214_v54 = vpop.f32.mrb[79].mxu1 }
 0x276   : > { %v8216_v16 = vsel %vm3371_vm1, %v3347_v28, %v3395_v5  ;;  %4665 = vadd.xlane.f32.xlu0 %v4664_v50  ;;  %vm3822_vm4 = vcmp.gt.f32.partialorder %v3798_v12, 0.0  ;;  %v3846_v0 = vmul.f32 0.2, %v3798_v12  ;;  %v4623_v3 = vmul.f32 %v8136_v13, %v8136_v13  ;;  %v8220_v41 = vpop.f32.mrb[88].mxu0  ;;  %v9289_v50 = vld [vmem:[#allocation19_spill] sm:$0xff] }
 0x277   : > { %v3872_v14 = vsel %vm3824_vm2, %v3800_v27, %v3848_v30  ;;  %5938 = vmatpush3.bf16.xpose.msra.mxu1 %v4392_v32  ;;  %v3801_v52 = vadd.f32 %v8081_v21, %v6984_v6  ;;  %v8226_v59 = vpack.c.bf16 %v8168_v61, %v8136_v13  ;;  %v3799_v11 = vadd.f32 %v8094_v17, %v9265_v58  ;;  %v8230_v28 = vpop.f32.mrb[89].mxu0  ;;  %v9290_v13 = vld [vmem:[#allocation7_spill] sm:$0xff] }
 0x278   : > { %v9288_v56 = vmax.f32 %v9267_v2, %v7980_v29  ;;  %v3870_v5 = vsel %vm3822_vm4, %v3798_v12, %v3846_v0  ;;  %v4655_v27 = vsel %vm4387_vm3, %v4623_v3, 0.0  ;;  %v3352_v21 = vadd.f32 %v8096_v39, %v9289_v50  ;;  %v8240_v30 = vpop.f32.mrb[90].mxu0  ;;  %v9293_v3 = vld [vmem:[#allocation20_spill] sm:$0xff] }
 0x279   : > { %v9291_v32 = vmax.f32 %v7813_v34, %v9290_v13  ;;  %4656 = vadd.xlane.f32.xlu1 %v4655_v27  ;;  %vm3825_vm6 = vcmp.gt.f32.partialorder %v3801_v52, 0.0  ;;  %v3849_v17 = vmul.f32 0.2, %v3801_v52  ;;  %5987 = vmatprep.subr.msk.bf16.mxu1 %vm4387_vm3, %v8226_v59  ;;  %vm3823_vm7 = vcmp.gt.f32.partialorder %v3799_v11, 0.0  ;;  %v8249_v29 = vpop.f32.mrb[91].mxu0 }
 0x27a   : > { %v8235_v24 = vmax.f32 %v9288_v56, %v3872_v14  ;;  %v3847_v2 = vmul.f32 0.2, %v3799_v11  ;;  %vm3376_vm8 = vcmp.gt.f32.partialorder %v3352_v21, 0.0  ;;  %v3400_v12 = vmul.f32 0.2, %v3352_v21  ;;  %v9294_v14 = vld [vmem:[#allocation21_spill] sm:$0xff] }
 0x27b   : > { %v8245_v38 = vmax.f32 %v9291_v32, %v3870_v5  ;;  %v4624_v39 = vmul.f32 %v8168_v61, %v8168_v61  ;;  %v3873_v0 = vsel %vm3825_vm6, %v3801_v52, %v3849_v17  ;;  %v3350_v34 = vadd.f32 %v8106_v19, %v9293_v3  ;;  %v9295_v5 = vld [vmem:[#allocation22_spill] sm:$0xff] }
 0x27c   : > { %v3353_v56 = vadd.f32 %v8113_v37, %v9294_v14  ;;  %v3351_v27 = vadd.f32 %v8119_v8, %v9295_v5  ;;  %v8262_v13 = vmax.f32 %v3777_v15, %v3873_v0  ;;  %v3871_v32 = vsel %vm3823_vm7, %v3799_v11, %v3847_v2 }
 0x27d   : > { %9292 = vst [vmem:[#allocation14_spill] sm:$0xff] %v8245_v38  ;;  %v8264_v38 = vsel %vm3376_vm8, %v3352_v21, %v3400_v12  ;;  %v4658_v61 = vsel %vm4387_vm3, %v4624_v39, 0.0  ;;  %v9296_v52 = vmax.f32 %v7830_v36, %v8000_v1  ;;  %vm3374_vm9 = vcmp.gt.f32.partialorder %v3350_v34, 0.0  ;;  %v8272_v8 = vpop.f32.mrb[92].mxu0 }
 0x27e   : > { %4659 = vadd.xlane.f32.xlu0 %v4658_v61  ;;  %v3398_v37 = vmul.f32 0.2, %v3350_v34  ;;  %vm3377_vm10 = vcmp.gt.f32.partialorder %v3353_v56, 0.0  ;;  %v3401_v17 = vmul.f32 0.2, %v3353_v56  ;;  %vm3375_vm11 = vcmp.gt.f32.partialorder %v3351_v27, 0.0 }
 0x27f   : > { %v8270_v19 = vmax.f32 %v9296_v52, %v3871_v32  ;;  %v3399_v55 = vmul.f32 0.2, %v3351_v27  ;;  %v4395_v53 = vsel %vm4387_vm3, %v8226_v59, 0  ;;  %v8280_v36 = vpack.c.bf16 %v8146_v22, %v8122_v57  ;;  %v8286_v21 = vpop.f32.mrb[93].mxu0 }
 0x280   : > { %v8276_v15 = vsel %vm3374_vm9, %v3350_v34, %v3398_v37  ;;  %5940 = vmatpush3.bf16.xpose.msra.mxu1 %v4395_v53  ;;  %v3444_v1 = vadd.f32 %v8152_v40, %v9283_v35  ;;  %v3442_v11 = vadd.f32 %v8161_v4, %v9284_v46  ;;  %v8288_v2 = vsel %vm3377_vm10, %v3353_v56, %v3401_v17  ;;  %v8296_v57 = vpop.f32.mrb[94].mxu0 }
 0x281   : > { %v8290_v12 = vsel %vm3375_vm11, %v3351_v27, %v3399_v55  ;;  %v3445_v39 = vadd.f32 %v8173_v23, %v9285_v44  ;;  %v3443_v0 = vadd.f32 %v8180_v9, %v9286_v25  ;;  %5988 = vmatprep.subr.msk.bf16.mxu1 %vm4387_vm3, %v8280_v36  ;;  %v3916_v23 = vadd.f32 %v8192_v26, %v9255_v33  ;;  %v3142_v32 = vpop.f32.mrb[95].mxu0 }
 0x282   : > { %vm3468_vm13 = vcmp.gt.f32.partialorder %v3444_v1, 0.0  ;;  %v3492_v22 = vmul.f32 0.2, %v3444_v1  ;;  %vm3466_vm14 = vcmp.gt.f32.partialorder %v3442_v11, 0.0  ;;  %v3490_v40 = vmul.f32 0.2, %v3442_v11 }
 0x283   : > { %vm3469_vm15 = vcmp.gt.f32.partialorder %v3445_v39, 0.0  ;;  %v3493_v4 = vmul.f32 0.2, %v3445_v39  ;;  %vm3467_vm0 = vcmp.gt.f32.partialorder %v3443_v0, 0.0  ;;  %v3491_v34 = vmul.f32 0.2, %v3443_v0 }
 0x284   : > { %v8300_v56 = vsel %vm3468_vm13, %v3444_v1, %v3492_v22  ;;  %v8302_v27 = vsel %vm3466_vm14, %v3442_v11, %v3490_v40  ;;  %v3914_v9 = vadd.f32 %v8203_v20, %v9256_v62  ;;  %v8308_v61 = vpop.f32.mrb[80].mxu1  ;;  %vm3940_vm1 = vcmp.gt.f32.partialorder %v3916_v23, 0.0 }
 0x285   : > { %v8314_v17 = vsel %vm3469_vm15, %v3445_v39, %v3493_v4  ;;  %v8316_v55 = vsel %vm3467_vm0, %v3443_v0, %v3491_v34  ;;  %v8318_v53 = vpop.f32.mrb[81].mxu1  ;;  %v3964_v1 = vmul.f32 0.2, %v3916_v23  ;;  %v8326_v22 = vpop.f32.mrb[96].mxu0  ;;  %v4398_v39 = vsel %vm4387_vm3, %v8280_v36, 0 }
 0x286   : > { %v8324_v11 = vpop.f32.mrb[82].mxu1  ;;  %vm3938_vm2 = vcmp.gt.f32.partialorder %v3914_v9, 0.0  ;;  %v3962_v40 = vmul.f32 0.2, %v3914_v9  ;;  %v3917_v0 = vadd.f32 %v8209_v7, %v9257_v51  ;;  %v8334_v34 = vpop.f32.mrb[97].mxu0  ;;  %v3915_v20 = vadd.f32 %v8214_v54, %v9258_v18 }
 0x287   : > { %v8332_v4 = vpop.f32.mrb[83].mxu1  ;;  %v8336_v26 = vsel %vm3940_vm1, %v3916_v23, %v3964_v1  ;;  %v3448_v37 = vadd.f32 %v8220_v41, %v9289_v50  ;;  %v3446_v52 = vadd.f32 %v8230_v28, %v9293_v3  ;;  %v8344_v62 = vpop.f32.mrb[98].mxu0 }
 0x288   : > { %9297 = vst [vmem:[#allocation28_spill] sm:$0xff] %v8336_v26  ;;  %5942 = vmatpush3.bf16.xpose.msra.mxu1 %v4398_v39  ;;  %v8348_v51 = vsel %vm3938_vm2, %v3914_v9, %v3962_v40  ;;  %vm3941_vm4 = vcmp.gt.f32.partialorder %v3917_v0, 0.0  ;;  %v3965_v23 = vmul.f32 0.2, %v3917_v0  ;;  %v8350_v1 = vpop.f32.mrb[99].mxu0  ;;  %vm3939_vm6 = vcmp.gt.f32.partialorder %v3915_v20, 0.0 }
 0x289   : > { %9298 = vst [vmem:[#allocation23_spill] sm:$0xff] %v8348_v51  ;;  %v3963_v39 = vmul.f32 0.2, %v3915_v20  ;;  %vm3472_vm7 = vcmp.gt.f32.partialorder %v3448_v37, 0.0  ;;  %v3496_v28 = vmul.f32 0.2, %v3448_v37  ;;  %v3449_v40 = vadd.f32 %v8240_v30, %v9294_v14 }
 0x28a   : > { %v8354_v41 = vsel %vm3941_vm4, %v3917_v0, %v3965_v23  ;;  %vm3470_vm8 = vcmp.gt.f32.partialorder %v3446_v52, 0.0  ;;  %v3494_v18 = vmul.f32 0.2, %v3446_v52  ;;  %v3447_v26 = vadd.f32 %v8249_v29, %v9295_v5 }
 0x28b   : > { %v8358_v9 = vsel %vm3939_vm6, %v3915_v20, %v3963_v39  ;;  %v8366_v51 = vsel %vm3472_vm7, %v3448_v37, %v3496_v28  ;;  %v3564_v23 = vadd.f32 %v8272_v8, %v9283_v35  ;;  %vm3473_vm9 = vcmp.gt.f32.partialorder %v3449_v40, 0.0 }
 0x28c   : > { %9299 = vst [vmem:[#allocation26_spill] sm:$0xff] %v8358_v9  ;;  %v8368_v0 = vsel %vm3470_vm8, %v3446_v52, %v3494_v18  ;;  %v3497_v30 = vmul.f32 0.2, %v3449_v40  ;;  %vm3471_vm10 = vcmp.gt.f32.partialorder %v3447_v26, 0.0  ;;  %v3495_v29 = vmul.f32 0.2, %v3447_v26 }
 0x28d   : > { %v5897_v7 = vpop.f32.mrb[100].mxu0  ;;  %vm3588_vm11 = vcmp.gt.f32.partialorder %v3564_v23, 0.0  ;;  %v3612_v18 = vmul.f32 0.2, %v3564_v23  ;;  %v3562_v8 = vadd.f32 %v8286_v21, %v9284_v46  ;;  %v3565_v37 = vadd.f32 %v8296_v57, %v9285_v44 }
 0x28e   : > { %v8378_v52 = vsel %vm3473_vm9, %v3449_v40, %v3497_v30  ;;  %v3563_v28 = vadd.f32 %v3142_v32, %v9286_v25  ;;  %v8387_v54 = vpop.f32.mrb[101].mxu0  ;;  %v8391_v39 = vsel %vm3471_vm10, %v3447_v26, %v3495_v29  ;;  %v3920_v30 = vadd.f32 %v8308_v61, %v9287_v49 }
 0x28f   : > { %5944 = vmatmul.mubr.msk.bf16.vlgmr.msra.gmra.mrb[100].mxu1 %vm4387_vm3, %v8150_v31  ;;  %v3636_v40 = vsel %vm3588_vm11, %v3564_v23, %v3612_v18  ;;  %v9300_v57 = vmax.f32 %v8188_v48, %v8300_v56  ;;  %vm3586_vm13 = vcmp.gt.f32.partialorder %v3562_v8, 0.0  ;;  %v3610_v20 = vmul.f32 0.2, %v3562_v8 }
 0x290   : > { %5947 = vmatprep.mubr.msk.bf16.mxu1 %vm4387_vm3, %v8226_v59  ;;  %v8395_v59 = vpop.f32.mrb[102].mxu0  ;;  %vm3589_vm14 = vcmp.gt.f32.partialorder %v3565_v37, 0.0  ;;  %v3613_v26 = vmul.f32 0.2, %v3565_v37  ;;  %vm3587_vm15 = vcmp.gt.f32.partialorder %v3563_v28, 0.0  ;;  %vm3944_vm0 = vcmp.gt.f32.partialorder %v3920_v30, 0.0 }
 0x291   : > { %v8402_v32 = vmax.f32 %v9300_v57, %v3636_v40  ;;  %v8404_v9 = vpop.f32.mrb[103].mxu0  ;;  %v3611_v23 = vmul.f32 0.2, %v3563_v28  ;;  %v3634_v29 = vsel %vm3586_vm13, %v3562_v8, %v3610_v20  ;;  %v3968_v61 = vmul.f32 0.2, %v3920_v30 }
 0x292   : > { %v3918_v18 = vadd.f32 %v8318_v53, %v9240_v47  ;;  %v5849_v21 = vpop.f32.mrb[84].mxu1  ;;  %v9301_v48 = vmax.f32 %v8196_v60, %v8302_v27  ;;  %v3637_v40 = vsel %vm3589_vm14, %v3565_v37, %v3613_v26  ;;  %v3921_v31 = vadd.f32 %v8324_v11, %v6984_v6 }
 0x293   : > { %v3635_v57 = vsel %vm3587_vm15, %v3563_v28, %v3611_v23  ;;  %v2882_v49 = vpop.f32.mrb[85].mxu1  ;;  %v9302_v20 = vmax.f32 %v8205_v63, %v8314_v17  ;;  %v9303_v53 = vmax.f32 %v8216_v16, %v8316_v55  ;;  %v8425_v42 = vsel %vm3944_vm0, %v3920_v30, %v3968_v61 }
 0x294   : > { %v8411_v56 = vmax.f32 %v9301_v48, %v3634_v29  ;;  %vm3942_vm1 = vcmp.gt.f32.partialorder %v3918_v18, 0.0  ;;  %v8427_v60 = vpop.f32.mrb[86].mxu1  ;;  %v3966_v63 = vmul.f32 0.2, %v3918_v18  ;;  %vm3945_vm2 = vcmp.gt.f32.partialorder %v3921_v31, 0.0 }
 0x295   : > { %v8418_v8 = vmax.f32 %v9302_v20, %v3637_v40  ;;  %v8423_v47 = vmax.f32 %v9303_v53, %v3635_v57  ;;  %v8429_v27 = vpop.f32.mrb[104].mxu0  ;;  %v3969_v17 = vmul.f32 0.2, %v3921_v31  ;;  %v8435_v37 = vpop.f32.mrb[87].mxu1  ;;  %v3919_v16 = vadd.f32 %v8332_v4, %v9265_v58 }
 0x296   : > { %v3568_v55 = vadd.f32 %v8326_v22, %v9289_v50  ;;  %v3566_v28 = vadd.f32 %v8334_v34, %v9293_v3  ;;  %v3569_v30 = vadd.f32 %v8344_v62, %v9294_v14  ;;  %v8445_v26 = vpop.f32.mrb[105].mxu0  ;;  %v3567_v29 = vadd.f32 %v8350_v1, %v9295_v5  ;;  %v9304_v22 = vld [vmem:[#allocation14_spill] sm:$0xff] }
 0x297   : > { %5948 = vmatmul.mubr.msk.bf16.gmra.mrb[104].mxu1 %vm4387_vm3, %v8280_v36  ;;  %v8447_v36 = vsel %vm3942_vm1, %v3918_v18, %v3966_v63  ;;  %v8449_v23 = vsel %vm3945_vm2, %v3921_v31, %v3969_v17  ;;  %v3684_v4 = vadd.f32 %v5897_v7, %v9283_v35  ;;  %v8454_v61 = vpop.f32.mrb[106].mxu0  ;;  %vm3943_vm4 = vcmp.gt.f32.partialorder %v3919_v16, 0.0 }
 0x298   : > { %v3967_v62 = vmul.f32 0.2, %v3919_v16  ;;  %v8460_v40 = vpop.f32.mrb[107].mxu0  ;;  %vm3592_vm6 = vcmp.gt.f32.partialorder %v3568_v55, 0.0  ;;  %v3616_v31 = vmul.f32 0.2, %v3568_v55  ;;  %v9306_v17 = vmax.f32 %v8264_v38, %v8366_v51 }
 0x299   : > { %vm3590_vm7 = vcmp.gt.f32.partialorder %v3566_v28, 0.0  ;;  %v3614_v18 = vmul.f32 0.2, %v3566_v28  ;;  %vm3593_vm8 = vcmp.gt.f32.partialorder %v3569_v30, 0.0  ;;  %v3617_v7 = vmul.f32 0.2, %v3569_v30 }
 0x29a   : > { %v8462_v57 = vsel %vm3943_vm4, %v3919_v16, %v3967_v62  ;;  %vm3591_vm9 = vcmp.gt.f32.partialorder %v3567_v29, 0.0  ;;  %v3640_v20 = vsel %vm3592_vm6, %v3568_v55, %v3616_v31  ;;  %v3615_v63 = vmul.f32 0.2, %v3567_v29 }
 0x29b   : > { %9305 = vst [vmem:[#allocation24_spill] sm:$0xff] %v8462_v57  ;;  %v3638_v53 = vsel %vm3590_vm7, %v3566_v28, %v3614_v18  ;;  %v8469_v34 = vmax.f32 %v9306_v17, %v3640_v20  ;;  %v9307_v48 = vmax.f32 %v8276_v15, %v8368_v0  ;;  %v3641_v16 = vsel %vm3593_vm8, %v3569_v30, %v3617_v7  ;;  %v9310_v18 = vld [vmem:[#allocation9_spill] sm:$0xff] }
 0x29c   : > { %vm3708_vm10 = vcmp.gt.f32.partialorder %v3684_v4, 0.0  ;;  %v9308_v1 = vmax.f32 %v8288_v2, %v8378_v52  ;;  %v3639_v28 = vsel %vm3591_vm9, %v3567_v29, %v3615_v63  ;;  %v3732_v31 = vmul.f32 0.2, %v3684_v4 }
 0x29d   : > { %v8474_v11 = vmax.f32 %v9307_v48, %v3638_v53  ;;  %v8476_v62 = vpop.f32.mrb[108].mxu0  ;;  %v3682_v51 = vadd.f32 %v8387_v54, %v9284_v46  ;;  %v9309_v15 = vmax.f32 %v8290_v12, %v8391_v39  ;;  %v3685_v30 = vadd.f32 %v8395_v59, %v9285_v44 }
 0x29e   : > { %v8481_v55 = vmax.f32 %v9308_v1, %v3641_v16  ;;  %v8485_v38 = vpop.f32.mrb[109].mxu0  ;;  %v3683_v2 = vadd.f32 %v8404_v9, %v9286_v25  ;;  %v4036_v52 = vadd.f32 %v5849_v21, %v9255_v33  ;;  %v8499_v48 = vsel %vm3708_vm10, %v3684_v4, %v3732_v31  ;;  %v9311_v31 = vld [vmem:[#allocation10_spill] sm:$0xff]  ;;  %v9312_v4 = vld [vmem:[#allocation28_spill] sm:$0xff] }
 0x29f   : > { %v8490_v0 = vmax.f32 %v9309_v15, %v3639_v28  ;;  %v8497_v29 = vpop.f32.mrb[110].mxu0  ;;  %vm3706_vm11 = vcmp.gt.f32.partialorder %v3682_v51, 0.0  ;;  %v3730_v54 = vmul.f32 0.2, %v3682_v51  ;;  %v4034_v7 = vadd.f32 %v2882_v49, %v9310_v18  ;;  %v9315_v18 = vld [vmem:[#allocation11_spill] sm:$0xff] }
 0x2a0   : > { %v3206_v1 = vpop.f32.mrb[111].mxu0  ;;  %vm3709_vm13 = vcmp.gt.f32.partialorder %v3685_v30, 0.0  ;;  %v3733_v39 = vmul.f32 0.2, %v3685_v30  ;;  %vm3707_vm14 = vcmp.gt.f32.partialorder %v3683_v2, 0.0  ;;  %vm4060_vm15 = vcmp.gt.f32.partialorder %v4036_v52, 0.0 }
 0x2a1   : > { %v8504_v59 = vsel %vm3706_vm11, %v3682_v51, %v3730_v54  ;;  %v3731_v9 = vmul.f32 0.2, %v3683_v2  ;;  %v4084_v21 = vmul.f32 0.2, %v4036_v52  ;;  %vm4058_vm0 = vcmp.gt.f32.partialorder %v4034_v7, 0.0 }
 0x2a2   : > { %v5853_v20 = vpop.f32.mrb[88].mxu1  ;;  %v8508_v53 = vsel %vm3709_vm13, %v3685_v30, %v3733_v39  ;;  %v4082_v49 = vmul.f32 0.2, %v4034_v7  ;;  %v4037_v51 = vadd.f32 %v8427_v60, %v9311_v31  ;;  %v9313_v30 = vmax.f32 %v8088_v45, %v9312_v4 }
 0x2a3   : > { %v2898_v63 = vpop.f32.mrb[89].mxu1  ;;  %v8512_v16 = vsel %vm3707_vm14, %v3683_v2, %v3731_v9  ;;  %v4108_v28 = vsel %vm4060_vm15, %v4036_v52, %v4084_v21  ;;  %v4035_v57 = vadd.f32 %v8435_v37, %v9315_v18  ;;  %v9316_v2 = vld [vmem:[#allocation23_spill] sm:$0xff]  ;;  %v3689_v37 = vadd.f32 %v8454_v61, %v9294_v14  ;;  %v9321_v61 = vld [vmem:[#allocation26_spill] sm:$0xff] }
 0x2a4   : > { %v5854_v15 = vpop.f32.mrb[90].mxu1  ;;  %v3779_v54 = vmax.f32 %v8423_v47, %v8512_v16  ;;  %v8521_v39 = vmax.f32 %v9313_v30, %v4108_v28  ;;  %v4106_v12 = vsel %vm4058_vm0, %v4034_v7, %v4082_v49  ;;  %v9317_v52 = vmax.f32 %v8103_v10, %v9316_v2 }
 0x2a5   : > { %v8525_v17 = vpop.f32.mrb[91].mxu1  ;;  %vm4061_vm1 = vcmp.gt.f32.partialorder %v4037_v51, 0.0  ;;  %v4085_v60 = vmul.f32 0.2, %v4037_v51  ;;  %v3688_v47 = vadd.f32 %v8429_v27, %v9289_v50  ;;  %vm4059_vm2 = vcmp.gt.f32.partialorder %v4035_v57, 0.0 }
 0x2a6   : > { %9314 = vst [vmem:[#allocation27_spill] sm:$0xff] %v8521_v39  ;;  %v8530_v9 = vmax.f32 %v9317_v52, %v4106_v12  ;;  %v5909_v21 = vpop.f32.mrb[112].mxu0  ;;  %v4083_v45 = vmul.f32 0.2, %v4035_v57  ;;  %v3686_v7 = vadd.f32 %v8445_v26, %v9293_v3  ;;  %v3687_v12 = vadd.f32 %v8460_v40, %v9295_v5  ;;  %v9320_v52 = vld [vmem:[#allocation8_spill] sm:$0xff] }
 0x2a7   : > { %v3219_v4 = vpop.f32.mrb[113].mxu0  ;;  %v4109_v49 = vsel %vm4061_vm1, %v4037_v51, %v4085_v60  ;;  %vm3712_vm4 = vcmp.gt.f32.partialorder %v3688_v47, 0.0  ;;  %v3736_v10 = vmul.f32 0.2, %v3688_v47  ;;  %v9319_v27 = vmax.f32 %v8111_v43, %v8354_v41 }
 0x2a8   : > { %9318 = vst [vmem:[#allocation25_spill] sm:$0xff] %v8530_v9  ;;  %v5910_v16 = vpop.f32.mrb[114].mxu0  ;;  %v4107_v30 = vsel %vm4059_vm2, %v4035_v57, %v4083_v45  ;;  %vm3710_vm6 = vcmp.gt.f32.partialorder %v3686_v7, 0.0  ;;  %v3734_v2 = vmul.f32 0.2, %v3686_v7  ;;  %v9322_v9 = vmax.f32 %v9320_v52, %v9321_v61  ;;  %v9323_v61 = vld [vmem:[#allocation12_spill] sm:$0xff] }
 0x2a9   : > { %v8543_v28 = vmax.f32 %v9319_v27, %v4109_v49  ;;  %v8545_v26 = vpop.f32.mrb[115].mxu0  ;;  %v8552_v60 = vsel %vm3712_vm4, %v3688_v47, %v3736_v10  ;;  %vm3713_vm7 = vcmp.gt.f32.partialorder %v3689_v37, 0.0  ;;  %v3737_v40 = vmul.f32 0.2, %v3689_v37 }
 0x2aa   : > { %v8550_v51 = vmax.f32 %v9322_v9, %v4107_v30  ;;  %v8556_v43 = vsel %vm3710_vm6, %v3686_v7, %v3734_v2  ;;  %vm3711_vm8 = vcmp.gt.f32.partialorder %v3687_v12, 0.0  ;;  %v3735_v41 = vmul.f32 0.2, %v3687_v12 }
 0x2ab   : > { %v8560_v45 = vsel %vm3713_vm7, %v3689_v37, %v3737_v40  ;;  %v3804_v9 = vadd.f32 %v8476_v62, %v9283_v35  ;;  %v3802_v47 = vadd.f32 %v8485_v38, %v9284_v46  ;;  %v3805_v7 = vadd.f32 %v8497_v29, %v9285_v44  ;;  %v9324_v40 = vld [vmem:[#allocation13_spill] sm:$0xff] }
 0x2ac   : > { %v8568_v10 = vsel %vm3711_vm8, %v3687_v12, %v3735_v41  ;;  %v3803_v27 = vadd.f32 %v3206_v1, %v9286_v25  ;;  %v4040_v12 = vadd.f32 %v5853_v20, %v9323_v61  ;;  %v4038_v41 = vadd.f32 %v2898_v63, %v9324_v40 }
 0x2ad   : > { %vm3828_vm9 = vcmp.gt.f32.partialorder %v3804_v9, 0.0  ;;  %v3852_v30 = vmul.f32 0.2, %v3804_v9  ;;  %vm3826_vm10 = vcmp.gt.f32.partialorder %v3802_v47, 0.0  ;;  %v3850_v62 = vmul.f32 0.2, %v3802_v47 }
 0x2ae   : > { %vm3829_vm11 = vcmp.gt.f32.partialorder %v3805_v7, 0.0  ;;  %v3853_v2 = vmul.f32 0.2, %v3805_v7  ;;  %vm3827_vm13 = vcmp.gt.f32.partialorder %v3803_v27, 0.0  ;;  %v3851_v52 = vmul.f32 0.2, %v3803_v27 }
 0x2af   : > { %v3876_v38 = vsel %vm3828_vm9, %v3804_v9, %v3852_v30  ;;  %v9325_v29 = vmax.f32 %v8402_v32, %v8499_v48  ;;  %v3874_v49 = vsel %vm3826_vm10, %v3802_v47, %v3850_v62  ;;  %v4041_v57 = vadd.f32 %v5854_v15, %v6984_v6 }
 0x2b0   : > { %v3877_v37 = vsel %vm3829_vm11, %v3805_v7, %v3853_v2  ;;  %v9326_v39 = vmax.f32 %v8411_v56, %v8504_v59  ;;  %v9327_v9 = vmax.f32 %v8418_v8, %v8508_v53  ;;  %v3875_v63 = vsel %vm3827_vm13, %v3803_v27, %v3851_v52 }
 0x2b1   : > { %v8580_v1 = vmax.f32 %v9325_v29, %v3876_v38  ;;  %vm4064_vm14 = vcmp.gt.f32.partialorder %v4040_v12, 0.0  ;;  %v8593_v32 = vmax.f32 %v3779_v54, %v3875_v63  ;;  %v4088_v48 = vmul.f32 0.2, %v4040_v12 }
 0x2b2   : > { %v8586_v25 = vmax.f32 %v9326_v39, %v3874_v49  ;;  %v8591_v20 = vmax.f32 %v9327_v9, %v3877_v37  ;;  %v5857_v30 = vpop.f32.mrb[92].mxu1  ;;  %vm4062_vm15 = vcmp.gt.f32.partialorder %v4038_v41, 0.0  ;;  %v4086_v47 = vmul.f32 0.2, %v4038_v41 }
 0x2b3   : > { %v2914_v7 = vpop.f32.mrb[93].mxu1  ;;  %vm4065_vm0 = vcmp.gt.f32.partialorder %v4041_v57, 0.0  ;;  %v4089_v15 = vmul.f32 0.2, %v4041_v57  ;;  %v4039_v56 = vadd.f32 %v8525_v17, %v9265_v58  ;;  %v3808_v59 = vadd.f32 %v5909_v21, %v9289_v50 }
 0x2b4   : > { %v5858_v39 = vpop.f32.mrb[94].mxu1  ;;  %v4112_v8 = vsel %vm4064_vm14, %v4040_v12, %v4088_v48  ;;  %v4110_v53 = vsel %vm4062_vm15, %v4038_v41, %v4086_v47  ;;  %v3806_v49 = vadd.f32 %v3219_v4, %v9293_v3  ;;  %v3809_v27 = vadd.f32 %v5910_v16, %v9294_v14 }
 0x2b5   : > { %v2917_v54 = vpop.f32.mrb[95].mxu1  ;;  %v9328_v37 = vmax.f32 %v8235_v24, %v8425_v42  ;;  %v9329_v2 = vmax.f32 %v9304_v22, %v8447_v36  ;;  %v4113_v17 = vsel %vm4065_vm0, %v4041_v57, %v4089_v15  ;;  %vm4063_vm1 = vcmp.gt.f32.partialorder %v4039_v56, 0.0 }
 0x2b6   : > { %v5913_v21 = vpop.f32.mrb[116].mxu0  ;;  %v9330_v52 = vmax.f32 %v8262_v13, %v8449_v23  ;;  %v4087_v16 = vmul.f32 0.2, %v4039_v56  ;;  %vm3832_vm2 = vcmp.gt.f32.partialorder %v3808_v59, 0.0  ;;  %v3856_v12 = vmul.f32 0.2, %v3808_v59 }
 0x2b7   : > { %v8603_v62 = vmax.f32 %v9328_v37, %v4112_v8  ;;  %v8608_v38 = vmax.f32 %v9329_v2, %v4110_v53  ;;  %v3235_v41 = vpop.f32.mrb[117].mxu0  ;;  %vm3830_vm4 = vcmp.gt.f32.partialorder %v3806_v49, 0.0  ;;  %v3854_v42 = vmul.f32 0.2, %v3806_v49  ;;  %v9331_v13 = vld [vmem:[#allocation24_spill] sm:$0xff] }
 0x2b8   : > { %v8613_v4 = vmax.f32 %v9330_v52, %v4113_v17  ;;  %vm3833_vm6 = vcmp.gt.f32.partialorder %v3809_v27, 0.0  ;;  %v3857_v24 = vmul.f32 0.2, %v3809_v27  ;;  %v4111_v29 = vsel %vm4063_vm1, %v4039_v56, %v4087_v16  ;;  %v5914_v9 = vpop.f32.mrb[118].mxu0  ;;  %v9338_v16 = vld [vmem:[#allocation27_spill] sm:$0xff] }
 0x2b9   : > { %v3880_v36 = vsel %vm3832_vm2, %v3808_v59, %v3856_v12  ;;  %v3807_v22 = vadd.f32 %v8545_v26, %v9295_v5  ;;  %v4156_v57 = vadd.f32 %v5857_v30, %v9255_v33  ;;  %v9332_v23 = vmax.f32 %v8270_v19, %v9331_v13  ;;  %v3238_v56 = vpop.f32.mrb[119].mxu0 }
 0x2ba   : > { %v9333_v48 = vmax.f32 %v8469_v34, %v8552_v60  ;;  %v3878_v15 = vsel %vm3830_vm4, %v3806_v49, %v3854_v42  ;;  %v3881_v8 = vsel %vm3833_vm6, %v3809_v27, %v3857_v24  ;;  %v9334_v59 = vmax.f32 %v8474_v11, %v8556_v43  ;;  %v9336_v34 = vld [vmem:[#allocation9_spill] sm:$0xff] }
 0x2bb   : > { %v8621_v63 = vmax.f32 %v9332_v23, %v4111_v29  ;;  %v9335_v33 = vmax.f32 %v8481_v55, %v8560_v45  ;;  %vm3831_vm7 = vcmp.gt.f32.partialorder %v3807_v22, 0.0  ;;  %v3855_v19 = vmul.f32 0.2, %v3807_v22 }
 0x2bc   : > { %v8626_v47 = vmax.f32 %v9333_v48, %v3880_v36  ;;  %v8631_v26 = vmax.f32 %v9334_v59, %v3878_v15  ;;  %vm4180_vm8 = vcmp.gt.f32.partialorder %v4156_v57, 0.0  ;;  %v4204_v53 = vmul.f32 0.2, %v4156_v57 }
 0x2bd   : > { %v8636_v30 = vmax.f32 %v9335_v33, %v3881_v8  ;;  %v4154_v60 = vadd.f32 %v2914_v7, %v9336_v34  ;;  %v4157_v49 = vadd.f32 %v5858_v39, %v9311_v31  ;;  %v3879_v27 = vsel %vm3831_vm7, %v3807_v22, %v3855_v19 }
 0x2be   : > { %v4155_v37 = vadd.f32 %v2917_v54, %v9315_v18  ;;  %v3924_v11 = vadd.f32 %v5913_v21, %v9283_v35  ;;  %v3922_v43 = vadd.f32 %v3235_v41, %v9284_v46  ;;  %v9337_v55 = vmax.f32 %v8490_v0, %v8568_v10  ;;  %v5917_v52 = vpop.f32.mrb[120].mxu0  ;;  %v9339_v10 = vld [vmem:[#allocation25_spill] sm:$0xff] }
 0x2bf   : > { %v4228_v2 = vsel %vm4180_vm8, %v4156_v57, %v4204_v53  ;;  %vm4178_vm9 = vcmp.gt.f32.partialorder %v4154_v60, 0.0  ;;  %v4202_v17 = vmul.f32 0.2, %v4154_v60  ;;  %vm4181_vm10 = vcmp.gt.f32.partialorder %v4157_v49, 0.0  ;;  %v3251_v18 = vpop.f32.mrb[121].mxu0 }
 0x2c0   : > { %v8646_v45 = vmax.f32 %v9337_v55, %v3879_v27  ;;  %v8649_v7 = vmax.f32 %v9338_v16, %v4228_v2  ;;  %v4205_v31 = vmul.f32 0.2, %v4157_v49  ;;  %vm4179_vm11 = vcmp.gt.f32.partialorder %v4155_v37, 0.0  ;;  %v5918_v12 = vpop.f32.mrb[122].mxu0 }
 0x2c1   : > { %v4226_v39 = vsel %vm4178_vm9, %v4154_v60, %v4202_v17  ;;  %v4203_v54 = vmul.f32 0.2, %v4155_v37  ;;  %vm3948_vm13 = vcmp.gt.f32.partialorder %v3924_v11, 0.0  ;;  %v3972_v21 = vmul.f32 0.2, %v3924_v11  ;;  %v3254_v24 = vpop.f32.mrb[123].mxu0 }
 0x2c2   : > { %v5492_v0 = vpack.c.bf16 %v8649_v7, %v8649_v7  ;;  %v4250_v41 = vmax.f32 %v9339_v10, %v4226_v39  ;;  %v4229_v42 = vsel %vm4181_vm10, %v4157_v49, %v4205_v31  ;;  %vm3946_vm14 = vcmp.gt.f32.partialorder %v3922_v43, 0.0 }
 0x2c3   : > { %v4253_v29 = vmax.f32 %v8543_v28, %v4229_v42  ;;  %v4227_v36 = vsel %vm4179_vm11, %v4155_v37, %v4203_v54  ;;  %v8655_v22 = vsel %vm3948_vm13, %v3924_v11, %v3972_v21  ;;  %v3970_v57 = vmul.f32 0.2, %v3922_v43  ;;  %v9340_v28 = vld [vmem:[#allocation18_spill] sm:$0xff] }
 0x2c4   : > { %4373 = vst.msk [vmem:[%s8048_s12 + $0x28] sm:$0xf] %vm4362_vm12, %v5492_v0  ;;  %v5490_v13 = vpack.c.bf16 %v4250_v41, %v4250_v41  ;;  %v4251_v23 = vmax.f32 %v8550_v51, %v4227_v36  ;;  %v4020_v48 = vmax.f32 %v8580_v1, %v8655_v22  ;;  %v3925_v15 = vadd.f32 %v5914_v9, %v9285_v44 }
 0x2c5   : > { %v5493_v8 = vpack.c.bf16 %v4253_v29, %v4253_v29  ;;  %v8663_v59 = vsel %vm3946_vm14, %v3922_v43, %v3970_v57  ;;  %v3923_v33 = vadd.f32 %v3238_v56, %v9340_v28  ;;  %v4629_v19 = vmul.f32 %v8649_v7, %v8649_v7 }
 0x2c6   : > { %4371 = vst.msk [vmem:[%s8048_s12 + $0x20] sm:$0xf] %vm4362_vm12, %v5490_v13  ;;  %v5491_v53 = vpack.c.bf16 %v4251_v23, %v4251_v23  ;;  %v4018_v51 = vmax.f32 %v8586_v25, %v8663_v59  ;;  %vm3949_vm15 = vcmp.gt.f32.partialorder %v3925_v15, 0.0  ;;  %v3973_v34 = vmul.f32 0.2, %v3925_v15 }
 0x2c7   : > { %4374 = vst.msk [vmem:[%s8048_s12 + $0x2c] sm:$0xf] %vm4362_vm12, %v5493_v8  ;;  %vm3947_vm0 = vcmp.gt.f32.partialorder %v3923_v33, 0.0  ;;  %v3971_v9 = vmul.f32 0.2, %v3923_v33  ;;  %v4673_v60 = vsel %vm4387_vm3, %v4629_v19, 0.0  ;;  %v3928_v49 = vadd.f32 %v5917_v52, %v9289_v50 }
 0x2c8   : > { %4372 = vst.msk [vmem:[%s8048_s12 + $0x24] sm:$0xf] %vm4362_vm12, %v5491_v53  ;;  %v8678_v56 = vsel %vm3949_vm15, %v3925_v15, %v3973_v34  ;;  %4674 = vadd.xlane.f32.xlu0 %v4673_v60  ;;  %v3926_v27 = vadd.f32 %v3251_v18, %v9293_v3  ;;  %v4630_v37 = vmul.f32 %v4253_v29, %v4253_v29 }
 0x2c9   : > { %v4270_v11 = vpack.c.bf16 %v4251_v23, %v4250_v41  ;;  %v4021_v43 = vmax.f32 %v8591_v20, %v8678_v56  ;;  %v8683_v55 = vsel %vm3947_vm0, %v3923_v33, %v3971_v9  ;;  %vm3952_vm1 = vcmp.gt.f32.partialorder %v3928_v49, 0.0 }
 0x2ca   : > { %v3976_v2 = vmul.f32 0.2, %v3928_v49  ;;  %v4019_v17 = vmax.f32 %v8593_v32, %v8683_v55  ;;  %vm3950_vm2 = vcmp.gt.f32.partialorder %v3926_v27, 0.0  ;;  %v3974_v52 = vmul.f32 0.2, %v3926_v27 }
 0x2cb   : > { %v4676_v16 = vsel %vm4387_vm3, %v4630_v37, 0.0  ;;  %5989 = vmatprep.subr.msk.bf16.mxu1 %vm4387_vm3, %v4270_v11  ;;  %5959 = vmatprep.mubr.msk.bf16.mxu1 %vm4387_vm3, %v4270_v11  ;;  %v3929_v18 = vadd.f32 %v5918_v12, %v9294_v14  ;;  %v4466_v39 = vsel %vm4387_vm3, %v4270_v11, 0  ;;  %v3927_v54 = vadd.f32 %v3254_v24, %v9295_v5 }
 0x2cc   : > { %v8690_v31 = vsel %vm3952_vm1, %v3928_v49, %v3976_v2  ;;  %4677 = vadd.xlane.f32.xlu1 %v4676_v16  ;;  %v8697_v0 = vsel %vm3950_vm2, %v3926_v27, %v3974_v52  ;;  %5952 = vmatpush3.bf16.xpose.msra.mxu1 %v4466_v39  ;;  %v4627_v10 = vmul.f32 %v4250_v41, %v4250_v41 }
 0x2cd   : > { %v4024_v21 = vmax.f32 %v8626_v47, %v8690_v31  ;;  %v8700_v42 = vpack.c.bf16 %v4253_v29, %v8649_v7  ;;  %v4022_v36 = vmax.f32 %v8631_v26, %v8697_v0  ;;  %vm3953_vm4 = vcmp.gt.f32.partialorder %v3929_v18, 0.0 }
 0x2ce   : > { %v3977_v57 = vmul.f32 0.2, %v3929_v18  ;;  %vm3951_vm6 = vcmp.gt.f32.partialorder %v3927_v54, 0.0  ;;  %v3975_v12 = vmul.f32 0.2, %v3927_v54  ;;  %v4667_v13 = vsel %vm4387_vm3, %v4627_v10, 0.0 }
 0x2cf   : > { %5990 = vmatprep.subr.msk.bf16.mxu1 %vm4387_vm3, %v8700_v42  ;;  %v4628_v24 = vmul.f32 %v4251_v23, %v4251_v23  ;;  %4668 = vadd.xlane.f32.xlu0 %v4667_v13  ;;  %v5861_v29 = vpop.f32.mrb[96].mxu1  ;;  %v4469_v9 = vsel %vm4387_vm3, %v8700_v42, 0 }
 0x2d0   : > { %v8707_v15 = vsel %vm3953_vm4, %v3929_v18, %v3977_v57  ;;  %v8711_v41 = vsel %vm3951_vm6, %v3927_v54, %v3975_v12  ;;  %v4160_v33 = vadd.f32 %v5861_v29, %v9323_v61  ;;  %v2930_v19 = vpop.f32.mrb[97].mxu1 }
 0x2d1   : > { %v4025_v7 = vmax.f32 %v8636_v30, %v8707_v15  ;;  %v4023_v8 = vmax.f32 %v8646_v45, %v8711_v41  ;;  %v4670_v53 = vsel %vm4387_vm3, %v4628_v24, 0.0  ;;  %v4158_v34 = vadd.f32 %v2930_v19, %v9324_v40  ;;  %v5862_v23 = vpop.f32.mrb[98].mxu1  ;;  %v5921_v37 = vpop.f32.mrb[124].mxu0 }
 0x2d2   : > { %vm4184_vm7 = vcmp.gt.f32.partialorder %v4160_v33, 0.0  ;;  %v4208_v60 = vmul.f32 0.2, %v4160_v33  ;;  %v4161_v49 = vadd.f32 %v5862_v23, %v6984_v6  ;;  %v2933_v27 = vpop.f32.mrb[99].mxu1  ;;  %v4044_v2 = vadd.f32 %v5921_v37, %v9283_v35  ;;  %v3267_v52 = vpop.f32.mrb[125].mxu0 }
 0x2d3   : > { %4671 = vadd.xlane.f32.xlu0 %v4670_v53  ;;  %vm4182_vm8 = vcmp.gt.f32.partialorder %v4158_v34, 0.0  ;;  %v4206_v11 = vmul.f32 0.2, %v4158_v34  ;;  %v4159_v61 = vadd.f32 %v2933_v27, %v9265_v58  ;;  %v4042_v18 = vadd.f32 %v3267_v52, %v9284_v46  ;;  %v5922_v39 = vpop.f32.mrb[126].mxu0 }
 0x2d4   : > { %5954 = vmatpush3.bf16.xpose.msra.mxu1 %v4469_v9  ;;  %v4232_v40 = vsel %vm4184_vm7, %v4160_v33, %v4208_v60  ;;  %vm4185_vm9 = vcmp.gt.f32.partialorder %v4161_v49, 0.0  ;;  %v4209_v16 = vmul.f32 0.2, %v4161_v49  ;;  %v3270_v57 = vpop.f32.mrb[127].mxu0  ;;  %vm4068_vm11 = vcmp.gt.f32.partialorder %v4044_v2, 0.0 }
 0x2d5   : > { %v4256_v54 = vmax.f32 %v8603_v62, %v4232_v40  ;;  %v4230_v10 = vsel %vm4182_vm8, %v4158_v34, %v4206_v11  ;;  %vm4183_vm10 = vcmp.gt.f32.partialorder %v4159_v61, 0.0  ;;  %v4207_v6 = vmul.f32 0.2, %v4159_v61 }
 0x2d6   : > { %v4254_v12 = vmax.f32 %v8608_v38, %v4230_v10  ;;  %v4233_v13 = vsel %vm4185_vm9, %v4161_v49, %v4209_v16  ;;  %v4092_v58 = vmul.f32 0.2, %v4044_v2  ;;  %vm4066_vm13 = vcmp.gt.f32.partialorder %v4042_v18, 0.0 }
 0x2d7   : > { %v5496_v24 = vpack.c.bf16 %v4256_v54, %v4256_v54  ;;  %v8727_v29 = vmax.f32 %v8613_v4, %v4233_v13  ;;  %v4231_v33 = vsel %vm4183_vm10, %v4159_v61, %v4207_v6  ;;  %v4090_v34 = vmul.f32 0.2, %v4042_v18 }
 0x2d8   : > { %v5494_v19 = vpack.c.bf16 %v4254_v12, %v4254_v12  ;;  %v4255_v62 = vmax.f32 %v8621_v63, %v4231_v33  ;;  %v4116_v53 = vsel %vm4068_vm11, %v4044_v2, %v4092_v58  ;;  %v4045_v4 = vadd.f32 %v5922_v39, %v9285_v44 }
 0x2d9   : > { %4377 = vst.msk [vmem:[%s8048_s12 + $0x38] sm:$0xf] %vm4362_vm12, %v5496_v24  ;;  %v5497_v38 = vpack.c.bf16 %v8727_v29, %v8727_v29  ;;  %v8737_v23 = vmax.f32 %v4020_v48, %v4116_v53  ;;  %v4043_v9 = vadd.f32 %v3270_v57, %v9340_v28  ;;  %v4114_v60 = vsel %vm4066_vm13, %v4042_v18, %v4090_v34 }
 0x2da   : > { %4375 = vst.msk [vmem:[%s8048_s12 + $0x30] sm:$0xf] %vm4362_vm12, %v5494_v19  ;;  %v5495_v63 = vpack.c.bf16 %v4255_v62, %v4255_v62  ;;  %v4633_v49 = vmul.f32 %v4256_v54, %v4256_v54  ;;  %v4272_v27 = vpack.c.bf16 %v4255_v62, %v4254_v12  ;;  %v8748_v37 = vmax.f32 %v4018_v51, %v4114_v60 }
 0x2db   : > { %4378 = vst.msk [vmem:[%s8048_s12 + $0x3c] sm:$0xf] %vm4362_vm12, %v5497_v38  ;;  %vm4069_vm14 = vcmp.gt.f32.partialorder %v4045_v4, 0.0  ;;  %v4093_v1 = vmul.f32 0.2, %v4045_v4  ;;  %vm4067_vm15 = vcmp.gt.f32.partialorder %v4043_v9, 0.0  ;;  %v4632_v11 = vmul.f32 %v4255_v62, %v4255_v62 }
 0x2dc   : > { %4376 = vst.msk [vmem:[%s8048_s12 + $0x34] sm:$0xf] %vm4362_vm12, %v5495_v63  ;;  %v4091_v22 = vmul.f32 0.2, %v4043_v9  ;;  %v4685_v48 = vsel %vm4387_vm3, %v4633_v49, 0.0  ;;  %5991 = vmatprep.subr.msk.bf16.mxu1 %vm4387_vm3, %v4272_v27  ;;  %v4472_v61 = vsel %vm4387_vm3, %v4272_v27, 0  ;;  %v4631_v52 = vmul.f32 %v4254_v12, %v4254_v12 }
 0x2dd   : > { %v4117_v2 = vsel %vm4069_vm14, %v4045_v4, %v4093_v1  ;;  %4686 = vadd.xlane.f32.xlu0 %v4685_v48  ;;  %5956 = vmatpush3.bf16.xpose.msra.mxu1 %v4472_v61  ;;  %v8756_v25 = vpack.c.bf16 %v8727_v29, %v4256_v54  ;;  %v4682_v40 = vsel %vm4387_vm3, %v4632_v11, 0.0  ;;  %v5925_v18 = vpop.f32.mrb[128].mxu0 }
 0x2de   : > { %v4141_v59 = vmax.f32 %v4021_v43, %v4117_v2  ;;  %v4115_v51 = vsel %vm4067_vm15, %v4043_v9, %v4091_v22  ;;  %4683 = vadd.xlane.f32.xlu1 %v4682_v40  ;;  %v4048_v39 = vadd.f32 %v5925_v18, %v9289_v50  ;;  %v3283_v54 = vpop.f32.mrb[129].mxu0  ;;  %v4679_v10 = vsel %vm4387_vm3, %v4631_v52, 0.0 }
 0x2df   : > { %v4139_v16 = vmax.f32 %v4019_v17, %v4115_v51  ;;  %5992 = vmatprep.subr.msk.bf16.mxu1 %vm4387_vm3, %v8756_v25  ;;  %v4046_v20 = vadd.f32 %v3283_v54, %v9293_v3  ;;  %v5926_v56 = vpop.f32.mrb[130].mxu0  ;;  %v4475_v13 = vsel %vm4387_vm3, %v8756_v25, 0  ;;  %vm4810_vm15 = vcmask 261312  }
 0x2e0   : > { %vm4072_vm0 = vcmp.gt.f32.partialorder %v4048_v39, 0.0  ;;  %v4096_v43 = vmul.f32 0.2, %v4048_v39  ;;  %v4049_v6 = vadd.f32 %v5926_v56, %v9294_v14  ;;  %v3286_v32 = vpop.f32.mrb[131].mxu0 }
 0x2e1   : > { %4680 = vadd.xlane.f32.xlu0 %v4679_v10  ;;  %vm4070_vm1 = vcmp.gt.f32.partialorder %v4046_v20, 0.0  ;;  %v4094_v55 = vmul.f32 0.2, %v4046_v20  ;;  %v4047_v17 = vadd.f32 %v3286_v32, %v9295_v5 }
 0x2e2   : > { %v4120_v57 = vsel %vm4072_vm0, %v4048_v39, %v4096_v43  ;;  %vm4073_vm2 = vcmp.gt.f32.partialorder %v4049_v6, 0.0  ;;  %v4097_v12 = vmul.f32 0.2, %v4049_v6  ;;  %vm4817_vm0 = vcmask 326912  }
 0x2e3   : > { %v8777_v58 = vmax.f32 %v4024_v21, %v4120_v57  ;;  %v4118_v24 = vsel %vm4070_vm1, %v4046_v20, %v4094_v55  ;;  %vm4071_vm4 = vcmp.gt.f32.partialorder %v4047_v17, 0.0  ;;  %v4095_v33 = vmul.f32 0.2, %v4047_v17 }
 0x2e4   : > { %v8782_v19 = vmax.f32 %v4022_v36, %v4118_v24  ;;  %v4121_v62 = vsel %vm4073_vm2, %v4049_v6, %v4097_v12  ;;  %vm4824_vm1 = vcmask 392512   ;;  %vm4831_vm2 = vcmask 458112  }
 0x2e5   : > { %5958 = vmatpush3.bf16.xpose.msra.mxu1 %v4475_v13  ;;  %v8787_v53 = vmax.f32 %v4025_v7, %v4121_v62  ;;  %v4119_v34 = vsel %vm4071_vm4, %v4047_v17, %v4095_v33  ;;  %vm4838_vm4 = vcmask 523712  }
 0x2e6   : > { %v8792_v47 = vmax.f32 %v4023_v8, %v4119_v34 }
 0x2e8   : > { %v5929_v31 = vpop.f32.mrb[132].mxu0 }
 0x2e9   : > { %v4164_v21 = vadd.f32 %v5929_v31, %v9283_v35  ;;  %v3299_v38 = vpop.f32.mrb[133].mxu0 }
 0x2ea   : > { %v4162_v26 = vadd.f32 %v3299_v38, %v9284_v46  ;;  %v5930_v0 = vpop.f32.mrb[134].mxu0 }
 0x2eb   : > { %vm4188_vm6 = vcmp.gt.f32.partialorder %v4164_v21, 0.0  ;;  %v4212_v30 = vmul.f32 0.2, %v4164_v21  ;;  %v4165_v36 = vadd.f32 %v5930_v0, %v9285_v44  ;;  %v3302_v15 = vpop.f32.mrb[135].mxu0 }
 0x2ec   : > { %5960 = vmatmul.mubr.msk.bf16.vlgmr.msra.gmra.mrb[108].mxu1 %vm4387_vm3, %v8700_v42  ;;  %vm4186_vm7 = vcmp.gt.f32.partialorder %v4162_v26, 0.0  ;;  %v4210_v45 = vmul.f32 0.2, %v4162_v26  ;;  %v4163_v7 = vadd.f32 %v3302_v15, %v9340_v28 }
 0x2ed   : > { %5963 = vmatprep.mubr.msk.bf16.mxu1 %vm4387_vm3, %v4272_v27  ;;  %v4236_v41 = vsel %vm4188_vm6, %v4164_v21, %v4212_v30  ;;  %vm4189_vm8 = vcmp.gt.f32.partialorder %v4165_v36, 0.0  ;;  %v4213_v35 = vmul.f32 0.2, %v4165_v36 }
 0x2ee   : > { %v4260_v46 = vmax.f32 %v8737_v23, %v4236_v41  ;;  %v4234_v8 = vsel %vm4186_vm7, %v4162_v26, %v4210_v45  ;;  %vm4187_vm9 = vcmp.gt.f32.partialorder %v4163_v7, 0.0  ;;  %v4211_v42 = vmul.f32 0.2, %v4163_v7 }
 0x2ef   : > { %v4258_v4 = vmax.f32 %v8748_v37, %v4234_v8  ;;  %v4237_v44 = vsel %vm4189_vm8, %v4165_v36, %v4213_v35  ;;  %v4634_v36 = vmul.f32 %v8727_v29, %v8727_v29 }
 0x2f0   : > { %v5500_v9 = vpack.c.bf16 %v4260_v46, %v4260_v46  ;;  %v4261_v63 = vmax.f32 %v4141_v59, %v4237_v44  ;;  %v4235_v60 = vsel %vm4187_vm9, %v4163_v7, %v4211_v42  ;;  %v4637_v49 = vmul.f32 %v4260_v46, %v4260_v46  ;;  %v9342_v44 = vld [vmem:[#allocation5_spill] sm:$0xff] }
 0x2f1   : > { %v5498_v27 = vpack.c.bf16 %v4258_v4, %v4258_v4  ;;  %v4259_v28 = vmax.f32 %v4139_v16, %v4235_v60  ;;  %v4635_v1 = vmul.f32 %v4258_v4, %v4258_v4  ;;  %v4688_v7 = vsel %vm4387_vm3, %v4634_v36, 0.0 }
 0x2f2   : > { %4381 = vst.msk [vmem:[%s8048_s12 + $0x48] sm:$0xf] %vm4362_vm12, %v5500_v9  ;;  %v5501_v22 = vpack.c.bf16 %v4261_v63, %v4261_v63  ;;  %v4697_v23 = vsel %vm4387_vm3, %v4637_v49, 0.0  ;;  %v4638_v48 = vmul.f32 %v4261_v63, %v4261_v63  ;;  %v8806_v11 = vpack.c.bf16 %v4261_v63, %v4260_v46  ;;  %v9341_v46 = vld [vmem:[#allocation6_spill] sm:$0xff] }
 0x2f3   : > { %4379 = vst.msk [vmem:[%s8048_s12 + $0x40] sm:$0xf] %vm4362_vm12, %v5498_v27  ;;  %v5499_v37 = vpack.c.bf16 %v4259_v28, %v4259_v28  ;;  %4698 = vadd.xlane.f32.xlu1 %v4697_v23  ;;  %v4274_v61 = vpack.c.bf16 %v4259_v28, %v4258_v4  ;;  %v4636_v59 = vmul.f32 %v4259_v28, %v4259_v28  ;;  %v4691_v39 = vsel %vm4387_vm3, %v4635_v1, 0.0 }
 0x2f4   : > { %5964 = vmatmul.mubr.msk.bf16.gmra.mrb[112].mxu1 %vm4387_vm3, %v8756_v25  ;;  %4382 = vst.msk [vmem:[%s8048_s12 + $0x4c] sm:$0xf] %vm4362_vm12, %v5501_v22  ;;  %v4700_v52 = vsel %vm4387_vm3, %v4638_v48, 0.0  ;;  %v4791_v8 = vadd.s32 4294967288, %v9341_v46  ;;  %v4798_v63 = vadd.s32 4294967280, %v9341_v46  ;;  %v8866_v60 = vsub.s32 %v9341_v46, %v9342_v44 }
 0x2f5   : > { %v5933_v2 = vpop.f32.mrb[136].mxu0  ;;  %4380 = vst.msk [vmem:[%s8048_s12 + $0x44] sm:$0xf] %vm4362_vm12, %v5499_v37  ;;  %4701 = vadd.xlane.f32.xlu0 %v4700_v52  ;;  %5993 = vmatprep.subr.msk.bf16.mxu1 %vm4387_vm3, %v4274_v61  ;;  %v4543_v25 = vsel %vm4387_vm3, %v4274_v61, 0  ;;  %v4805_v49 = vadd.s32 4294967272, %v9341_v46  ;;  %v4812_v28 = vadd.s32 4294967264, %v9341_v46 }
 0x2f6   : > { %v4168_v51 = vadd.f32 %v5933_v2, %v9289_v50  ;;  %v3315_v40 = vpop.f32.mrb[137].mxu0  ;;  %5968 = vmatpush3.bf16.xpose.msra.mxu1 %v4543_v25  ;;  %5975 = vmatprep.mubr.msk.bf16.mxu1 %vm4387_vm3, %v4274_v61  ;;  %v8861_v9 = vsub.s32 %v4791_v8, %v9342_v44  ;;  %v8875_v22 = vsub.s32 %v4798_v63, %v9342_v44  ;;  %v4819_v37 = vadd.s32 4294967256, %v9341_v46 }
 0x2f7   : > { %v4166_v16 = vadd.f32 %v3315_v40, %v9293_v3  ;;  %v5934_v18 = vpop.f32.mrb[138].mxu0  ;;  %4692 = vadd.xlane.f32.xlu1 %v4691_v39  ;;  %5994 = vmatprep.subr.msk.bf16.mxu1 %vm4387_vm3, %v8806_v11  ;;  %v4694_v3 = vsel %vm4387_vm3, %v4636_v59, 0.0  ;;  %v8885_v61 = vsub.s32 %v4812_v28, %v9342_v44 }
 0x2f8   : > { %vm4192_vm10 = vcmp.gt.f32.partialorder %v4168_v51, 0.0  ;;  %v4216_v54 = vmul.f32 0.2, %v4168_v51  ;;  %v4169_v10 = vadd.f32 %v5934_v18, %v9294_v14  ;;  %v3318_v20 = vpop.f32.mrb[139].mxu0  ;;  %v4651_v29 = vpop.xlane.xlu1 %4650  ;;  %v8891_v40 = vsub.s32 %v4819_v37, %v9342_v44 }
 0x2f9   : > { %vm4190_vm11 = vcmp.gt.f32.partialorder %v4166_v16, 0.0  ;;  %v4214_v50 = vmul.f32 0.2, %v4166_v16  ;;  %v4167_v56 = vadd.f32 %v3318_v20, %v9295_v5  ;;  %4695 = vadd.xlane.f32.xlu0 %v4694_v3  ;;  %v4802_v59 = vrot.slane %v4651_v29, %v8875_v22 }
 0x2fa   : > { %v4240_v43 = vsel %vm4192_vm10, %v4168_v51, %v4216_v54  ;;  %vm4193_vm13 = vcmp.gt.f32.partialorder %v4169_v10, 0.0  ;;  %v4217_v6 = vmul.f32 0.2, %v4169_v10  ;;  %v4645_v35 = vpop.xlane.xlu0 %4644 }
 0x2fb   : > { %v4264_v32 = vmax.f32 %v8777_v58, %v4240_v43  ;;  %v4238_v14 = vsel %vm4190_vm11, %v4166_v16, %v4214_v50  ;;  %vm4191_vm14 = vcmp.gt.f32.partialorder %v4167_v56, 0.0  ;;  %v4215_v55 = vmul.f32 0.2, %v4167_v56 }
 0x2fc   : > { %v4262_v17 = vmax.f32 %v8782_v19, %v4238_v14  ;;  %v4241_v57 = vsel %vm4193_vm13, %v4169_v10, %v4217_v6  ;;  %v4546_v58 = vsel %vm4387_vm3, %v8806_v11, 0  ;;  %v4790_v48 = vrot.slane %v4645_v35, %v8866_v60 }
 0x2fd   : > { %v5504_v12 = vpack.c.bf16 %v4264_v32, %v4264_v32  ;;  %v4265_v5 = vmax.f32 %v8787_v53, %v4241_v57  ;;  %v4239_v13 = vsel %vm4191_vm14, %v4167_v56, %v4215_v55  ;;  %v4641_v62 = vmul.f32 %v4264_v32, %v4264_v32  ;;  %v8858_v42 = vpop.xlane.xlu1 %4647 }
 0x2fe   : > { %v5502_v24 = vpack.c.bf16 %v4262_v17, %v4262_v17  ;;  %v4263_v33 = vmax.f32 %v8792_v47, %v4239_v13  ;;  %5970 = vmatpush3.bf16.xpose.msra.mxu1 %v4546_v58  ;;  %v4639_v53 = vmul.f32 %v4262_v17, %v4262_v17  ;;  %v4654_v4 = vpop.xlane.xlu0 %4653  ;;  %v4795_v1 = vrot.slane %v8858_v42, %v8861_v9 }
 0x2ff   : > { %4385 = vst.msk [vmem:[%s8048_s12 + $0x58] sm:$0xf] %vm4362_vm12, %v5504_v12  ;;  %v5505_v34 = vpack.c.bf16 %v4265_v5, %v4265_v5  ;;  %v4709_v31 = vsel %vm4387_vm3, %v4641_v62, 0.0  ;;  %v4642_v26 = vmul.f32 %v4265_v5, %v4265_v5  ;;  %v4277_v0 = vpack.c.bf16 %v4265_v5, %v4264_v32 }
 0x300   : > { %4383 = vst.msk [vmem:[%s8048_s12 + $0x50] sm:$0xf] %vm4362_vm12, %v5502_v24  ;;  %v5503_v19 = vpack.c.bf16 %v4263_v33, %v4263_v33  ;;  %v4640_v21 = vmul.f32 %v4263_v33, %v4263_v33  ;;  %4710 = vadd.xlane.f32.xlu1 %v4709_v31  ;;  %v4276_v38 = vpack.c.bf16 %v4263_v33, %v4262_v17  ;;  %v4703_v30 = vsel %vm4387_vm3, %v4639_v53, 0.0 }
 0x301   : > { %4386 = vst.msk [vmem:[%s8048_s12 + $0x5c] sm:$0xf] %vm4362_vm12, %v5505_v34  ;;  %v4712_v15 = vsel %vm4387_vm3, %v4642_v26, 0.0  ;;  %v4552_v41 = vsel %vm4387_vm3, %v4277_v0, 0  ;;  %v8869_v27 = vpop.xlane.xlu1 %4662  ;;  %v4826_v16 = vadd.s32 4294967248, %v9341_v46  ;;  %v4833_v10 = vadd.s32 4294967240, %v9341_v46 }
 0x302   : > { %4384 = vst.msk [vmem:[%s8048_s12 + $0x54] sm:$0xf] %vm4362_vm12, %v5503_v19  ;;  %v4706_v47 = vsel %vm4387_vm3, %v4640_v21, 0.0  ;;  %5995 = vmatprep.subr.msk.bf16.mxu1 %vm4387_vm3, %v4276_v38  ;;  %v4549_v45 = vsel %vm4387_vm3, %v4276_v38, 0  ;;  %vm4796_vm12 = vcmask 130112  }
 0x303   : > { %4707 = vadd.xlane.f32.xlu0 %v4706_v47  ;;  %v8877_v23 = vpop.xlane.xlu0 %4665  ;;  %v4797_v2 = vsel %vm4796_vm12, %v4795_v1, %v4790_v48  ;;  %v8900_v50 = vsub.s32 %v4826_v16, %v9342_v44  ;;  %v8905_v3 = vsub.s32 %v4833_v10, %v9342_v44 }
 0x304   : > { %4704 = vadd.xlane.f32.xlu1 %v4703_v30 }
 0x305   : > { %v4830_v6 = vrot.slane %v8869_v27, %v8900_v50  ;;  %v4837_v57 = vrot.slane %v8877_v23, %v8905_v3 }
 0x306   : > { %5972 = vmatpush3.bf16.xpose.msra.mxu1 %v4549_v45  ;;  %v4657_v52 = vpop.xlane.xlu1 %4656 }
 0x307   : > { %4713 = vadd.xlane.f32.xlu0 %v4712_v15  ;;  %5996 = vmatprep.subr.msk.bf16.mxu1 %vm4387_vm3, %v4277_v0  ;;  %v4816_v18 = vrot.slane %v4657_v52, %v8885_v61 }
 0x308   : > { %4689 = vadd.xlane.f32.xlu1 %v4688_v7 }
 0x30b   : > { %v4660_v39 = vpop.xlane.xlu0 %4659 }
 0x30c   : > { %v4823_v20 = vrot.slane %v4660_v39, %v8891_v40 }
 0x30e   : > { %5974 = vmatpush3.bf16.xpose.msra.mxu1 %v4552_v41 }
 0x315   : > { %5976 = vmatmul.mubr.msk.bf16.vlgmr.msra.gmra.mrb[116].mxu1 %vm4387_vm3, %v8806_v11  ;;  %v8881_v11 = vsub.s32 %v4805_v49, %v9342_v44 }
 0x316   : > { %5979 = vmatprep.mubr.msk.bf16.mxu1 %vm4387_vm3, %v4276_v38 }
 0x317   : > { %v4809_v51 = vrot.slane %v4654_v4, %v8881_v11 }
 0x31d   : > { %5980 = vmatmul.mubr.msk.bf16.gmra.mrb[120].mxu1 %vm4387_vm3, %v4277_v0  ;;  %vm4803_vm3 = vcmask 195712  }
 0x31e   : > { %v4804_v25 = vsel %vm4803_vm3, %v4802_v59, %v4797_v2 }
 0x31f   : > { %v4811_v54 = vsel %vm4810_vm15, %v4809_v51, %v4804_v25 }
 0x320   : > { %v4818_v56 = vsel %vm4817_vm0, %v4816_v18, %v4811_v54 }
 0x321   : > { %v4825_v43 = vsel %vm4824_vm1, %v4823_v20, %v4818_v56 }
 0x322   : > { %v4832_v14 = vsel %vm4831_vm2, %v4830_v6, %v4825_v43 }
 0x323   : > { %v4839_v62 = vsel %vm4838_vm4, %v4837_v57, %v4832_v14 }
 0x359   : > { %v4678_v49 = vpop.xlane.xlu1 %4677 }
 0x35a   : > { %v4857_v20 = vrot.slane %v4678_v49, %v8881_v11 }
 0x362   : > { %v5945_v32 = vpop.f32.mrb[100].mxu1 }
 0x363   : > { %v4717_v55 = vmul.f32 2.0, %v5945_v32  ;;  %v4434_v17 = vpop.f32.mrb[101].mxu1 }
 0x364   : > { %v4715_v12 = vmul.f32 2.0, %v4434_v17  ;;  %v5946_v5 = vpop.f32.mrb[102].mxu1 }
 0x365   : > { %v4741_v13 = vsub.f32 %v4717_v55, %v4651_v29  ;;  %v4718_v24 = vmul.f32 2.0, %v5946_v5  ;;  %v4437_v33 = vpop.f32.mrb[103].mxu1 }
 0x366   : > { %v4739_v58 = vsub.f32 %v4715_v12, %v4645_v35  ;;  %v4716_v34 = vmul.f32 2.0, %v4437_v33 }
 0x367   : > { %v4947_v19 = vsub.f32 %v4741_v13, %v4839_v62  ;;  %v4742_v31 = vsub.f32 %v4718_v24, %v4654_v4 }
 0x368   : > { %v4945_v21 = vsub.f32 %v4739_v58, %v4839_v62  ;;  %v4740_v53 = vsub.f32 %v4716_v34, %v8858_v42 }
 0x369   : > { %4971 = vst.msk [vmem:[%s8917_s15 + $0x10] sm:$0xff] %vm2174_vm5, %v4947_v19  ;;  %v4948_v38 = vsub.f32 %v4742_v31, %v4839_v62 }
 0x36a   : > { %4969 = vst.msk [vmem:[%s8917_s15] sm:$0xff] %vm2174_vm5, %v4945_v21  ;;  %v4946_v47 = vsub.f32 %v4740_v53, %v4839_v62  ;;  %v5949_v26 = vpop.f32.mrb[104].mxu1 }
 0x36b   : > { %4972 = vst.msk [vmem:[%s8917_s15 + $0x18] sm:$0xff] %vm2174_vm5, %v4948_v38  ;;  %v4721_v0 = vmul.f32 2.0, %v5949_v26  ;;  %v4450_v30 = vpop.f32.mrb[105].mxu1  ;;  %v8937_v28 = vpop.xlane.xlu1 %4683 }
 0x36c   : > { %4970 = vst.msk [vmem:[%s8917_s15 + $0x8] sm:$0xff] %vm2174_vm5, %v4946_v47  ;;  %v4719_v36 = vmul.f32 2.0, %v4450_v30  ;;  %v5950_v15 = vpop.f32.mrb[106].mxu1  ;;  %v4867_v32 = vrot.slane %v8937_v28, %v8891_v40 }
 0x36d   : > { %v4745_v45 = vsub.f32 %v4721_v0, %v8869_v27  ;;  %v4722_v7 = vmul.f32 2.0, %v5950_v15  ;;  %v4453_v41 = vpop.f32.mrb[107].mxu1  ;;  %v4675_v27 = vpop.xlane.xlu0 %4674 }
 0x36e   : > { %v4743_v29 = vsub.f32 %v4719_v36, %v4657_v52  ;;  %v4720_v35 = vmul.f32 2.0, %v4453_v41  ;;  %v4852_v18 = vrot.slane %v4675_v27, %v8875_v22 }
 0x36f   : > { %v4951_v46 = vsub.f32 %v4745_v45, %v4839_v62  ;;  %v4746_v8 = vsub.f32 %v4722_v7, %v8877_v23 }
 0x370   : > { %v4949_v42 = vsub.f32 %v4743_v29, %v4839_v62  ;;  %v4744_v4 = vsub.f32 %v4720_v35, %v4660_v39 }
 0x371   : > { %4975 = vst.msk [vmem:[%s8917_s15 + $0x30] sm:$0xff] %vm2174_vm5, %v4951_v46  ;;  %v4952_v44 = vsub.f32 %v4746_v8, %v4839_v62  ;;  %v4669_v48 = vpop.xlane.xlu0 %4668 }
 0x372   : > { %4973 = vst.msk [vmem:[%s8917_s15 + $0x20] sm:$0xff] %vm2174_vm5, %v4949_v42  ;;  %v4950_v63 = vsub.f32 %v4744_v4, %v4839_v62  ;;  %v4843_v51 = vrot.slane %v4669_v48, %v8866_v60 }
 0x373   : > { %4976 = vst.msk [vmem:[%s8917_s15 + $0x38] sm:$0xff] %vm2174_vm5, %v4952_v44 }
 0x374   : > { %4974 = vst.msk [vmem:[%s8917_s15 + $0x28] sm:$0xff] %vm2174_vm5, %v4950_v63 }
 0x375   : > { %v4672_v37 = vpop.xlane.xlu0 %4671 }
 0x376   : > { %v4847_v59 = vrot.slane %v4672_v37, %v8861_v9 }
 0x378   : > { %v4848_v25 = vsel %vm4796_vm12, %v4847_v59, %v4843_v51 }
 0x379   : > { %v4687_v2 = vpop.xlane.xlu0 %4686  ;;  %v4853_v54 = vsel %vm4803_vm3, %v4852_v18, %v4848_v25 }
 0x37a   : > { %v4858_v56 = vsel %vm4810_vm15, %v4857_v20, %v4853_v54  ;;  %v4872_v57 = vrot.slane %v4687_v2, %v8900_v50 }
 0x37d   : > { %v4681_v16 = vpop.xlane.xlu0 %4680 }
 0x37e   : > { %v4862_v10 = vrot.slane %v4681_v16, %v8885_v61 }
 0x380   : > { %v8939_v1 = vpop.xlane.xlu1 %4698  ;;  %v4863_v43 = vsel %vm4817_vm0, %v4862_v10, %v4858_v56 }
 0x381   : > { %v4868_v14 = vsel %vm4824_vm1, %v4867_v32, %v4863_v43 }
 0x382   : > { %v4873_v33 = vsel %vm4831_vm2, %v4872_v57, %v4868_v14 }
 0x384   : > { %v8941_v23 = vpop.xlane.xlu1 %4692 }
 0x385   : > { %v4882_v51 = vrot.slane %v8941_v23, %v8866_v60 }
 0x38d   : > { %v8943_v52 = vpop.xlane.xlu1 %4710 }
 0x391   : > { %v8949_v39 = vpop.xlane.xlu1 %4704 }
 0x392   : > { %v4901_v54 = vrot.slane %v8949_v39, %v8885_v61 }
 0x395   : > { %v4690_v6 = vpop.xlane.xlu1 %4689 }
 0x396   : > { %v4877_v55 = vrot.slane %v4690_v6, %v8905_v3 }
 0x398   : > { %v4878_v19 = vsel %vm4838_vm4, %v4877_v55, %v4873_v33 }
 0x3bf   : > { %v5961_v17 = vpop.f32.mrb[108].mxu1 }
 0x3c0   : > { %v4725_v12 = vmul.f32 2.0, %v5961_v17  ;;  %v4511_v5 = vpop.f32.mrb[109].mxu1 }
 0x3c1   : > { %v4723_v13 = vmul.f32 2.0, %v4511_v5  ;;  %v5962_v24 = vpop.f32.mrb[110].mxu1 }
 0x3c2   : > { %v4749_v62 = vsub.f32 %v4725_v12, %v4675_v27  ;;  %v4726_v58 = vmul.f32 2.0, %v5962_v24  ;;  %v4514_v34 = vpop.f32.mrb[111].mxu1 }
 0x3c3   : > { %v4747_v31 = vsub.f32 %v4723_v13, %v4669_v48  ;;  %v4724_v21 = vmul.f32 2.0, %v4514_v34 }
 0x3c4   : > { %v4955_v53 = vsub.f32 %v4749_v62, %v4878_v19  ;;  %v4750_v38 = vsub.f32 %v4726_v58, %v4678_v49 }
 0x3c5   : > { %v4953_v47 = vsub.f32 %v4747_v31, %v4878_v19  ;;  %v4748_v26 = vsub.f32 %v4724_v21, %v4672_v37  ;;  %v4702_v37 = vpop.xlane.xlu0 %4701 }
 0x3c6   : > { %4979 = vst.msk [vmem:[%s8917_s15 + $0x50] sm:$0xff] %vm2174_vm5, %v4955_v53  ;;  %v4956_v0 = vsub.f32 %v4750_v38, %v4878_v19  ;;  %v4896_v10 = vrot.slane %v4702_v37, %v8881_v11 }
 0x3c7   : > { %4977 = vst.msk [vmem:[%s8917_s15 + $0x40] sm:$0xff] %vm2174_vm5, %v4953_v47  ;;  %v4954_v30 = vsub.f32 %v4748_v26, %v4878_v19  ;;  %v5965_v36 = vpop.f32.mrb[112].mxu1 }
 0x3c8   : > { %4980 = vst.msk [vmem:[%s8917_s15 + $0x58] sm:$0xff] %vm2174_vm5, %v4956_v0  ;;  %v4729_v15 = vmul.f32 2.0, %v5965_v36  ;;  %v4527_v45 = vpop.f32.mrb[113].mxu1 }
 0x3c9   : > { %4978 = vst.msk [vmem:[%s8917_s15 + $0x48] sm:$0xff] %vm2174_vm5, %v4954_v30  ;;  %v4727_v7 = vmul.f32 2.0, %v4527_v45  ;;  %v5966_v41 = vpop.f32.mrb[114].mxu1 }
 0x3ca   : > { %v4753_v29 = vsub.f32 %v4729_v15, %v4687_v2  ;;  %v4730_v35 = vmul.f32 2.0, %v5966_v41  ;;  %v4530_v46 = vpop.f32.mrb[115].mxu1  ;;  %v4696_v2 = vpop.xlane.xlu0 %4695 }
 0x3cb   : > { %v4751_v8 = vsub.f32 %v4727_v7, %v4681_v16  ;;  %v4728_v42 = vmul.f32 2.0, %v4530_v46  ;;  %v4886_v59 = vrot.slane %v4696_v2, %v8861_v9 }
 0x3cc   : > { %v4959_v4 = vsub.f32 %v4753_v29, %v4878_v19  ;;  %v4754_v44 = vsub.f32 %v4730_v35, %v4690_v6 }
 0x3cd   : > { %v4957_v63 = vsub.f32 %v4751_v8, %v4878_v19  ;;  %v4752_v49 = vsub.f32 %v4728_v42, %v8937_v28  ;;  %v4887_v25 = vsel %vm4796_vm12, %v4886_v59, %v4882_v51  ;;  %v4891_v28 = vrot.slane %v8939_v1, %v8875_v22 }
 0x3ce   : > { %4983 = vst.msk [vmem:[%s8917_s15 + $0x70] sm:$0xff] %vm2174_vm5, %v4959_v4  ;;  %v4960_v27 = vsub.f32 %v4754_v44, %v4878_v19  ;;  %v4708_v18 = vpop.xlane.xlu0 %4707  ;;  %v4911_v22 = vrot.slane %v8943_v52, %v8900_v50 }
 0x3cf   : > { %4981 = vst.msk [vmem:[%s8917_s15 + $0x60] sm:$0xff] %vm2174_vm5, %v4957_v63  ;;  %v4958_v48 = vsub.f32 %v4752_v49, %v4878_v19  ;;  %v4892_v16 = vsel %vm4803_vm3, %v4891_v28, %v4887_v25  ;;  %v4906_v56 = vrot.slane %v4708_v18, %v8891_v40 }
 0x3d0   : > { %4984 = vst.msk [vmem:[%s8917_s15 + $0x78] sm:$0xff] %vm2174_vm5, %v4960_v27  ;;  %v4897_v20 = vsel %vm4810_vm15, %v4896_v10, %v4892_v16 }
 0x3d1   : > { %4982 = vst.msk [vmem:[%s8917_s15 + $0x68] sm:$0xff] %vm2174_vm5, %v4958_v48  ;;  %v4902_v9 = vsel %vm4817_vm0, %v4901_v54, %v4897_v20 }
 0x3d2   : > { %v4714_v60 = vpop.xlane.xlu0 %4713  ;;  %v4907_v43 = vsel %vm4824_vm1, %v4906_v56, %v4902_v9 }
 0x3d3   : > { %v4916_v6 = vrot.slane %v4714_v60, %v8905_v3  ;;  %v4912_v61 = vsel %vm4831_vm2, %v4911_v22, %v4907_v43 }
 0x3d5   : > { %v4917_v5 = vsel %vm4838_vm4, %v4916_v6, %v4912_v61 }
 0x3e8   : > { %v5977_v32 = vpop.f32.mrb[116].mxu1 }
 0x3e9   : > { %v4733_v14 = vmul.f32 2.0, %v5977_v32  ;;  %v4588_v11 = vpop.f32.mrb[117].mxu1 }
 0x3ea   : > { %v4731_v55 = vmul.f32 2.0, %v4588_v11  ;;  %v5978_v17 = vpop.f32.mrb[118].mxu1 }
 0x3eb   : > { %v4757_v40 = vsub.f32 %v4733_v14, %v8939_v1  ;;  %v4734_v57 = vmul.f32 2.0, %v5978_v17  ;;  %v4591_v12 = vpop.f32.mrb[119].mxu1 }
 0x3ec   : > { %v4755_v50 = vsub.f32 %v4731_v55, %v8941_v23  ;;  %v4732_v3 = vmul.f32 2.0, %v4591_v12 }
 0x3ed   : > { %v4963_v13 = vsub.f32 %v4757_v40, %v4917_v5  ;;  %v4758_v24 = vsub.f32 %v4734_v57, %v4702_v37 }
 0x3ee   : > { %v4961_v33 = vsub.f32 %v4755_v50, %v4917_v5  ;;  %v4756_v62 = vsub.f32 %v4732_v3, %v4696_v2 }
 0x3ef   : > { %4987 = vst.msk [vmem:[%s8917_s15 + $0x90] sm:$0xff] %vm2174_vm5, %v4963_v13  ;;  %v4964_v58 = vsub.f32 %v4758_v24, %v4917_v5 }
 0x3f0   : > { %4985 = vst.msk [vmem:[%s8917_s15 + $0x80] sm:$0xff] %vm2174_vm5, %v4961_v33  ;;  %v4962_v1 = vsub.f32 %v4756_v62, %v4917_v5  ;;  %v5981_v34 = vpop.f32.mrb[120].mxu1 }
 0x3f1   : > { %4988 = vst.msk [vmem:[%s8917_s15 + $0x98] sm:$0xff] %vm2174_vm5, %v4964_v58  ;;  %v4737_v19 = vmul.f32 2.0, %v5981_v34  ;;  %v4604_v31 = vpop.f32.mrb[121].mxu1 }
 0x3f2   : > { %4986 = vst.msk [vmem:[%s8917_s15 + $0x88] sm:$0xff] %vm2174_vm5, %v4962_v1  ;;  %v4735_v23 = vmul.f32 2.0, %v4604_v31  ;;  %v5982_v21 = vpop.f32.mrb[122].mxu1 }
 0x3f3   : > { %v4761_v53 = vsub.f32 %v4737_v19, %v8943_v52  ;;  %v4738_v38 = vmul.f32 2.0, %v5982_v21  ;;  %v4607_v47 = vpop.f32.mrb[123].mxu1 }
 0x3f4   : > { %v4759_v26 = vsub.f32 %v4735_v23, %v8949_v39  ;;  %v4736_v0 = vmul.f32 2.0, %v4607_v47 }
 0x3f5   : > { %v4967_v30 = vsub.f32 %v4761_v53, %v4917_v5  ;;  %v4762_v36 = vsub.f32 %v4738_v38, %v4714_v60 }
 0x3f6   : > { %v4965_v15 = vsub.f32 %v4759_v26, %v4917_v5  ;;  %v4760_v45 = vsub.f32 %v4736_v0, %v4708_v18 }
 0x3f7   : > { %4991 = vst.msk [vmem:[%s8917_s15 + $0xb0] sm:$0xff] %vm2174_vm5, %v4967_v30  ;;  %v4968_v7 = vsub.f32 %v4762_v36, %v4917_v5 }
 0x3f8   : > { %4989 = vst.msk [vmem:[%s8917_s15 + $0xa0] sm:$0xff] %vm2174_vm5, %v4965_v15  ;;  %v4966_v52 = vsub.f32 %v4760_v45, %v4917_v5 }
 0x3f9   : > { %4992 = vst.msk [vmem:[%s8917_s15 + $0xb8] sm:$0xff] %vm2174_vm5, %v4968_v7 }
 0x3fa   : > { %4990 = vst.msk [vmem:[%s8917_s15 + $0xa8] sm:$0xff] %vm2174_vm5, %v4966_v52 }
 0x3fb   : > { %6056 = shalt.err (!%p6053_p3)
}
 0x3fc   : > { %s6057_s10 = scalar_lea.hbm %s9022_s25, 3072  ;;  %s6061_s13 = scalar_lea.hbm %s9077_s6, 6144 }
 0x3fd   : > { %p6058_p4 = scmp.ne.s32.totalorder %s9022_s25, %s6057_s10  ;;  %p6062_p9 = scmp.lt.u32.totalorder %s9022_s25, %s9077_s6 }
 0x3fe   : > { %p6063_p10 = scmp.lt.u32.totalorder %s6061_s13, %s6057_s10  ;;  %p6065_p12 = scmp.lt.u32.totalorder %s6057_s10, %s9022_s25 }
 0x3ff   : > { %p6059_p7 = pnand %p6058_p4, %p6185_p5 }
 0x400   : > { %p6064_p11 = por %p6063_p10, %p6062_p9 }
 0x401   : > { %p6060_p8 = pneg %p6059_p7 }
 0x402   : > { %p6066_p13 = por %p6065_p12, %p6064_p11 }
 0x404   : > { %p6067_p0 = pnand %p6066_p13, %p6060_p8 }
 0x406   : > { %6070 = shalt.err (!%p6067_p0)
}
 0x407   : > { %s6110_s16 = smov 128   ;;  %s6111_s18 = smov 8  }
 0x408   : > { %5998 = dma.vmem_to_hbm [thread:$0]  (%p6185_p5), %s9015_s17, 3072, %s9022_s25, %s9030_s20, %s6110_s16, %s6110_s16, %s6111_s18  }
 0x409 PF: > { %p6004_p1 = scmp.ge.s32.totalorder %s6105_s24, 2  ;;  %s5042_s19 = sand.u32 1, %s6093_s21  }
 0x40a   : > { %s5043_s26 = scalar_lea.sflag [#allocation3], %s5042_s19 }
 0x40b   : > { %p6001_p2 = pnand %p6004_p1, %p6189_p6 }
 0x40d   : > { %6088 = dma.done.wait (!%p6001_p2), %s5043_s26, 3072  }
 0x40e   : > { %6090 = vsyncadd (!%p6001_p2), %s5043_s26, 4294964224  ;;  %p17_p3 = scmp.ge.s32.totalorder %s6172_s27, 4   ;;  %s9343_s21 = smov %s6097_s22 }
 0x40f   : > { %s9344_s22 = smov %s6101_s23  ;;  %s9345_s23 = smov %s6183_s30 }
 0x410   : > { %s9346_s24 = smov %s6172_s27  ;;  %19 = sbr.rel (!%p17_p3) target bundleno = 3 (0x3), region = 90 }
 0x417   :  { %5048 = vsyncpa [#allocation3], 1 }
 0x418   :  { %5050 = vsyncpa [#allocation3 + $0x1], 1 }

</bundles_post_ra>
